<compile_context>
chip_gen: v7x
topology: tpu7x:2x2x1
jax: 0.10.0
libtpu: 0.0.40
codegen_flags: <defaults>
</compile_context>

<pallas_src>
import functools

import jax
import jax.numpy as jnp
from jax.experimental import pallas as pl
from jax.experimental.pallas import tpu as pltpu

EPS = 1e-5      # PyTorch BatchNorm2d default eps
LANE = 128      # TPU lane width


def _round_up(x, m):
    return (x + m - 1) // m * m


def _vmem_limit_bytes():
    # Generation-aware cap: ~3/4 of physical VMEM (48 MiB on v7x's 64 MiB,
    # 96 MiB on v5e/v6e's 128 MiB).  Conservative fallback if the query fails.
    try:
        cap = int(pltpu.get_tpu_info().vmem_capacity_bytes)
    except Exception:
        cap = 64 * 1024 * 1024
    return int(min(100 * 1024 * 1024, cap * 3 // 4))


# ------------------------------ glue helpers ------------------------------- #

def _phase_planes(x_nhwc, stride, ho, wo, cin_p):
    """Spatially zero-pad by 1, pad channels to cin_p (lane width) and
    decompose into stride*stride phase planes so every 3x3 tap (and the
    stride-s identity sample) becomes a CONTIGUOUS slice inside the kernel.

    plane[ph, pw][i, j] = xpad[stride*i + ph, stride*j + pw]
    Returns (N * stride * stride, hh, wh, cin_p), image-major, plane index
    ph*stride + pw.  Total size ~= input size (no 9x blow-up).
    """
    n, h, w, c = x_nhwc.shape
    xp = jnp.pad(x_nhwc, ((0, 0), (1, 1), (1, 1), (0, cin_p - c)))
    a = 2 // stride
    hh, wh = ho + a, wo + a
    planes = []
    for ph in range(stride):
        for pw in range(stride):
            p = xp[:, ph:ph + stride * hh:stride, pw:pw + stride * wh:stride, :]
            p = jnp.pad(p, ((0, 0), (0, hh - p.shape[1]),
                            (0, wh - p.shape[2]), (0, 0)))
            planes.append(p)
    out = jnp.stack(planes, axis=1)                  # (N, s*s, hh, wh, cin_p)
    return out.reshape(n * stride * stride, hh, wh, cin_p)


def _pad_conv_w(w, cin_p, cout_p):
    """(3,3,cin,cout) -> (9, cin_p, cout_p), zero padded."""
    _, _, ci, co = w.shape
    wp = jnp.pad(w, ((0, 0), (0, 0), (0, cin_p - ci), (0, cout_p - co)))
    return wp.reshape(9, cin_p, cout_p)


def _pad_vec(v, n):
    return jnp.pad(v.astype(jnp.float32), (0, n - v.shape[0]))


def _bn_scale_shift(s_sum, s_sumsq, count, gamma, beta):
    """Finalize biased batch stats into a per-channel (scale, shift) pair.

    Invariant: padded channels carry gamma=beta=0 and zero sums, so they
    finalize to scale=shift=0 (no NaNs, no contribution).  `count` is the
    true number of pixels (no padded rows exist in this layout).
    TODO(synk): E[x^2]-E[x]^2 in f32 can cancel for very large M with a large
    mean/std ratio; per-tile mean-shifted accumulation would be more robust.
    """
    mean = s_sum / count
    var = jnp.maximum(s_sumsq / count - mean * mean, 0.0)
    scale = gamma * jax.lax.rsqrt(var + EPS)
    shift = beta - mean * scale
    return jnp.stack([scale, shift], axis=0)          # (2, Cp) f32


# ----------------------------- Pallas kernels ------------------------------ #

def _make_conv1_kernel(stride, ho, wo):
    """3x3 conv (stride s) via 9 accumulating MXU dots over in-VMEM tap
    slices of the phase-decomposed input; emits raw z1 + per-image stats."""
    def kernel(xp_ref, w_ref, z_ref, st_ref, acc_ref):
        acc_ref[...] = jnp.zeros_like(acc_ref)
        for kh in range(3):
            for kw in range(3):
                ph, ah = kh % stride, kh // stride
                pw, aw = kw % stride, kw // stride
                tap = xp_ref[ph * stride + pw, ah:ah + ho, aw:aw + wo, :]
                tap = tap.reshape(ho * wo, tap.shape[-1])
                acc_ref[...] += jnp.dot(tap, w_ref[kh * 3 + kw],
                                        preferred_element_type=jnp.float32)
        acc = acc_ref[...]
        z_ref[0] = acc.astype(z_ref.dtype)
        st_ref[0, 0:1, :] = jnp.sum(acc, axis=0, keepdims=True)
        st_ref[0, 1:2, :] = jnp.sum(acc * acc, axis=0, keepdims=True)
    return kernel


def _conv2_accumulate(z1_ref, ss1_ref, w2_ref, ybuf, acc_ref, *, ho, wo, cdt):
    """Fused BN1+ReLU on raw z1, scatter into a zero-bordered VMEM halo
    buffer, then stride-1 3x3 conv as 9 accumulating MXU dots."""
    cp = acc_ref.shape[-1]
    ss = ss1_ref[...]                                          # (2, Cp) f32
    y1 = jnp.maximum(z1_ref[0].astype(jnp.float32) * ss[0:1, :] + ss[1:2, :],
                     0.0)                                      # (rows, Cp) f32
    ybuf[...] = jnp.zeros_like(ybuf)       # border := 0 every step (safe under
    ybuf[1:ho + 1, 1:wo + 1, :] = y1.reshape(ho, wo, cp)       # megacore split)
    acc_ref[...] = jnp.zeros_like(acc_ref)
    for kh in range(3):
        for kw in range(3):
            tap = ybuf[kh:kh + ho, kw:kw + wo, :]
            tap = tap.reshape(ho * wo, cp).astype(cdt)
            acc_ref[...] += jnp.dot(tap, w2_ref[kh * 3 + kw],
                                    preferred_element_type=jnp.float32)
    return acc_ref[...]


def _make_conv2_proj_kernel(stride, ho, wo, cdt):
    """Stage-2 conv fused with the 1x1 projection shortcut matmul; the
    shortcut input is the in-kernel slice of its single phase plane."""
    a = 1 // stride      # identity sample offset inside its phase plane

    def kernel(z1_ref, ss1_ref, xid_ref, w2_ref, wsc_ref,
               z2_ref, sc_ref, st_ref, ybuf, acc_ref):
        acc = _conv2_accumulate(z1_ref, ss1_ref, w2_ref, ybuf, acc_ref,
                                ho=ho, wo=wo, cdt=cdt)
        idn = xid_ref[0, a:a + ho, a:a + wo, :]
        idn = idn.reshape(ho * wo, idn.shape[-1])
        sc = jnp.dot(idn, wsc_ref[...], preferred_element_type=jnp.float32)
        z2_ref[0] = acc.astype(z2_ref.dtype)
        sc_ref[0] = sc.astype(sc_ref.dtype)
        st_ref[0, 0:1, :] = jnp.sum(acc, axis=0, keepdims=True)
        st_ref[0, 1:2, :] = jnp.sum(acc * acc, axis=0, keepdims=True)
        st_ref[0, 2:3, :] = jnp.sum(sc, axis=0, keepdims=True)
        st_ref[0, 3:4, :] = jnp.sum(sc * sc, axis=0, keepdims=True)
    return kernel


def _make_conv2_id_kernel(ho, wo, cdt):
    def kernel(z1_ref, ss1_ref, w2_ref, z2_ref, st_ref, ybuf, acc_ref):
        acc = _conv2_accumulate(z1_ref, ss1_ref, w2_ref, ybuf, acc_ref,
                                ho=ho, wo=wo, cdt=cdt)
        z2_ref[0] = acc.astype(z2_ref.dtype)
        st_ref[0, 0:1, :] = jnp.sum(acc, axis=0, keepdims=True)
        st_ref[0, 1:2, :] = jnp.sum(acc * acc, axis=0, keepdims=True)
    return kernel


def _bn_add_relu_proj_kernel(z2_ref, sc_ref, ss2_ref, sssc_ref, o_ref):
    """out = relu(bn2(z2) + bn_sc(sc)) with precomputed scale/shift (f32)."""
    ss2 = ss2_ref[...]
    ssc = sssc_ref[...]
    main = z2_ref[0].astype(jnp.float32) * ss2[0:1, :] + ss2[1:2, :]
    idn = sc_ref[0].astype(jnp.float32) * ssc[0:1, :] + ssc[1:2, :]
    o_ref[0] = jnp.maximum(main + idn, 0.0).astype(o_ref.dtype)


def _make_bn_add_relu_id_kernel(ho, wo):
    """out = relu(bn2(z2) + x); identity read in-kernel from the phase array
    (stride == 1, cin == cout here, so no channel padding copy is needed)."""
    def kernel(z2_ref, xp_ref, ss2_ref, o_ref):
        ss2 = ss2_ref[...]
        idn = xp_ref[0, 1:1 + ho, 1:1 + wo, :].astype(jnp.float32)
        idn = idn.reshape(ho * wo, idn.shape[-1])
        main = z2_ref[0].astype(jnp.float32) * ss2[0:1, :] + ss2[1:2, :]
        o_ref[0] = jnp.maximum(main + idn, 0.0).astype(o_ref.dtype)
    return kernel


# ------------------------------ forward ------------------------------------ #

def resnet_block_forward(x_nchw, p, stride, *, compute_dtype=jnp.bfloat16):
    n, cin, h, w = x_nchw.shape
    cout = p["w1"].shape[-1]
    has_proj = (stride != 1) or (cin != cout)
    ho = (h - 1) // stride + 1
    wo = (w - 1) // stride + 1
    rows = ho * wo
    m = n * rows
    cp = _round_up(cout, LANE)
    cin_p = _round_up(cin, LANE)
    cdt = compute_dtype

    cparams = pltpu.CompilerParams(
        dimension_semantics=("parallel",),            # images are independent
        vmem_limit_bytes=_vmem_limit_bytes(),
    )

    x = jnp.transpose(x_nchw, (0, 2, 3, 1)).astype(jnp.float32)   # NHWC
    a_off = 2 // stride
    hh, wh = ho + a_off, wo + a_off
    s2 = stride * stride

    # Phase-decomposed, spatially padded, channel-padded input (~1x traffic).
    xph = _phase_planes(x, stride, ho, wo, cin_p).astype(cdt)
    w1p = _pad_conv_w(p["w1"], cin_p, cp).astype(cdt)
    w2p = _pad_conv_w(p["w2"], cp, cp).astype(cdt)

    row_spec = pl.BlockSpec((1, rows, cp), lambda i: (i, 0, 0))
    ss_spec = pl.BlockSpec((2, cp), lambda i: (0, 0))

    # ---- stage 1: conv1 (stride s) + per-image channel stats ----------------
    z1, st1 = pl.pallas_call(
        _make_conv1_kernel(stride, ho, wo),
        out_shape=(jax.ShapeDtypeStruct((n, rows, cp), cdt),
                   jax.ShapeDtypeStruct((n, 2, cp), jnp.float32)),
        grid=(n,),
        in_specs=[pl.BlockSpec((s2, hh, wh, cin_p), lambda i: (i, 0, 0, 0)),
                  pl.BlockSpec((9, cin_p, cp), lambda i: (0, 0, 0))],
        out_specs=(row_spec,
                   pl.BlockSpec((1, 2, cp), lambda i: (i, 0, 0))),
        scratch_shapes=[pltpu.VMEM((rows, cp), jnp.float32)],
        compiler_params=cparams,
    )(xph, w1p)

    g1, b1 = _pad_vec(p["g1"], cp), _pad_vec(p["b1"], cp)
    ss1 = _bn_scale_shift(st1[:, 0, :].sum(0), st1[:, 1, :].sum(0), m, g1, b1)
    g2, b2 = _pad_vec(p["g2"], cp), _pad_vec(p["b2"], cp)

    # ---- stage 2: fused BN1+ReLU -> conv2 [-> + 1x1 shortcut] + stats -------
    # TODO(synk): spatial H-tiling with a manual halo DMA (instead of one
    # whole image per grid step) would be needed for very large images.
    if has_proj:
        pidx = (1 % stride) * stride + (1 % stride)   # phase of the s-strided x
        wscp = jnp.pad(p["wsc"].reshape(cin, cout),
                       ((0, cin_p - cin), (0, cp - cout))).astype(cdt)
        id_spec = pl.BlockSpec((1, hh, wh, cin_p),
                               lambda i: (i * s2 + pidx, 0, 0, 0))

        z2, sc, st2 = pl.pallas_call(
            _make_conv2_proj_kernel(stride, ho, wo, cdt),
            out_shape=(jax.ShapeDtypeStruct((n, rows, cp), cdt),
                       jax.ShapeDtypeStruct((n, rows, cp), cdt),
                       jax.ShapeDtypeStruct((n, 4, cp), jnp.float32)),
            grid=(n,),
            in_specs=[row_spec,
                      ss_spec,
                      id_spec,
                      pl.BlockSpec((9, cp, cp), lambda i: (0, 0, 0)),
                      pl.BlockSpec((cin_p, cp), lambda i: (0, 0))],
            out_specs=(row_spec,
                       row_spec,
                       pl.BlockSpec((1, 4, cp), lambda i: (i, 0, 0))),
            scratch_shapes=[pltpu.VMEM((ho + 2, wo + 2, cp), jnp.float32),
                            pltpu.VMEM((rows, cp), jnp.float32)],
            compiler_params=cparams,
        )(z1, ss1, xph, w2p, wscp)

        ss2 = _bn_scale_shift(st2[:, 0, :].sum(0), st2[:, 1, :].sum(0),
                              m, g2, b2)
        gsc, bsc = _pad_vec(p["gsc"], cp), _pad_vec(p["bsc"], cp)
        sssc = _bn_scale_shift(st2[:, 2, :].sum(0), st2[:, 3, :].sum(0),
                               m, gsc, bsc)

        out = pl.pallas_call(
            _bn_add_relu_proj_kernel,
            out_shape=jax.ShapeDtypeStruct((n, rows, cp), jnp.float32),
            grid=(n,),
            in_specs=[row_spec, row_spec, ss_spec, ss_spec],
            out_specs=row_spec,
            compiler_params=cparams,
        )(z2, sc, ss2, sssc)
    else:
        z2, st2 = pl.pallas_call(
            _make_conv2_id_kernel(ho, wo, cdt),
            out_shape=(jax.ShapeDtypeStruct((n, rows, cp), cdt),
                       jax.ShapeDtypeStruct((n, 2, cp), jnp.float32)),
            grid=(n,),
            in_specs=[row_spec,
                      ss_spec,
                      pl.BlockSpec((9, cp, cp), lambda i: (0, 0, 0))],
            out_specs=(row_spec,
                       pl.BlockSpec((1, 2, cp), lambda i: (i, 0, 0))),
            scratch_shapes=[pltpu.VMEM((ho + 2, wo + 2, cp), jnp.float32),
                            pltpu.VMEM((rows, cp), jnp.float32)],
            compiler_params=cparams,
        )(z1, ss1, w2p)

        ss2 = _bn_scale_shift(st2[:, 0, :].sum(0), st2[:, 1, :].sum(0),
                              m, g2, b2)

        out = pl.pallas_call(
            _make_bn_add_relu_id_kernel(ho, wo),
            out_shape=jax.ShapeDtypeStruct((n, rows, cp), jnp.float32),
            grid=(n,),
            in_specs=[row_spec,
                      pl.BlockSpec((1, hh, wh, cin_p),
                                   lambda i: (i, 0, 0, 0)),
                      ss_spec],
            out_specs=row_spec,
            compiler_params=cparams,
        )(z2, xph, ss2)

    out = out.reshape(n, ho, wo, cp)[..., :cout]
    return jnp.transpose(out, (0, 3, 1, 2))           # back to NCHW


# -------------------------- pure-JAX reference ------------------------------ #

def _ref_forward(x_nchw, p, stride):
    x = jnp.transpose(x_nchw, (0, 2, 3, 1)).astype(jnp.float32)
    cin, cout = p["w1"].shape[2], p["w1"].shape[3]
    has_proj = (stride != 1) or (cin != cout)

    def conv(v, w, s, pad):
        return jax.lax.conv_general_dilated(
            v, w, (s, s), [(pad, pad), (pad, pad)],
            dimension_numbers=("NHWC", "HWIO", "NHWC"))

    def bn(v, g, b):
        mean = v.mean(axis=(0, 1, 2), keepdims=True)
        var = ((v - mean) ** 2).mean(axis=(0, 1, 2), keepdims=True)
        return (v - mean) * jax.lax.rsqrt(var + EPS) * g + b

    out = jax.nn.relu(bn(conv(x, p["w1"], stride, 1), p["g1"], p["b1"]))
    out = bn(conv(out, p["w2"], 1, 1), p["g2"], p["b2"])
    if has_proj:
        idn = bn(conv(x, p["wsc"], stride, 0), p["gsc"], p["bsc"])
    else:
        idn = x
    return jnp.transpose(jax.nn.relu(out + idn), (0, 3, 1, 2))


# ---------------------------------- main ------------------------------------ #

def make_params(key, cin, cout, has_proj):
    ks = jax.random.split(key, 10)
    p = {
        "w1": 0.2 * jax.random.normal(ks[0], (3, 3, cin, cout), jnp.float32),
        "g1": 1.0 + 0.1 * jax.random.normal(ks[1], (cout,), jnp.float32),
        "b1": 0.1 * jax.random.normal(ks[2], (cout,), jnp.float32),
        "w2": 0.2 * jax.random.normal(ks[3], (3, 3, cout, cout), jnp.float32),
        "g2": 1.0 + 0.1 * jax.random.normal(ks[4], (cout,), jnp.float32),
        "b2": 0.1 * jax.random.normal(ks[5], (cout,), jnp.float32),
    }
    if has_proj:
        p["wsc"] = 0.2 * jax.random.normal(ks[6], (1, 1, cin, cout), jnp.float32)
        p["gsc"] = 1.0 + 0.1 * jax.random.normal(ks[7], (cout,), jnp.float32)
        p["bsc"] = 0.1 * jax.random.normal(ks[8], (cout,), jnp.float32)
    return p


if __name__ == "__main__":
    key = jax.random.PRNGKey(0)
    k_x1, k_p1, k_x2, k_p2 = jax.random.split(key, 4)

    # --- case 1: projection shortcut (stride=2, Cin != Cout), f32 exact ------
    N, Cin, H, W, Cout, stride = 2, 4, 16, 16, 8, 2
    x1 = jax.random.normal(k_x1, (N, Cin, H, W), jnp.float32)
    p1 = make_params(k_p1, Cin, Cout, has_proj=True)
    fwd1 = jax.jit(functools.partial(resnet_block_forward, stride=stride,
                                     compute_dtype=jnp.float32))
    out1 = jax.block_until_ready(fwd1(x1, p1))
    ref1 = jax.block_until_ready(_ref_forward(x1, p1, stride))
    assert out1.shape == ref1.shape == (N, Cout, 8, 8), out1.shape
    assert jnp.allclose(out1, ref1, rtol=2e-3, atol=2e-3), \
        float(jnp.max(jnp.abs(out1 - ref1)))

    # --- case 2: identity shortcut (stride=1, Cin == Cout), f32 exact --------
    C = 8
    x2 = jax.random.normal(k_x2, (N, C, H, W), jnp.float32)
    p2 = make_params(k_p2, C, C, has_proj=False)
    fwd2 = jax.jit(functools.partial(resnet_block_forward, stride=1,
                                     compute_dtype=jnp.float32))
    out2 = jax.block_until_ready(fwd2(x2, p2))
    ref2 = jax.block_until_ready(_ref_forward(x2, p2, 1))
    assert out2.shape == ref2.shape == (N, C, H, W), out2.shape
    assert jnp.allclose(out2, ref2, rtol=2e-3, atol=2e-3), \
        float(jnp.max(jnp.abs(out2 - ref2)))

    # --- case 3: default bf16 MXU operands / bf16 intermediates --------------
    # (f32 accumulation + f32 stats; looser tolerance vs. the f32 reference.)
    fwd3 = jax.jit(functools.partial(resnet_block_forward, stride=stride))
    out3 = jax.block_until_ready(fwd3(x1, p1))
    err3 = float(jnp.max(jnp.abs(out3.astype(jnp.float32) - ref1)))
    assert err3 < 0.25, err3

    print("KERNEL_OK")
</pallas_src>

<mosaic_0001>
module attributes {stable_mosaic.version = 11 : i64} {
  func.func @kernel(%arg0: i32, %arg1: memref<4x9x9x128xf32, #tpu.memory_space<vmem>>, %arg2: memref<9x128x128xf32, #tpu.memory_space<vmem>>, %arg3: memref<1x64x128xf32, #tpu.memory_space<vmem>>, %arg4: memref<1x2x128xf32, #tpu.memory_space<vmem>>, %arg5: memref<64x128xf32, #tpu.memory_space<vmem>>) attributes {dimension_semantics = [#tpu.dimension_semantics<parallel>], iteration_bounds = array<i64: 2>, scalar_prefetch = 0 : i64, scratch_operands = 1 : i64, tpu.core_type = #tpu.core_type<tc>, window_params = [{transform_indices = @transform_0, window_bounds = array<i64: 4, 9, 9, 128>}, {pipeline_mode = #tpu.pipeline_mode<synchronous>, transform_indices = @transform_1, window_bounds = array<i64: 9, 128, 128>}, {transform_indices = @transform_2, window_bounds = array<i64: 1, 64, 128>}, {transform_indices = @transform_3, window_bounds = array<i64: 1, 2, 128>}]} {
    %cst = arith.constant 0.000000e+00 : f32
    %0 = vector.broadcast %cst : f32 to vector<64x128xf32>
    %c0 = arith.constant 0 : index
    %c0_0 = arith.constant 0 : index
    %1 = vector.load %arg5[%c0, %c0_0] : memref<64x128xf32, #tpu.memory_space<vmem>>, vector<64x128xf32>
    tpu.vector_store %arg5[%c0, %c0_0], %0 {strides = array<i32>} : memref<64x128xf32, #tpu.memory_space<vmem>>, vector<64x128xf32>,
    %c0_1 = arith.constant 0 : index
    %c0_2 = arith.constant 0 : index
    %c0_3 = arith.constant 0 : index
    %c0_4 = arith.constant 0 : index
    %2 = vector.load %arg1[%c0_1, %c0_2, %c0_3, %c0_4] : memref<4x9x9x128xf32, #tpu.memory_space<vmem>>, vector<1x8x8x128xf32>
    %3 = vector.shape_cast %2 : vector<1x8x8x128xf32> to vector<8x8x128xf32>
    %4 = vector.shape_cast %3 : vector<8x8x128xf32> to vector<64x128xf32>
    %c0_5 = arith.constant 0 : index
    %c0_6 = arith.constant 0 : index
    %5 = vector.load %arg5[%c0_5, %c0_6] : memref<64x128xf32, #tpu.memory_space<vmem>>, vector<64x128xf32>
    %c0_7 = arith.constant 0 : index
    %c0_8 = arith.constant 0 : index
    %c0_9 = arith.constant 0 : index
    %6 = vector.load %arg2[%c0_7, %c0_8, %c0_9] : memref<9x128x128xf32, #tpu.memory_space<vmem>>, vector<1x128x128xf32>
    %7 = vector.shape_cast %6 : vector<1x128x128xf32> to vector<128x128xf32>
    %cst_10 = arith.constant dense<0.000000e+00> : vector<64x128xf32>
    %8 = tpu.matmul %4, %7, %cst_10 {dimension_numbers = #tpu.dot_dimension_numbers<[1], [0], [0], [1], [0, 0, 1, 1], [], []>} : vector<64x128xf32>, vector<128x128xf32>, vector<64x128xf32> -> vector<64x128xf32>
    %9 = arith.addf %5, %8 : vector<64x128xf32>
    %c0_11 = arith.constant 0 : index
    %c0_12 = arith.constant 0 : index
    %10 = vector.load %arg5[%c0_11, %c0_12] : memref<64x128xf32, #tpu.memory_space<vmem>>, vector<64x128xf32>
    tpu.vector_store %arg5[%c0_11, %c0_12], %9 {strides = array<i32>} : memref<64x128xf32, #tpu.memory_space<vmem>>, vector<64x128xf32>,
    %c1 = arith.constant 1 : index
    %c0_13 = arith.constant 0 : index
    %c0_14 = arith.constant 0 : index
    %c0_15 = arith.constant 0 : index
    %11 = vector.load %arg1[%c1, %c0_13, %c0_14, %c0_15] : memref<4x9x9x128xf32, #tpu.memory_space<vmem>>, vector<1x8x8x128xf32>
    %12 = vector.shape_cast %11 : vector<1x8x8x128xf32> to vector<8x8x128xf32>
    %13 = vector.shape_cast %12 : vector<8x8x128xf32> to vector<64x128xf32>
    %c0_16 = arith.constant 0 : index
    %c0_17 = arith.constant 0 : index
    %14 = vector.load %arg5[%c0_16, %c0_17] : memref<64x128xf32, #tpu.memory_space<vmem>>, vector<64x128xf32>
    %c1_18 = arith.constant 1 : index
    %c0_19 = arith.constant 0 : index
    %c0_20 = arith.constant 0 : index
    %15 = vector.load %arg2[%c1_18, %c0_19, %c0_20] : memref<9x128x128xf32, #tpu.memory_space<vmem>>, vector<1x128x128xf32>
    %16 = vector.shape_cast %15 : vector<1x128x128xf32> to vector<128x128xf32>
    %cst_21 = arith.constant dense<0.000000e+00> : vector<64x128xf32>
    %17 = tpu.matmul %13, %16, %cst_21 {dimension_numbers = #tpu.dot_dimension_numbers<[1], [0], [0], [1], [0, 0, 1, 1], [], []>} : vector<64x128xf32>, vector<128x128xf32>, vector<64x128xf32> -> vector<64x128xf32>
    %18 = arith.addf %14, %17 : vector<64x128xf32>
    %c0_22 = arith.constant 0 : index
    %c0_23 = arith.constant 0 : index
    %19 = vector.load %arg5[%c0_22, %c0_23] : memref<64x128xf32, #tpu.memory_space<vmem>>, vector<64x128xf32>
    tpu.vector_store %arg5[%c0_22, %c0_23], %18 {strides = array<i32>} : memref<64x128xf32, #tpu.memory_space<vmem>>, vector<64x128xf32>,
    %c0_24 = arith.constant 0 : index
    %c0_25 = arith.constant 0 : index
    %c1_26 = arith.constant 1 : index
    %c0_27 = arith.constant 0 : index
    %20 = vector.load %arg1[%c0_24, %c0_25, %c1_26, %c0_27] : memref<4x9x9x128xf32, #tpu.memory_space<vmem>>, vector<1x8x8x128xf32>
    %21 = vector.shape_cast %20 : vector<1x8x8x128xf32> to vector<8x8x128xf32>
    %22 = vector.shape_cast %21 : vector<8x8x128xf32> to vector<64x128xf32>
    %c0_28 = arith.constant 0 : index
    %c0_29 = arith.constant 0 : index
    %23 = vector.load %arg5[%c0_28, %c0_29] : memref<64x128xf32, #tpu.memory_space<vmem>>, vector<64x128xf32>
    %c2 = arith.constant 2 : index
    %c0_30 = arith.constant 0 : index
    %c0_31 = arith.constant 0 : index
    %24 = vector.load %arg2[%c2, %c0_30, %c0_31] : memref<9x128x128xf32, #tpu.memory_space<vmem>>, vector<1x128x128xf32>
    %25 = vector.shape_cast %24 : vector<1x128x128xf32> to vector<128x128xf32>
    %cst_32 = arith.constant dense<0.000000e+00> : vector<64x128xf32>
    %26 = tpu.matmul %22, %25, %cst_32 {dimension_numbers = #tpu.dot_dimension_numbers<[1], [0], [0], [1], [0, 0, 1, 1], [], []>} : vector<64x128xf32>, vector<128x128xf32>, vector<64x128xf32> -> vector<64x128xf32>
    %27 = arith.addf %23, %26 : vector<64x128xf32>
    %c0_33 = arith.constant 0 : index
    %c0_34 = arith.constant 0 : index
    %28 = vector.load %arg5[%c0_33, %c0_34] : memref<64x128xf32, #tpu.memory_space<vmem>>, vector<64x128xf32>
    tpu.vector_store %arg5[%c0_33, %c0_34], %27 {strides = array<i32>} : memref<64x128xf32, #tpu.memory_space<vmem>>, vector<64x128xf32>,
    %c2_35 = arith.constant 2 : index
    %c0_36 = arith.constant 0 : index
    %c0_37 = arith.constant 0 : index
    %c0_38 = arith.constant 0 : index
    %29 = vector.load %arg1[%c2_35, %c0_36, %c0_37, %c0_38] : memref<4x9x9x128xf32, #tpu.memory_space<vmem>>, vector<1x8x8x128xf32>
    %30 = vector.shape_cast %29 : vector<1x8x8x128xf32> to vector<8x8x128xf32>
    %31 = vector.shape_cast %30 : vector<8x8x128xf32> to vector<64x128xf32>
    %c0_39 = arith.constant 0 : index
    %c0_40 = arith.constant 0 : index
    %32 = vector.load %arg5[%c0_39, %c0_40] : memref<64x128xf32, #tpu.memory_space<vmem>>, vector<64x128xf32>
    %c3 = arith.constant 3 : index
    %c0_41 = arith.constant 0 : index
    %c0_42 = arith.constant 0 : index
    %33 = vector.load %arg2[%c3, %c0_41, %c0_42] : memref<9x128x128xf32, #tpu.memory_space<vmem>>, vector<1x128x128xf32>
    %34 = vector.shape_cast %33 : vector<1x128x128xf32> to vector<128x128xf32>
    %cst_43 = arith.constant dense<0.000000e+00> : vector<64x128xf32>
    %35 = tpu.matmul %31, %34, %cst_43 {dimension_numbers = #tpu.dot_dimension_numbers<[1], [0], [0], [1], [0, 0, 1, 1], [], []>} : vector<64x128xf32>, vector<128x128xf32>, vector<64x128xf32> -> vector<64x128xf32>
    %36 = arith.addf %32, %35 : vector<64x128xf32>
    %c0_44 = arith.constant 0 : index
    %c0_45 = arith.constant 0 : index
    %37 = vector.load %arg5[%c0_44, %c0_45] : memref<64x128xf32, #tpu.memory_space<vmem>>, vector<64x128xf32>
    tpu.vector_store %arg5[%c0_44, %c0_45], %36 {strides = array<i32>} : memref<64x128xf32, #tpu.memory_space<vmem>>, vector<64x128xf32>,
    %c3_46 = arith.constant 3 : index
    %c0_47 = arith.constant 0 : index
    %c0_48 = arith.constant 0 : index
    %c0_49 = arith.constant 0 : index
    %38 = vector.load %arg1[%c3_46, %c0_47, %c0_48, %c0_49] : memref<4x9x9x128xf32, #tpu.memory_space<vmem>>, vector<1x8x8x128xf32>
    %39 = vector.shape_cast %38 : vector<1x8x8x128xf32> to vector<8x8x128xf32>
    %40 = vector.shape_cast %39 : vector<8x8x128xf32> to vector<64x128xf32>
    %c0_50 = arith.constant 0 : index
    %c0_51 = arith.constant 0 : index
    %41 = vector.load %arg5[%c0_50, %c0_51] : memref<64x128xf32, #tpu.memory_space<vmem>>, vector<64x128xf32>
    %c4 = arith.constant 4 : index
    %c0_52 = arith.constant 0 : index
    %c0_53 = arith.constant 0 : index
    %42 = vector.load %arg2[%c4, %c0_52, %c0_53] : memref<9x128x128xf32, #tpu.memory_space<vmem>>, vector<1x128x128xf32>
    %43 = vector.shape_cast %42 : vector<1x128x128xf32> to vector<128x128xf32>
    %cst_54 = arith.constant dense<0.000000e+00> : vector<64x128xf32>
    %44 = tpu.matmul %40, %43, %cst_54 {dimension_numbers = #tpu.dot_dimension_numbers<[1], [0], [0], [1], [0, 0, 1, 1], [], []>} : vector<64x128xf32>, vector<128x128xf32>, vector<64x128xf32> -> vector<64x128xf32>
    %45 = arith.addf %41, %44 : vector<64x128xf32>
    %c0_55 = arith.constant 0 : index
    %c0_56 = arith.constant 0 : index
    %46 = vector.load %arg5[%c0_55, %c0_56] : memref<64x128xf32, #tpu.memory_space<vmem>>, vector<64x128xf32>
    tpu.vector_store %arg5[%c0_55, %c0_56], %45 {strides = array<i32>} : memref<64x128xf32, #tpu.memory_space<vmem>>, vector<64x128xf32>,
    %c2_57 = arith.constant 2 : index
    %c0_58 = arith.constant 0 : index
    %c1_59 = arith.constant 1 : index
    %c0_60 = arith.constant 0 : index
    %47 = vector.load %arg1[%c2_57, %c0_58, %c1_59, %c0_60] : memref<4x9x9x128xf32, #tpu.memory_space<vmem>>, vector<1x8x8x128xf32>
    %48 = vector.shape_cast %47 : vector<1x8x8x128xf32> to vector<8x8x128xf32>
    %49 = vector.shape_cast %48 : vector<8x8x128xf32> to vector<64x128xf32>
    %c0_61 = arith.constant 0 : index
    %c0_62 = arith.constant 0 : index
    %50 = vector.load %arg5[%c0_61, %c0_62] : memref<64x128xf32, #tpu.memory_space<vmem>>, vector<64x128xf32>
    %c5 = arith.constant 5 : index
    %c0_63 = arith.constant 0 : index
    %c0_64 = arith.constant 0 : index
    %51 = vector.load %arg2[%c5, %c0_63, %c0_64] : memref<9x128x128xf32, #tpu.memory_space<vmem>>, vector<1x128x128xf32>
    %52 = vector.shape_cast %51 : vector<1x128x128xf32> to vector<128x128xf32>
    %cst_65 = arith.constant dense<0.000000e+00> : vector<64x128xf32>
    %53 = tpu.matmul %49, %52, %cst_65 {dimension_numbers = #tpu.dot_dimension_numbers<[1], [0], [0], [1], [0, 0, 1, 1], [], []>} : vector<64x128xf32>, vector<128x128xf32>, vector<64x128xf32> -> vector<64x128xf32>
    %54 = arith.addf %50, %53 : vector<64x128xf32>
    %c0_66 = arith.constant 0 : index
    %c0_67 = arith.constant 0 : index
    %55 = vector.load %arg5[%c0_66, %c0_67] : memref<64x128xf32, #tpu.memory_space<vmem>>, vector<64x128xf32>
    tpu.vector_store %arg5[%c0_66, %c0_67], %54 {strides = array<i32>} : memref<64x128xf32, #tpu.memory_space<vmem>>, vector<64x128xf32>,
    %c0_68 = arith.constant 0 : index
    %c1_69 = arith.constant 1 : index
    %c0_70 = arith.constant 0 : index
    %c0_71 = arith.constant 0 : index
    %56 = vector.load %arg1[%c0_68, %c1_69, %c0_70, %c0_71] : memref<4x9x9x128xf32, #tpu.memory_space<vmem>>, vector<1x8x8x128xf32>
    %57 = vector.shape_cast %56 : vector<1x8x8x128xf32> to vector<8x8x128xf32>
    %58 = vector.shape_cast %57 : vector<8x8x128xf32> to vector<64x128xf32>
    %c0_72 = arith.constant 0 : index
    %c0_73 = arith.constant 0 : index
    %59 = vector.load %arg5[%c0_72, %c0_73] : memref<64x128xf32, #tpu.memory_space<vmem>>, vector<64x128xf32>
    %c6 = arith.constant 6 : index
    %c0_74 = arith.constant 0 : index
    %c0_75 = arith.constant 0 : index
    %60 = vector.load %arg2[%c6, %c0_74, %c0_75] : memref<9x128x128xf32, #tpu.memory_space<vmem>>, vector<1x128x128xf32>
    %61 = vector.shape_cast %60 : vector<1x128x128xf32> to vector<128x128xf32>
    %cst_76 = arith.constant dense<0.000000e+00> : vector<64x128xf32>
    %62 = tpu.matmul %58, %61, %cst_76 {dimension_numbers = #tpu.dot_dimension_numbers<[1], [0], [0], [1], [0, 0, 1, 1], [], []>} : vector<64x128xf32>, vector<128x128xf32>, vector<64x128xf32> -> vector<64x128xf32>
    %63 = arith.addf %59, %62 : vector<64x128xf32>
    %c0_77 = arith.constant 0 : index
    %c0_78 = arith.constant 0 : index
    %64 = vector.load %arg5[%c0_77, %c0_78] : memref<64x128xf32, #tpu.memory_space<vmem>>, vector<64x128xf32>
    tpu.vector_store %arg5[%c0_77, %c0_78], %63 {strides = array<i32>} : memref<64x128xf32, #tpu.memory_space<vmem>>, vector<64x128xf32>,
    %c1_79 = arith.constant 1 : index
    %c1_80 = arith.constant 1 : index
    %c0_81 = arith.constant 0 : index
    %c0_82 = arith.constant 0 : index
    %65 = vector.load %arg1[%c1_79, %c1_80, %c0_81, %c0_82] : memref<4x9x9x128xf32, #tpu.memory_space<vmem>>, vector<1x8x8x128xf32>
    %66 = vector.shape_cast %65 : vector<1x8x8x128xf32> to vector<8x8x128xf32>
    %67 = vector.shape_cast %66 : vector<8x8x128xf32> to vector<64x128xf32>
    %c0_83 = arith.constant 0 : index
    %c0_84 = arith.constant 0 : index
    %68 = vector.load %arg5[%c0_83, %c0_84] : memref<64x128xf32, #tpu.memory_space<vmem>>, vector<64x128xf32>
    %c7 = arith.constant 7 : index
    %c0_85 = arith.constant 0 : index
    %c0_86 = arith.constant 0 : index
    %69 = vector.load %arg2[%c7, %c0_85, %c0_86] : memref<9x128x128xf32, #tpu.memory_space<vmem>>, vector<1x128x128xf32>
    %70 = vector.shape_cast %69 : vector<1x128x128xf32> to vector<128x128xf32>
    %cst_87 = arith.constant dense<0.000000e+00> : vector<64x128xf32>
    %71 = tpu.matmul %67, %70, %cst_87 {dimension_numbers = #tpu.dot_dimension_numbers<[1], [0], [0], [1], [0, 0, 1, 1], [], []>} : vector<64x128xf32>, vector<128x128xf32>, vector<64x128xf32> -> vector<64x128xf32>
    %72 = arith.addf %68, %71 : vector<64x128xf32>
    %c0_88 = arith.constant 0 : index
    %c0_89 = arith.constant 0 : index
    %73 = vector.load %arg5[%c0_88, %c0_89] : memref<64x128xf32, #tpu.memory_space<vmem>>, vector<64x128xf32>
    tpu.vector_store %arg5[%c0_88, %c0_89], %72 {strides = array<i32>} : memref<64x128xf32, #tpu.memory_space<vmem>>, vector<64x128xf32>,
    %c0_90 = arith.constant 0 : index
    %c1_91 = arith.constant 1 : index
    %c1_92 = arith.constant 1 : index
    %c0_93 = arith.constant 0 : index
    %74 = vector.load %arg1[%c0_90, %c1_91, %c1_92, %c0_93] : memref<4x9x9x128xf32, #tpu.memory_space<vmem>>, vector<1x8x8x128xf32>
    %75 = vector.shape_cast %74 : vector<1x8x8x128xf32> to vector<8x8x128xf32>
    %76 = vector.shape_cast %75 : vector<8x8x128xf32> to vector<64x128xf32>
    %c0_94 = arith.constant 0 : index
    %c0_95 = arith.constant 0 : index
    %77 = vector.load %arg5[%c0_94, %c0_95] : memref<64x128xf32, #tpu.memory_space<vmem>>, vector<64x128xf32>
    %c8 = arith.constant 8 : index
    %c0_96 = arith.constant 0 : index
    %c0_97 = arith.constant 0 : index
    %78 = vector.load %arg2[%c8, %c0_96, %c0_97] : memref<9x128x128xf32, #tpu.memory_space<vmem>>, vector<1x128x128xf32>
    %79 = vector.shape_cast %78 : vector<1x128x128xf32> to vector<128x128xf32>
    %cst_98 = arith.constant dense<0.000000e+00> : vector<64x128xf32>
    %80 = tpu.matmul %76, %79, %cst_98 {dimension_numbers = #tpu.dot_dimension_numbers<[1], [0], [0], [1], [0, 0, 1, 1], [], []>} : vector<64x128xf32>, vector<128x128xf32>, vector<64x128xf32> -> vector<64x128xf32>
    %81 = arith.addf %77, %80 : vector<64x128xf32>
    %c0_99 = arith.constant 0 : index
    %c0_100 = arith.constant 0 : index
    %82 = vector.load %arg5[%c0_99, %c0_100] : memref<64x128xf32, #tpu.memory_space<vmem>>, vector<64x128xf32>
    tpu.vector_store %arg5[%c0_99, %c0_100], %81 {strides = array<i32>} : memref<64x128xf32, #tpu.memory_space<vmem>>, vector<64x128xf32>,
    %c0_101 = arith.constant 0 : index
    %c0_102 = arith.constant 0 : index
    %83 = vector.load %arg5[%c0_101, %c0_102] : memref<64x128xf32, #tpu.memory_space<vmem>>, vector<64x128xf32>
    %c0_103 = arith.constant 0 : index
    %c0_104 = arith.constant 0 : index
    %c0_105 = arith.constant 0 : index
    %84 = vector.load %arg3[%c0_103, %c0_104, %c0_105] : memref<1x64x128xf32, #tpu.memory_space<vmem>>, vector<1x64x128xf32>
    %85 = vector.shape_cast %84 : vector<1x64x128xf32> to vector<64x128xf32>
    %86 = vector.shape_cast %83 : vector<64x128xf32> to vector<1x64x128xf32>
    tpu.vector_store %arg3[%c0_103, %c0_104, %c0_105], %86 {strides = array<i32>} : memref<1x64x128xf32, #tpu.memory_space<vmem>>, vector<1x64x128xf32>,
    %cst_106 = arith.constant dense<0.000000e+00> : vector<128xf32>
    %87 = vector.multi_reduction <add>, %83, %cst_106 [0] : vector<64x128xf32> to vector<128xf32>
    %88 = vector.shape_cast %87 : vector<128xf32> to vector<1x128xf32>
    %c0_107 = arith.constant 0 : index
    %c0_108 = arith.constant 0 : index
    %c0_109 = arith.constant 0 : index
    %89 = vector.load %arg4[%c0_107, %c0_108, %c0_109] : memref<1x2x128xf32, #tpu.memory_space<vmem>>, vector<1x1x128xf32>
    %90 = vector.shape_cast %89 : vector<1x1x128xf32> to vector<1x128xf32>
    %91 = vector.shape_cast %88 : vector<1x128xf32> to vector<1x1x128xf32>
    tpu.vector_store %arg4[%c0_107, %c0_108, %c0_109], %91 {strides = array<i32>} : memref<1x2x128xf32, #tpu.memory_space<vmem>>, vector<1x1x128xf32>,
    %92 = arith.mulf %83, %83 : vector<64x128xf32>
    %cst_110 = arith.constant dense<0.000000e+00> : vector<128xf32>
    %93 = vector.multi_reduction <add>, %92, %cst_110 [0] : vector<64x128xf32> to vector<128xf32>
    %94 = vector.shape_cast %93 : vector<128xf32> to vector<1x128xf32>
    %c0_111 = arith.constant 0 : index
    %c1_112 = arith.constant 1 : index
    %c0_113 = arith.constant 0 : index
    %95 = vector.load %arg4[%c0_111, %c1_112, %c0_113] : memref<1x2x128xf32, #tpu.memory_space<vmem>>, vector<1x1x128xf32>
    %96 = vector.shape_cast %95 : vector<1x1x128xf32> to vector<1x128xf32>
    %97 = vector.shape_cast %94 : vector<1x128xf32> to vector<1x1x128xf32>
    tpu.vector_store %arg4[%c0_111, %c1_112, %c0_113], %97 {strides = array<i32>} : memref<1x2x128xf32, #tpu.memory_space<vmem>>, vector<1x1x128xf32>,
    return
  }
  func.func @transform_0(%arg0: i32) -> (i32, i32, i32, i32) {
    %c0_i32 = arith.constant 0 : i32
    %c0_i32_0 = arith.constant 0 : i32
    %c0_i32_1 = arith.constant 0 : i32
    %c0_i32_2 = arith.constant 0 : i32
    return %arg0, %c0_i32, %c0_i32_0, %c0_i32_1 : i32, i32, i32, i32
  }
  func.func @transform_1(%arg0: i32) -> (i32, i32, i32) {
    %c0_i32 = arith.constant 0 : i32
    %c0_i32_0 = arith.constant 0 : i32
    %c0_i32_1 = arith.constant 0 : i32
    %c0_i32_2 = arith.constant 0 : i32
    return %c0_i32, %c0_i32_0, %c0_i32_1 : i32, i32, i32
  }
  func.func @transform_2(%arg0: i32) -> (i32, i32, i32) {
    %c0_i32 = arith.constant 0 : i32
    %c0_i32_0 = arith.constant 0 : i32
    %c0_i32_1 = arith.constant 0 : i32
    return %arg0, %c0_i32, %c0_i32_0 : i32, i32, i32
  }
  func.func @transform_3(%arg0: i32) -> (i32, i32, i32) {
    %c0_i32 = arith.constant 0 : i32
    %c0_i32_0 = arith.constant 0 : i32
    %c0_i32_1 = arith.constant 0 : i32
    return %arg0, %c0_i32, %c0_i32_0 : i32, i32, i32
  }
}

module attributes {stable_mosaic.version = 11 : i64} {
  func.func @kernel(%arg0: i32, %arg1: memref<1x64x128xf32, #tpu.memory_space<vmem>>, %arg2: memref<2x128xf32, #tpu.memory_space<vmem>>, %arg3: memref<1x9x9x128xf32, #tpu.memory_space<vmem>>, %arg4: memref<9x128x128xf32, #tpu.memory_space<vmem>>, %arg5: memref<128x128xf32, #tpu.memory_space<vmem>>, %arg6: memref<1x64x128xf32, #tpu.memory_space<vmem>>, %arg7: memref<1x64x128xf32, #tpu.memory_space<vmem>>, %arg8: memref<1x4x128xf32, #tpu.memory_space<vmem>>, %arg9: memref<10x10x128xf32, #tpu.memory_space<vmem>>, %arg10: memref<64x128xf32, #tpu.memory_space<vmem>>) attributes {dimension_semantics = [#tpu.dimension_semantics<parallel>], iteration_bounds = array<i64: 2>, scalar_prefetch = 0 : i64, scratch_operands = 2 : i64, tpu.core_type = #tpu.core_type<tc>, window_params = [{transform_indices = @transform_0, window_bounds = array<i64: 1, 64, 128>}, {pipeline_mode = #tpu.pipeline_mode<synchronous>, transform_indices = @transform_1, window_bounds = array<i64: 2, 128>}, {transform_indices = @transform_2, window_bounds = array<i64: 1, 9, 9, 128>}, {pipeline_mode = #tpu.pipeline_mode<synchronous>, transform_indices = @transform_3, window_bounds = array<i64: 9, 128, 128>}, {pipeline_mode = #tpu.pipeline_mode<synchronous>, transform_indices = @transform_4, window_bounds = array<i64: 128, 128>}, {transform_indices = @transform_5, window_bounds = array<i64: 1, 64, 128>}, {transform_indices = @transform_6, window_bounds = array<i64: 1, 64, 128>}, {transform_indices = @transform_7, window_bounds = array<i64: 1, 4, 128>}]} {
    %c0 = arith.constant 0 : index
    %c0_0 = arith.constant 0 : index
    %0 = vector.load %arg2[%c0, %c0_0] : memref<2x128xf32, #tpu.memory_space<vmem>>, vector<2x128xf32>
    %c0_1 = arith.constant 0 : index
    %c0_2 = arith.constant 0 : index
    %c0_3 = arith.constant 0 : index
    %1 = vector.load %arg1[%c0_1, %c0_2, %c0_3] : memref<1x64x128xf32, #tpu.memory_space<vmem>>, vector<1x64x128xf32>
    %2 = vector.shape_cast %1 : vector<1x64x128xf32> to vector<64x128xf32>
    %3 = vector.extract_strided_slice %0 {offsets = [0, 0], sizes = [1, 128], strides = [1, 1]} : vector<2x128xf32> to vector<1x128xf32>
    %4 = vector.broadcast %3 : vector<1x128xf32> to vector<64x128xf32>
    %5 = arith.mulf %2, %4 : vector<64x128xf32>
    %6 = vector.extract_strided_slice %0 {offsets = [1, 0], sizes = [1, 128], strides = [1, 1]} : vector<2x128xf32> to vector<1x128xf32>
    %7 = vector.broadcast %6 : vector<1x128xf32> to vector<64x128xf32>
    %8 = arith.addf %5, %7 : vector<64x128xf32>
    %cst = arith.constant 0.000000e+00 : f32
    %9 = vector.broadcast %cst : f32 to vector<64x128xf32>
    %10 = arith.maximumf %8, %9 : vector<64x128xf32>
    %cst_4 = arith.constant 0.000000e+00 : f32
    %11 = vector.broadcast %cst_4 : f32 to vector<10x10x128xf32>
    %c0_5 = arith.constant 0 : index
    %c0_6 = arith.constant 0 : index
    %c0_7 = arith.constant 0 : index
    %12 = vector.load %arg9[%c0_5, %c0_6, %c0_7] : memref<10x10x128xf32, #tpu.memory_space<vmem>>, vector<10x10x128xf32>
    tpu.vector_store %arg9[%c0_5, %c0_6, %c0_7], %11 {strides = array<i32>} : memref<10x10x128xf32, #tpu.memory_space<vmem>>, vector<10x10x128xf32>,
    %13 = vector.shape_cast %10 : vector<64x128xf32> to vector<8x8x128xf32>
    %c1 = arith.constant 1 : index
    %c1_8 = arith.constant 1 : index
    %c0_9 = arith.constant 0 : index
    %14 = vector.load %arg9[%c1, %c1_8, %c0_9] : memref<10x10x128xf32, #tpu.memory_space<vmem>>, vector<8x8x128xf32>
    tpu.vector_store %arg9[%c1, %c1_8, %c0_9], %13 {strides = array<i32>} : memref<10x10x128xf32, #tpu.memory_space<vmem>>, vector<8x8x128xf32>,
    %cst_10 = arith.constant 0.000000e+00 : f32
    %15 = vector.broadcast %cst_10 : f32 to vector<64x128xf32>
    %c0_11 = arith.constant 0 : index
    %c0_12 = arith.constant 0 : index
    %16 = vector.load %arg10[%c0_11, %c0_12] : memref<64x128xf32, #tpu.memory_space<vmem>>, vector<64x128xf32>
    tpu.vector_store %arg10[%c0_11, %c0_12], %15 {strides = array<i32>} : memref<64x128xf32, #tpu.memory_space<vmem>>, vector<64x128xf32>,
    %c0_13 = arith.constant 0 : index
    %c0_14 = arith.constant 0 : index
    %c0_15 = arith.constant 0 : index
    %17 = vector.load %arg9[%c0_13, %c0_14, %c0_15] : memref<10x10x128xf32, #tpu.memory_space<vmem>>, vector<8x8x128xf32>
    %18 = vector.shape_cast %17 : vector<8x8x128xf32> to vector<64x128xf32>
    %c0_16 = arith.constant 0 : index
    %c0_17 = arith.constant 0 : index
    %19 = vector.load %arg10[%c0_16, %c0_17] : memref<64x128xf32, #tpu.memory_space<vmem>>, vector<64x128xf32>
    %c0_18 = arith.constant 0 : index
    %c0_19 = arith.constant 0 : index
    %c0_20 = arith.constant 0 : index
    %20 = vector.load %arg4[%c0_18, %c0_19, %c0_20] : memref<9x128x128xf32, #tpu.memory_space<vmem>>, vector<1x128x128xf32>
    %21 = vector.shape_cast %20 : vector<1x128x128xf32> to vector<128x128xf32>
    %cst_21 = arith.constant dense<0.000000e+00> : vector<64x128xf32>
    %22 = tpu.matmul %18, %21, %cst_21 {dimension_numbers = #tpu.dot_dimension_numbers<[1], [0], [0], [1], [0, 0, 1, 1], [], []>} : vector<64x128xf32>, vector<128x128xf32>, vector<64x128xf32> -> vector<64x128xf32>
    %23 = arith.addf %19, %22 : vector<64x128xf32>
    %c0_22 = arith.constant 0 : index
    %c0_23 = arith.constant 0 : index
    %24 = vector.load %arg10[%c0_22, %c0_23] : memref<64x128xf32, #tpu.memory_space<vmem>>, vector<64x128xf32>
    tpu.vector_store %arg10[%c0_22, %c0_23], %23 {strides = array<i32>} : memref<64x128xf32, #tpu.memory_space<vmem>>, vector<64x128xf32>,
    %c0_24 = arith.constant 0 : index
    %c1_25 = arith.constant 1 : index
    %c0_26 = arith.constant 0 : index
    %25 = vector.load %arg9[%c0_24, %c1_25, %c0_26] : memref<10x10x128xf32, #tpu.memory_space<vmem>>, vector<8x8x128xf32>
    %26 = vector.shape_cast %25 : vector<8x8x128xf32> to vector<64x128xf32>
    %c0_27 = arith.constant 0 : index
    %c0_28 = arith.constant 0 : index
    %27 = vector.load %arg10[%c0_27, %c0_28] : memref<64x128xf32, #tpu.memory_space<vmem>>, vector<64x128xf32>
    %c1_29 = arith.constant 1 : index
    %c0_30 = arith.constant 0 : index
    %c0_31 = arith.constant 0 : index
    %28 = vector.load %arg4[%c1_29, %c0_30, %c0_31] : memref<9x128x128xf32, #tpu.memory_space<vmem>>, vector<1x128x128xf32>
    %29 = vector.shape_cast %28 : vector<1x128x128xf32> to vector<128x128xf32>
    %cst_32 = arith.constant dense<0.000000e+00> : vector<64x128xf32>
    %30 = tpu.matmul %26, %29, %cst_32 {dimension_numbers = #tpu.dot_dimension_numbers<[1], [0], [0], [1], [0, 0, 1, 1], [], []>} : vector<64x128xf32>, vector<128x128xf32>, vector<64x128xf32> -> vector<64x128xf32>
    %31 = arith.addf %27, %30 : vector<64x128xf32>
    %c0_33 = arith.constant 0 : index
    %c0_34 = arith.constant 0 : index
    %32 = vector.load %arg10[%c0_33, %c0_34] : memref<64x128xf32, #tpu.memory_space<vmem>>, vector<64x128xf32>
    tpu.vector_store %arg10[%c0_33, %c0_34], %31 {strides = array<i32>} : memref<64x128xf32, #tpu.memory_space<vmem>>, vector<64x128xf32>,
    %c0_35 = arith.constant 0 : index
    %c2 = arith.constant 2 : index
    %c0_36 = arith.constant 0 : index
    %33 = vector.load %arg9[%c0_35, %c2, %c0_36] : memref<10x10x128xf32, #tpu.memory_space<vmem>>, vector<8x8x128xf32>
    %34 = vector.shape_cast %33 : vector<8x8x128xf32> to vector<64x128xf32>
    %c0_37 = arith.constant 0 : index
    %c0_38 = arith.constant 0 : index
    %35 = vector.load %arg10[%c0_37, %c0_38] : memref<64x128xf32, #tpu.memory_space<vmem>>, vector<64x128xf32>
    %c2_39 = arith.constant 2 : index
    %c0_40 = arith.constant 0 : index
    %c0_41 = arith.constant 0 : index
    %36 = vector.load %arg4[%c2_39, %c0_40, %c0_41] : memref<9x128x128xf32, #tpu.memory_space<vmem>>, vector<1x128x128xf32>
    %37 = vector.shape_cast %36 : vector<1x128x128xf32> to vector<128x128xf32>
    %cst_42 = arith.constant dense<0.000000e+00> : vector<64x128xf32>
    %38 = tpu.matmul %34, %37, %cst_42 {dimension_numbers = #tpu.dot_dimension_numbers<[1], [0], [0], [1], [0, 0, 1, 1], [], []>} : vector<64x128xf32>, vector<128x128xf32>, vector<64x128xf32> -> vector<64x128xf32>
    %39 = arith.addf %35, %38 : vector<64x128xf32>
    %c0_43 = arith.constant 0 : index
    %c0_44 = arith.constant 0 : index
    %40 = vector.load %arg10[%c0_43, %c0_44] : memref<64x128xf32, #tpu.memory_space<vmem>>, vector<64x128xf32>
    tpu.vector_store %arg10[%c0_43, %c0_44], %39 {strides = array<i32>} : memref<64x128xf32, #tpu.memory_space<vmem>>, vector<64x128xf32>,
    %c1_45 = arith.constant 1 : index
    %c0_46 = arith.constant 0 : index
    %c0_47 = arith.constant 0 : index
    %41 = vector.load %arg9[%c1_45, %c0_46, %c0_47] : memref<10x10x128xf32, #tpu.memory_space<vmem>>, vector<8x8x128xf32>
    %42 = vector.shape_cast %41 : vector<8x8x128xf32> to vector<64x128xf32>
    %c0_48 = arith.constant 0 : index
    %c0_49 = arith.constant 0 : index
    %43 = vector.load %arg10[%c0_48, %c0_49] : memref<64x128xf32, #tpu.memory_space<vmem>>, vector<64x128xf32>
    %c3 = arith.constant 3 : index
    %c0_50 = arith.constant 0 : index
    %c0_51 = arith.constant 0 : index
    %44 = vector.load %arg4[%c3, %c0_50, %c0_51] : memref<9x128x128xf32, #tpu.memory_space<vmem>>, vector<1x128x128xf32>
    %45 = vector.shape_cast %44 : vector<1x128x128xf32> to vector<128x128xf32>
    %cst_52 = arith.constant dense<0.000000e+00> : vector<64x128xf32>
    %46 = tpu.matmul %42, %45, %cst_52 {dimension_numbers = #tpu.dot_dimension_numbers<[1], [0], [0], [1], [0, 0, 1, 1], [], []>} : vector<64x128xf32>, vector<128x128xf32>, vector<64x128xf32> -> vector<64x128xf32>
    %47 = arith.addf %43, %46 : vector<64x128xf32>
    %c0_53 = arith.constant 0 : index
    %c0_54 = arith.constant 0 : index
    %48 = vector.load %arg10[%c0_53, %c0_54] : memref<64x128xf32, #tpu.memory_space<vmem>>, vector<64x128xf32>
    tpu.vector_store %arg10[%c0_53, %c0_54], %47 {strides = array<i32>} : memref<64x128xf32, #tpu.memory_space<vmem>>, vector<64x128xf32>,
    %c1_55 = arith.constant 1 : index
    %c1_56 = arith.constant 1 : index
    %c0_57 = arith.constant 0 : index
    %49 = vector.load %arg9[%c1_55, %c1_56, %c0_57] : memref<10x10x128xf32, #tpu.memory_space<vmem>>, vector<8x8x128xf32>
    %50 = vector.shape_cast %49 : vector<8x8x128xf32> to vector<64x128xf32>
    %c0_58 = arith.constant 0 : index
    %c0_59 = arith.constant 0 : index
    %51 = vector.load %arg10[%c0_58, %c0_59] : memref<64x128xf32, #tpu.memory_space<vmem>>, vector<64x128xf32>
    %c4 = arith.constant 4 : index
    %c0_60 = arith.constant 0 : index
    %c0_61 = arith.constant 0 : index
    %52 = vector.load %arg4[%c4, %c0_60, %c0_61] : memref<9x128x128xf32, #tpu.memory_space<vmem>>, vector<1x128x128xf32>
    %53 = vector.shape_cast %52 : vector<1x128x128xf32> to vector<128x128xf32>
    %cst_62 = arith.constant dense<0.000000e+00> : vector<64x128xf32>
    %54 = tpu.matmul %50, %53, %cst_62 {dimension_numbers = #tpu.dot_dimension_numbers<[1], [0], [0], [1], [0, 0, 1, 1], [], []>} : vector<64x128xf32>, vector<128x128xf32>, vector<64x128xf32> -> vector<64x128xf32>
    %55 = arith.addf %51, %54 : vector<64x128xf32>
    %c0_63 = arith.constant 0 : index
    %c0_64 = arith.constant 0 : index
    %56 = vector.load %arg10[%c0_63, %c0_64] : memref<64x128xf32, #tpu.memory_space<vmem>>, vector<64x128xf32>
    tpu.vector_store %arg10[%c0_63, %c0_64], %55 {strides = array<i32>} : memref<64x128xf32, #tpu.memory_space<vmem>>, vector<64x128xf32>,
    %c1_65 = arith.constant 1 : index
    %c2_66 = arith.constant 2 : index
    %c0_67 = arith.constant 0 : index
    %57 = vector.load %arg9[%c1_65, %c2_66, %c0_67] : memref<10x10x128xf32, #tpu.memory_space<vmem>>, vector<8x8x128xf32>
    %58 = vector.shape_cast %57 : vector<8x8x128xf32> to vector<64x128xf32>
    %c0_68 = arith.constant 0 : index
    %c0_69 = arith.constant 0 : index
    %59 = vector.load %arg10[%c0_68, %c0_69] : memref<64x128xf32, #tpu.memory_space<vmem>>, vector<64x128xf32>
    %c5 = arith.constant 5 : index
    %c0_70 = arith.constant 0 : index
    %c0_71 = arith.constant 0 : index
    %60 = vector.load %arg4[%c5, %c0_70, %c0_71] : memref<9x128x128xf32, #tpu.memory_space<vmem>>, vector<1x128x128xf32>
    %61 = vector.shape_cast %60 : vector<1x128x128xf32> to vector<128x128xf32>
    %cst_72 = arith.constant dense<0.000000e+00> : vector<64x128xf32>
    %62 = tpu.matmul %58, %61, %cst_72 {dimension_numbers = #tpu.dot_dimension_numbers<[1], [0], [0], [1], [0, 0, 1, 1], [], []>} : vector<64x128xf32>, vector<128x128xf32>, vector<64x128xf32> -> vector<64x128xf32>
    %63 = arith.addf %59, %62 : vector<64x128xf32>
    %c0_73 = arith.constant 0 : index
    %c0_74 = arith.constant 0 : index
    %64 = vector.load %arg10[%c0_73, %c0_74] : memref<64x128xf32, #tpu.memory_space<vmem>>, vector<64x128xf32>
    tpu.vector_store %arg10[%c0_73, %c0_74], %63 {strides = array<i32>} : memref<64x128xf32, #tpu.memory_space<vmem>>, vector<64x128xf32>,
    %c2_75 = arith.constant 2 : index
    %c0_76 = arith.constant 0 : index
    %c0_77 = arith.constant 0 : index
    %65 = vector.load %arg9[%c2_75, %c0_76, %c0_77] : memref<10x10x128xf32, #tpu.memory_space<vmem>>, vector<8x8x128xf32>
    %66 = vector.shape_cast %65 : vector<8x8x128xf32> to vector<64x128xf32>
    %c0_78 = arith.constant 0 : index
    %c0_79 = arith.constant 0 : index
    %67 = vector.load %arg10[%c0_78, %c0_79] : memref<64x128xf32, #tpu.memory_space<vmem>>, vector<64x128xf32>
    %c6 = arith.constant 6 : index
    %c0_80 = arith.constant 0 : index
    %c0_81 = arith.constant 0 : index
    %68 = vector.load %arg4[%c6, %c0_80, %c0_81] : memref<9x128x128xf32, #tpu.memory_space<vmem>>, vector<1x128x128xf32>
    %69 = vector.shape_cast %68 : vector<1x128x128xf32> to vector<128x128xf32>
    %cst_82 = arith.constant dense<0.000000e+00> : vector<64x128xf32>
    %70 = tpu.matmul %66, %69, %cst_82 {dimension_numbers = #tpu.dot_dimension_numbers<[1], [0], [0], [1], [0, 0, 1, 1], [], []>} : vector<64x128xf32>, vector<128x128xf32>, vector<64x128xf32> -> vector<64x128xf32>
    %71 = arith.addf %67, %70 : vector<64x128xf32>
    %c0_83 = arith.constant 0 : index
    %c0_84 = arith.constant 0 : index
    %72 = vector.load %arg10[%c0_83, %c0_84] : memref<64x128xf32, #tpu.memory_space<vmem>>, vector<64x128xf32>
    tpu.vector_store %arg10[%c0_83, %c0_84], %71 {strides = array<i32>} : memref<64x128xf32, #tpu.memory_space<vmem>>, vector<64x128xf32>,
    %c2_85 = arith.constant 2 : index
    %c1_86 = arith.constant 1 : index
    %c0_87 = arith.constant 0 : index
    %73 = vector.load %arg9[%c2_85, %c1_86, %c0_87] : memref<10x10x128xf32, #tpu.memory_space<vmem>>, vector<8x8x128xf32>
    %74 = vector.shape_cast %73 : vector<8x8x128xf32> to vector<64x128xf32>
    %c0_88 = arith.constant 0 : index
    %c0_89 = arith.constant 0 : index
    %75 = vector.load %arg10[%c0_88, %c0_89] : memref<64x128xf32, #tpu.memory_space<vmem>>, vector<64x128xf32>
    %c7 = arith.constant 7 : index
    %c0_90 = arith.constant 0 : index
    %c0_91 = arith.constant 0 : index
    %76 = vector.load %arg4[%c7, %c0_90, %c0_91] : memref<9x128x128xf32, #tpu.memory_space<vmem>>, vector<1x128x128xf32>
    %77 = vector.shape_cast %76 : vector<1x128x128xf32> to vector<128x128xf32>
    %cst_92 = arith.constant dense<0.000000e+00> : vector<64x128xf32>
    %78 = tpu.matmul %74, %77, %cst_92 {dimension_numbers = #tpu.dot_dimension_numbers<[1], [0], [0], [1], [0, 0, 1, 1], [], []>} : vector<64x128xf32>, vector<128x128xf32>, vector<64x128xf32> -> vector<64x128xf32>
    %79 = arith.addf %75, %78 : vector<64x128xf32>
    %c0_93 = arith.constant 0 : index
    %c0_94 = arith.constant 0 : index
    %80 = vector.load %arg10[%c0_93, %c0_94] : memref<64x128xf32, #tpu.memory_space<vmem>>, vector<64x128xf32>
    tpu.vector_store %arg10[%c0_93, %c0_94], %79 {strides = array<i32>} : memref<64x128xf32, #tpu.memory_space<vmem>>, vector<64x128xf32>,
    %c2_95 = arith.constant 2 : index
    %c2_96 = arith.constant 2 : index
    %c0_97 = arith.constant 0 : index
    %81 = vector.load %arg9[%c2_95, %c2_96, %c0_97] : memref<10x10x128xf32, #tpu.memory_space<vmem>>, vector<8x8x128xf32>
    %82 = vector.shape_cast %81 : vector<8x8x128xf32> to vector<64x128xf32>
    %c0_98 = arith.constant 0 : index
    %c0_99 = arith.constant 0 : index
    %83 = vector.load %arg10[%c0_98, %c0_99] : memref<64x128xf32, #tpu.memory_space<vmem>>, vector<64x128xf32>
    %c8 = arith.constant 8 : index
    %c0_100 = arith.constant 0 : index
    %c0_101 = arith.constant 0 : index
    %84 = vector.load %arg4[%c8, %c0_100, %c0_101] : memref<9x128x128xf32, #tpu.memory_space<vmem>>, vector<1x128x128xf32>
    %85 = vector.shape_cast %84 : vector<1x128x128xf32> to vector<128x128xf32>
    %cst_102 = arith.constant dense<0.000000e+00> : vector<64x128xf32>
    %86 = tpu.matmul %82, %85, %cst_102 {dimension_numbers = #tpu.dot_dimension_numbers<[1], [0], [0], [1], [0, 0, 1, 1], [], []>} : vector<64x128xf32>, vector<128x128xf32>, vector<64x128xf32> -> vector<64x128xf32>
    %87 = arith.addf %83, %86 : vector<64x128xf32>
    %c0_103 = arith.constant 0 : index
    %c0_104 = arith.constant 0 : index
    %88 = vector.load %arg10[%c0_103, %c0_104] : memref<64x128xf32, #tpu.memory_space<vmem>>, vector<64x128xf32>
    tpu.vector_store %arg10[%c0_103, %c0_104], %87 {strides = array<i32>} : memref<64x128xf32, #tpu.memory_space<vmem>>, vector<64x128xf32>,
    %c0_105 = arith.constant 0 : index
    %c0_106 = arith.constant 0 : index
    %89 = vector.load %arg10[%c0_105, %c0_106] : memref<64x128xf32, #tpu.memory_space<vmem>>, vector<64x128xf32>
    %c0_107 = arith.constant 0 : index
    %c0_108 = arith.constant 0 : index
    %c0_109 = arith.constant 0 : index
    %c0_110 = arith.constant 0 : index
    %90 = vector.load %arg3[%c0_107, %c0_108, %c0_109, %c0_110] : memref<1x9x9x128xf32, #tpu.memory_space<vmem>>, vector<1x8x8x128xf32>
    %91 = vector.shape_cast %90 : vector<1x8x8x128xf32> to vector<8x8x128xf32>
    %92 = vector.shape_cast %91 : vector<8x8x128xf32> to vector<64x128xf32>
    %c0_111 = arith.constant 0 : index
    %c0_112 = arith.constant 0 : index
    %93 = vector.load %arg5[%c0_111, %c0_112] : memref<128x128xf32, #tpu.memory_space<vmem>>, vector<128x128xf32>
    %cst_113 = arith.constant dense<0.000000e+00> : vector<64x128xf32>
    %94 = tpu.matmul %92, %93, %cst_113 {dimension_numbers = #tpu.dot_dimension_numbers<[1], [0], [0], [1], [0, 0, 1, 1], [], []>} : vector<64x128xf32>, vector<128x128xf32>, vector<64x128xf32> -> vector<64x128xf32>
    %c0_114 = arith.constant 0 : index
    %c0_115 = arith.constant 0 : index
    %c0_116 = arith.constant 0 : index
    %95 = vector.load %arg6[%c0_114, %c0_115, %c0_116] : memref<1x64x128xf32, #tpu.memory_space<vmem>>, vector<1x64x128xf32>
    %96 = vector.shape_cast %95 : vector<1x64x128xf32> to vector<64x128xf32>
    %97 = vector.shape_cast %89 : vector<64x128xf32> to vector<1x64x128xf32>
    tpu.vector_store %arg6[%c0_114, %c0_115, %c0_116], %97 {strides = array<i32>} : memref<1x64x128xf32, #tpu.memory_space<vmem>>, vector<1x64x128xf32>,
    %c0_117 = arith.constant 0 : index
    %c0_118 = arith.constant 0 : index
    %c0_119 = arith.constant 0 : index
    %98 = vector.load %arg7[%c0_117, %c0_118, %c0_119] : memref<1x64x128xf32, #tpu.memory_space<vmem>>, vector<1x64x128xf32>
    %99 = vector.shape_cast %98 : vector<1x64x128xf32> to vector<64x128xf32>
    %100 = vector.shape_cast %94 : vector<64x128xf32> to vector<1x64x128xf32>
    tpu.vector_store %arg7[%c0_117, %c0_118, %c0_119], %100 {strides = array<i32>} : memref<1x64x128xf32, #tpu.memory_space<vmem>>, vector<1x64x128xf32>,
    %cst_120 = arith.constant dense<0.000000e+00> : vector<128xf32>
    %101 = vector.multi_reduction <add>, %89, %cst_120 [0] : vector<64x128xf32> to vector<128xf32>
    %102 = vector.shape_cast %101 : vector<128xf32> to vector<1x128xf32>
    %c0_121 = arith.constant 0 : index
    %c0_122 = arith.constant 0 : index
    %c0_123 = arith.constant 0 : index
    %103 = vector.load %arg8[%c0_121, %c0_122, %c0_123] : memref<1x4x128xf32, #tpu.memory_space<vmem>>, vector<1x1x128xf32>
    %104 = vector.shape_cast %103 : vector<1x1x128xf32> to vector<1x128xf32>
    %105 = vector.shape_cast %102 : vector<1x128xf32> to vector<1x1x128xf32>
    tpu.vector_store %arg8[%c0_121, %c0_122, %c0_123], %105 {strides = array<i32>} : memref<1x4x128xf32, #tpu.memory_space<vmem>>, vector<1x1x128xf32>,
    %106 = arith.mulf %89, %89 : vector<64x128xf32>
    %cst_124 = arith.constant dense<0.000000e+00> : vector<128xf32>
    %107 = vector.multi_reduction <add>, %106, %cst_124 [0] : vector<64x128xf32> to vector<128xf32>
    %108 = vector.shape_cast %107 : vector<128xf32> to vector<1x128xf32>
    %c0_125 = arith.constant 0 : index
    %c1_126 = arith.constant 1 : index
    %c0_127 = arith.constant 0 : index
    %109 = vector.load %arg8[%c0_125, %c1_126, %c0_127] : memref<1x4x128xf32, #tpu.memory_space<vmem>>, vector<1x1x128xf32>
    %110 = vector.shape_cast %109 : vector<1x1x128xf32> to vector<1x128xf32>
    %111 = vector.shape_cast %108 : vector<1x128xf32> to vector<1x1x128xf32>
    tpu.vector_store %arg8[%c0_125, %c1_126, %c0_127], %111 {strides = array<i32>} : memref<1x4x128xf32, #tpu.memory_space<vmem>>, vector<1x1x128xf32>,
    %cst_128 = arith.constant dense<0.000000e+00> : vector<128xf32>
    %112 = vector.multi_reduction <add>, %94, %cst_128 [0] : vector<64x128xf32> to vector<128xf32>
    %113 = vector.shape_cast %112 : vector<128xf32> to vector<1x128xf32>
    %c0_129 = arith.constant 0 : index
    %c2_130 = arith.constant 2 : index
    %c0_131 = arith.constant 0 : index
    %114 = vector.load %arg8[%c0_129, %c2_130, %c0_131] : memref<1x4x128xf32, #tpu.memory_space<vmem>>, vector<1x1x128xf32>
    %115 = vector.shape_cast %114 : vector<1x1x128xf32> to vector<1x128xf32>
    %116 = vector.shape_cast %113 : vector<1x128xf32> to vector<1x1x128xf32>
    tpu.vector_store %arg8[%c0_129, %c2_130, %c0_131], %116 {strides = array<i32>} : memref<1x4x128xf32, #tpu.memory_space<vmem>>, vector<1x1x128xf32>,
    %117 = arith.mulf %94, %94 : vector<64x128xf32>
    %cst_132 = arith.constant dense<0.000000e+00> : vector<128xf32>
    %118 = vector.multi_reduction <add>, %117, %cst_132 [0] : vector<64x128xf32> to vector<128xf32>
    %119 = vector.shape_cast %118 : vector<128xf32> to vector<1x128xf32>
    %c0_133 = arith.constant 0 : index
    %c3_134 = arith.constant 3 : index
    %c0_135 = arith.constant 0 : index
    %120 = vector.load %arg8[%c0_133, %c3_134, %c0_135] : memref<1x4x128xf32, #tpu.memory_space<vmem>>, vector<1x1x128xf32>
    %121 = vector.shape_cast %120 : vector<1x1x128xf32> to vector<1x128xf32>
    %122 = vector.shape_cast %119 : vector<1x128xf32> to vector<1x1x128xf32>
    tpu.vector_store %arg8[%c0_133, %c3_134, %c0_135], %122 {strides = array<i32>} : memref<1x4x128xf32, #tpu.memory_space<vmem>>, vector<1x1x128xf32>,
    return
  }
  func.func @transform_0(%arg0: i32) -> (i32, i32, i32) {
    %c0_i32 = arith.constant 0 : i32
    %c0_i32_0 = arith.constant 0 : i32
    %c0_i32_1 = arith.constant 0 : i32
    return %arg0, %c0_i32, %c0_i32_0 : i32, i32, i32
  }
  func.func @transform_1(%arg0: i32) -> (i32, i32) {
    %c0_i32 = arith.constant 0 : i32
    %c0_i32_0 = arith.constant 0 : i32
    %c0_i32_1 = arith.constant 0 : i32
    return %c0_i32, %c0_i32_0 : i32, i32
  }
  func.func @transform_2(%arg0: i32) -> (i32, i32, i32, i32) {
    %c4_i32 = arith.constant 4 : i32
    %0 = arith.muli %arg0, %c4_i32 : i32
    %c3_i32 = arith.constant 3 : i32
    %1 = arith.addi %0, %c3_i32 : i32
    %c0_i32 = arith.constant 0 : i32
    %c0_i32_0 = arith.constant 0 : i32
    %c0_i32_1 = arith.constant 0 : i32
    %c0_i32_2 = arith.constant 0 : i32
    return %1, %c0_i32, %c0_i32_0, %c0_i32_1 : i32, i32, i32, i32
  }
  func.func @transform_3(%arg0: i32) -> (i32, i32, i32) {
    %c0_i32 = arith.constant 0 : i32
    %c0_i32_0 = arith.constant 0 : i32
    %c0_i32_1 = arith.constant 0 : i32
    %c0_i32_2 = arith.constant 0 : i32
    return %c0_i32, %c0_i32_0, %c0_i32_1 : i32, i32, i32
  }
  func.func @transform_4(%arg0: i32) -> (i32, i32) {
    %c0_i32 = arith.constant 0 : i32
    %c0_i32_0 = arith.constant 0 : i32
    %c0_i32_1 = arith.constant 0 : i32
    return %c0_i32, %c0_i32_0 : i32, i32
  }
  func.func @transform_5(%arg0: i32) -> (i32, i32, i32) {
    %c0_i32 = arith.constant 0 : i32
    %c0_i32_0 = arith.constant 0 : i32
    %c0_i32_1 = arith.constant 0 : i32
    return %arg0, %c0_i32, %c0_i32_0 : i32, i32, i32
  }
  func.func @transform_6(%arg0: i32) -> (i32, i32, i32) {
    %c0_i32 = arith.constant 0 : i32
    %c0_i32_0 = arith.constant 0 : i32
    %c0_i32_1 = arith.constant 0 : i32
    return %arg0, %c0_i32, %c0_i32_0 : i32, i32, i32
  }
  func.func @transform_7(%arg0: i32) -> (i32, i32, i32) {
    %c0_i32 = arith.constant 0 : i32
    %c0_i32_0 = arith.constant 0 : i32
    %c0_i32_1 = arith.constant 0 : i32
    return %arg0, %c0_i32, %c0_i32_0 : i32, i32, i32
  }
}

module attributes {stable_mosaic.version = 11 : i64} {
  func.func @_bn_add_relu_proj_kernel(%arg0: i32, %arg1: memref<1x64x128xf32, #tpu.memory_space<vmem>>, %arg2: memref<1x64x128xf32, #tpu.memory_space<vmem>>, %arg3: memref<2x128xf32, #tpu.memory_space<vmem>>, %arg4: memref<2x128xf32, #tpu.memory_space<vmem>>, %arg5: memref<1x64x128xf32, #tpu.memory_space<vmem>>) attributes {dimension_semantics = [#tpu.dimension_semantics<parallel>], iteration_bounds = array<i64: 2>, scalar_prefetch = 0 : i64, scratch_operands = 0 : i64, tpu.core_type = #tpu.core_type<tc>, window_params = [{transform_indices = @transform_0, window_bounds = array<i64: 1, 64, 128>}, {transform_indices = @transform_1, window_bounds = array<i64: 1, 64, 128>}, {pipeline_mode = #tpu.pipeline_mode<synchronous>, transform_indices = @transform_2, window_bounds = array<i64: 2, 128>}, {pipeline_mode = #tpu.pipeline_mode<synchronous>, transform_indices = @transform_3, window_bounds = array<i64: 2, 128>}, {transform_indices = @transform_4, window_bounds = array<i64: 1, 64, 128>}]} {
    %c0 = arith.constant 0 : index
    %c0_0 = arith.constant 0 : index
    %0 = vector.load %arg3[%c0, %c0_0] : memref<2x128xf32, #tpu.memory_space<vmem>>, vector<2x128xf32>
    %c0_1 = arith.constant 0 : index
    %c0_2 = arith.constant 0 : index
    %1 = vector.load %arg4[%c0_1, %c0_2] : memref<2x128xf32, #tpu.memory_space<vmem>>, vector<2x128xf32>
    %c0_3 = arith.constant 0 : index
    %c0_4 = arith.constant 0 : index
    %c0_5 = arith.constant 0 : index
    %2 = vector.load %arg1[%c0_3, %c0_4, %c0_5] : memref<1x64x128xf32, #tpu.memory_space<vmem>>, vector<1x64x128xf32>
    %3 = vector.shape_cast %2 : vector<1x64x128xf32> to vector<64x128xf32>
    %4 = vector.extract_strided_slice %0 {offsets = [0, 0], sizes = [1, 128], strides = [1, 1]} : vector<2x128xf32> to vector<1x128xf32>
    %5 = vector.broadcast %4 : vector<1x128xf32> to vector<64x128xf32>
    %6 = arith.mulf %3, %5 : vector<64x128xf32>
    %7 = vector.extract_strided_slice %0 {offsets = [1, 0], sizes = [1, 128], strides = [1, 1]} : vector<2x128xf32> to vector<1x128xf32>
    %8 = vector.broadcast %7 : vector<1x128xf32> to vector<64x128xf32>
    %9 = arith.addf %6, %8 : vector<64x128xf32>
    %c0_6 = arith.constant 0 : index
    %c0_7 = arith.constant 0 : index
    %c0_8 = arith.constant 0 : index
    %10 = vector.load %arg2[%c0_6, %c0_7, %c0_8] : memref<1x64x128xf32, #tpu.memory_space<vmem>>, vector<1x64x128xf32>
    %11 = vector.shape_cast %10 : vector<1x64x128xf32> to vector<64x128xf32>
    %12 = vector.extract_strided_slice %1 {offsets = [0, 0], sizes = [1, 128], strides = [1, 1]} : vector<2x128xf32> to vector<1x128xf32>
    %13 = vector.broadcast %12 : vector<1x128xf32> to vector<64x128xf32>
    %14 = arith.mulf %11, %13 : vector<64x128xf32>
    %15 = vector.extract_strided_slice %1 {offsets = [1, 0], sizes = [1, 128], strides = [1, 1]} : vector<2x128xf32> to vector<1x128xf32>
    %16 = vector.broadcast %15 : vector<1x128xf32> to vector<64x128xf32>
    %17 = arith.addf %14, %16 : vector<64x128xf32>
    %18 = arith.addf %9, %17 : vector<64x128xf32>
    %cst = arith.constant 0.000000e+00 : f32
    %19 = vector.broadcast %cst : f32 to vector<64x128xf32>
    %20 = arith.maximumf %18, %19 : vector<64x128xf32>
    %c0_9 = arith.constant 0 : index
    %c0_10 = arith.constant 0 : index
    %c0_11 = arith.constant 0 : index
    %21 = vector.load %arg5[%c0_9, %c0_10, %c0_11] : memref<1x64x128xf32, #tpu.memory_space<vmem>>, vector<1x64x128xf32>
    %22 = vector.shape_cast %21 : vector<1x64x128xf32> to vector<64x128xf32>
    %23 = vector.shape_cast %20 : vector<64x128xf32> to vector<1x64x128xf32>
    tpu.vector_store %arg5[%c0_9, %c0_10, %c0_11], %23 {strides = array<i32>} : memref<1x64x128xf32, #tpu.memory_space<vmem>>, vector<1x64x128xf32>,
    return
  }
  func.func @transform_0(%arg0: i32) -> (i32, i32, i32) {
    %c0_i32 = arith.constant 0 : i32
    %c0_i32_0 = arith.constant 0 : i32
    %c0_i32_1 = arith.constant 0 : i32
    return %arg0, %c0_i32, %c0_i32_0 : i32, i32, i32
  }
  func.func @transform_1(%arg0: i32) -> (i32, i32, i32) {
    %c0_i32 = arith.constant 0 : i32
    %c0_i32_0 = arith.constant 0 : i32
    %c0_i32_1 = arith.constant 0 : i32
    return %arg0, %c0_i32, %c0_i32_0 : i32, i32, i32
  }
  func.func @transform_2(%arg0: i32) -> (i32, i32) {
    %c0_i32 = arith.constant 0 : i32
    %c0_i32_0 = arith.constant 0 : i32
    %c0_i32_1 = arith.constant 0 : i32
    return %c0_i32, %c0_i32_0 : i32, i32
  }
  func.func @transform_3(%arg0: i32) -> (i32, i32) {
    %c0_i32 = arith.constant 0 : i32
    %c0_i32_0 = arith.constant 0 : i32
    %c0_i32_1 = arith.constant 0 : i32
    return %c0_i32, %c0_i32_0 : i32, i32
  }
  func.func @transform_4(%arg0: i32) -> (i32, i32, i32) {
    %c0_i32 = arith.constant 0 : i32
    %c0_i32_0 = arith.constant 0 : i32
    %c0_i32_1 = arith.constant 0 : i32
    return %arg0, %c0_i32, %c0_i32_0 : i32, i32, i32
  }
}

</mosaic_0001>

<bundles_post_ra>
// kernel: resnet_block_forward.5
= control target key start
LH: loop header
LB: loop body
LE: loop exit
PB: predicated region body
PF: predicated region fallthrough
CT: control target
= control target key end

     0   :  { %s432_s15 = smov 0   ;;  %s513_s0 = inlined_call_operand.vmem [shape: f32[2,64,128], index: 0, kind: input, shape index: {}]   ;;  %s514_s1 = inlined_call_operand.vmem [shape: f32[2,64,128], index: 1, kind: input, shape index: {}]   ;;  %s515_s2 = inlined_call_operand.vmem [shape: f32[2,128], index: 2, kind: input, shape index: {}]   ;;  %s516_s3 = inlined_call_operand.vmem [shape: f32[2,128], index: 3, kind: input, shape index: {}]   ;;  %s517_s4 = inlined_call_operand.vmem [shape: f32[2,64,128], index: 4, kind: output, shape index: {}]  }
   0x1 LB: > { %s375_s16 = sadd.s32 4294967295, %s405_s15   ;;  %p379_p0 = scmp.ge.s32.totalorder %s405_s15, 1  ;;  %s405_s15 = sphi %s432_s15, %s14_s15  }
   0x2   : > { %p172_p1 = scmp.lt.s32.totalorder %s405_s15, 3 }
   0x4   : > { %p173_p2 = pnand %p379_p0, %p172_p1 }
   0x5   : > { %p203_p3 = scmp.lt.s32.totalorder (!%p173_p2), %s375_s16, 1  ;;  %v228_v0 = vlaneseq (!%p173_p2)  ;;  %v218_v2 = vld [vmem:[%s515_s2] sm:$0x3] (!%p173_p2) }
   0x6   : > { %176 = sbr.rel (%p173_p2) target bundleno = 35 (0x23), region = 36  ;;  %v219_v3 = vld [vmem:[%s516_s3] sm:$0x3] (!%p173_p2) }
   0x7   : > { %v229_v1 = vshrl.u32 (!%p173_p2), %v228_v0, 7 }
   0x9   : > { %v230_v4 = vsub.s32 (!%p173_p2), 0, %v229_v1  ;;  %v242_v5 = vsub.s32 (!%p173_p2), 1, %v229_v1 }
   0xb   : > { %v231_v7 = vrot.slane (!%p173_p2), %v218_v2, %v230_v4  ;;  %v461_v8 = vrot.slane (!%p173_p2), %v218_v2, %v242_v5  ;;  %v263_v10 = vrot.slane (!%p173_p2), %v219_v3, %v230_v4  ;;  %v464_v11 = vrot.slane (!%p173_p2), %v219_v3, %v242_v5 }
   0xd   : > { %s519_s16 = smov (!%p203_p3, %s375_s16), 1 }
   0xe   : > { %s446_s21 = sshll.u32 %s519_s16, 6 }
   0xf   : > { %s452_s24 = scalar_lea.vmem %s513_s0, %s446_s21  ;;  %s458_s27 = scalar_lea.vmem %s514_s1, %s446_s21 }
  0x10   : > { %v220_v6 = vld [vmem:[%s452_s24] sm:$0xff]  ;;  %v221_v12 = vld [vmem:[%s452_s24 + $0x8] sm:$0xff]  ;;  %v222_v14 = vld [vmem:[%s452_s24 + $0x10] sm:$0xff]  ;;  %s488_s30 = scalar_lea.vmem %s517_s4, %s446_s21 }
  0x11   : > { %v252_v9 = vld [vmem:[%s458_s27] sm:$0xff]  ;;  %v253_v13 = vld [vmem:[%s458_s27 + $0x8] sm:$0xff]  ;;  %v254_v15 = vld [vmem:[%s458_s27 + $0x10] sm:$0xff]  ;;  %v232_v16 = vmul.f32 %v231_v7, %v220_v6  ;;  %v233_v18 = vmul.f32 %v231_v7, %v221_v12  ;;  %v234_v22 = vmul.f32 %v231_v7, %v222_v14 }
  0x12   : > { %v264_v17 = vmul.f32 %v263_v10, %v252_v9  ;;  %v265_v19 = vmul.f32 %v263_v10, %v253_v13  ;;  %v223_v20 = vld [vmem:[%s452_s24 + $0x18] sm:$0xff]  ;;  %v266_v23 = vmul.f32 %v263_v10, %v254_v15  ;;  %v224_v26 = vld [vmem:[%s452_s24 + $0x20] sm:$0xff]  ;;  %v225_v32 = vld [vmem:[%s452_s24 + $0x28] sm:$0xff] }
  0x13   : > { %v255_v21 = vld [vmem:[%s458_s27 + $0x18] sm:$0xff]  ;;  %v235_v24 = vmul.f32 %v231_v7, %v223_v20  ;;  %v256_v27 = vld [vmem:[%s458_s27 + $0x20] sm:$0xff]  ;;  %v244_v28 = vadd.f32 %v461_v8, %v232_v16  ;;  %v245_v30 = vadd.f32 %v461_v8, %v233_v18  ;;  %v257_v33 = vld [vmem:[%s458_s27 + $0x28] sm:$0xff]  ;;  %v246_v34 = vadd.f32 %v461_v8, %v234_v22 }
  0x14   : > { %v267_v25 = vmul.f32 %v263_v10, %v255_v21  ;;  %v276_v29 = vadd.f32 %v464_v11, %v264_v17  ;;  %v277_v31 = vadd.f32 %v464_v11, %v265_v19  ;;  %v278_v35 = vadd.f32 %v464_v11, %v266_v23  ;;  %v226_v46 = vld [vmem:[%s452_s24 + $0x30] sm:$0xff]  ;;  %v227_v48 = vld [vmem:[%s452_s24 + $0x38] sm:$0xff] }
  0x15   : > { %v247_v36 = vadd.f32 %v461_v8, %v235_v24  ;;  %v236_v40 = vmul.f32 %v231_v7, %v224_v26  ;;  %v268_v41 = vmul.f32 %v263_v10, %v256_v27  ;;  %v237_v44 = vmul.f32 %v231_v7, %v225_v32  ;;  %v258_v47 = vld [vmem:[%s458_s27 + $0x30] sm:$0xff]  ;;  %v259_v53 = vld [vmem:[%s458_s27 + $0x38] sm:$0xff] }
  0x16   : > { %v279_v37 = vadd.f32 %v464_v11, %v267_v25  ;;  %v284_v38 = vadd.f32 %v276_v29, %v244_v28  ;;  %v285_v39 = vadd.f32 %v277_v31, %v245_v30  ;;  %v286_v42 = vadd.f32 %v278_v35, %v246_v34 }
  0x17   : > { %v269_v45 = vmul.f32 %v263_v10, %v257_v33  ;;  %v248_v51 = vadd.f32 %v461_v8, %v236_v40  ;;  %v280_v52 = vadd.f32 %v464_v11, %v268_v41  ;;  %v249_v56 = vadd.f32 %v461_v8, %v237_v44 }
  0x18   : > { %v287_v43 = vadd.f32 %v279_v37, %v247_v36  ;;  %v292_v49 = vmax.f32 %v284_v38, 0.0  ;;  %v293_v50 = vmax.f32 %v285_v39, 0.0  ;;  %v294_v54 = vmax.f32 %v286_v42, 0.0 }
  0x19   : > { %v281_v57 = vadd.f32 %v464_v11, %v269_v45  ;;  %v288_v58 = vadd.f32 %v280_v52, %v248_v51  ;;  %v238_v59 = vmul.f32 %v231_v7, %v226_v46  ;;  %v270_v60 = vmul.f32 %v263_v10, %v258_v47 }
  0x1a   : > { %v295_v55 = vmax.f32 %v287_v43, 0.0  ;;  %300 = vst [vmem:[%s488_s30] sm:$0xff] %v292_v49  ;;  %301 = vst [vmem:[%s488_s30 + $0x8] sm:$0xff] %v293_v50  ;;  %v239_v61 = vmul.f32 %v231_v7, %v227_v48  ;;  %v271_v63 = vmul.f32 %v263_v10, %v259_v53 }
  0x1b   : > { %302 = vst [vmem:[%s488_s30 + $0x10] sm:$0xff] %v294_v54  ;;  %v289_v62 = vadd.f32 %v281_v57, %v249_v56  ;;  %v296_v0 = vmax.f32 %v288_v58, 0.0  ;;  %v250_v1 = vadd.f32 %v461_v8, %v238_v59  ;;  %v282_v2 = vadd.f32 %v464_v11, %v270_v60 }
  0x1c   : > { %303 = vst [vmem:[%s488_s30 + $0x18] sm:$0xff] %v295_v55  ;;  %v251_v3 = vadd.f32 %v461_v8, %v239_v61  ;;  %v283_v5 = vadd.f32 %v464_v11, %v271_v63 }
  0x1d   : > { %v297_v4 = vmax.f32 %v289_v62, 0.0  ;;  %304 = vst [vmem:[%s488_s30 + $0x20] sm:$0xff] %v296_v0  ;;  %v290_v6 = vadd.f32 %v282_v2, %v250_v1 }
  0x1e   : > { %v291_v7 = vadd.f32 %v283_v5, %v251_v3 }
  0x1f   : > { %305 = vst [vmem:[%s488_s30 + $0x28] sm:$0xff] %v297_v4  ;;  %v298_v9 = vmax.f32 %v290_v6, 0.0 }
  0x20   : > { %v299_v12 = vmax.f32 %v291_v7, 0.0 }
  0x21   : > { %306 = vst [vmem:[%s488_s30 + $0x30] sm:$0xff] %v298_v9 }
  0x22   : > { %307 = vst [vmem:[%s488_s30 + $0x38] sm:$0xff] %v299_v12 }
  0x23 PF: > { %s14_s15 = sadd.s32 1, %s405_s15  }
  0x24   : > { %p11_p4 = scmp.ge.s32.totalorder %s14_s15, 4  }
  0x26   :  { %13 = sbr.rel (!%p11_p4) target bundleno = 1 (0x1), region = 69 }

// kernel: resnet_block_forward.3
= control target key start
LH: loop header
LB: loop body
LE: loop exit
PB: predicated region body
PF: predicated region fallthrough
CT: control target
= control target key end

     0   :  { %s2937_s12 = smov 0   ;;  %s3535_s0 = inlined_call_operand.vmem [shape: f32[8,9,9,128], index: 0, kind: input, shape index: {}]   ;;  %s3536_s1 = inlined_call_operand.vmem [shape: f32[9,128,128], index: 1, kind: input, shape index: {}]   ;;  %s3537_s2 = inlined_call_operand.vmem [shape: f32[2,64,128], index: 2, kind: output, shape index: {0}]   ;;  %s3538_s3 = inlined_call_operand.vmem [shape: f32[2,2,128], index: 3, kind: output, shape index: {1}]  }
   0x1 LB: > { %s2943_s13 = sadd.s32 4294967295, %s2915_s12   ;;  %p1727_p0 = scmp.ge.s32.totalorder %s2915_s12, 1  ;;  %s2915_s12 = sphi %s2937_s12, %s14_s12  }
   0x2   : > { %p142_p1 = scmp.lt.s32.totalorder %s2915_s12, 3 }
   0x4   : > { %p143_p2 = pnand %p1727_p0, %p142_p1 }
   0x5   : > { %v211_v0 = vld [vmem:[%s3536_s1] sm:$0xff] (!%p143_p2)  ;;  %v212_v1 = vld [vmem:[%s3536_s1 + $0x8] sm:$0xff] (!%p143_p2)  ;;  %s1728_s20 = sshll.u32 (!%p143_p2), %s2943_s13, 2  ;;  %v213_v5 = vld [vmem:[%s3536_s1 + $0x10] sm:$0xff] (!%p143_p2)  ;;  %p178_p4 = scmp.lt.s32.totalorder (!%p143_p2), %s2943_s13, 1 }
   0x6   : > { %146 = sbr.rel (%p143_p2) target bundleno = 416 (0x1a0), region = 28  ;;  %v1805_v2 = vld [vmem:[%s3536_s1 + $0x200] sm:$0xff] (!%p143_p2)  ;;  %v2532_v3 = vpack.c.bf16 (!%p143_p2), %v212_v1, %v211_v0  ;;  %v1806_v4 = vld [vmem:[%s3536_s1 + $0x208] sm:$0xff] (!%p143_p2)  ;;  %v214_v6 = vld [vmem:[%s3536_s1 + $0x18] sm:$0xff] (!%p143_p2)  ;;  %p172_p3 = scmp.lt.s32.totalorder (!%p143_p2), %s1728_s20, 7 }
   0x7   : > { %v2660_v7 = vpack.c.bf16 (!%p143_p2), %v1806_v4, %v1805_v2  ;;  %v2536_v8 = vpack.c.bf16 (!%p143_p2), %v214_v6, %v213_v5  ;;  %v1807_v9 = vld [vmem:[%s3536_s1 + $0x210] sm:$0xff] (!%p143_p2)  ;;  %v1808_v10 = vld [vmem:[%s3536_s1 + $0x218] sm:$0xff] (!%p143_p2)  ;;  %v215_v11 = vld [vmem:[%s3536_s1 + $0x20] sm:$0xff] (!%p143_p2) }
   0x8   : > { %2533 = vmatprep.subr.bf16.mxu1 (!%p143_p2), %v2532_v3  ;;  %v2664_v12 = vpack.c.bf16 (!%p143_p2), %v1808_v10, %v1807_v9  ;;  %v216_v13 = vld [vmem:[%s3536_s1 + $0x28] sm:$0xff] (!%p143_p2)  ;;  %v1809_v14 = vld [vmem:[%s3536_s1 + $0x220] sm:$0xff] (!%p143_p2)  ;;  %v217_v18 = vld [vmem:[%s3536_s1 + $0x30] sm:$0xff] (!%p143_p2) }
   0x9   : > { %v1810_v15 = vld [vmem:[%s3536_s1 + $0x228] sm:$0xff] (!%p143_p2)  ;;  %2661 = vmatprep.subr.bf16.mxu0 (!%p143_p2), %v2660_v7  ;;  %2535 = vmatpush3.bf16.msra.mxu1 (!%p143_p2), %v2532_v3  ;;  %v2540_v16 = vpack.c.bf16 (!%p143_p2), %v216_v13, %v215_v11  ;;  %v218_v19 = vld [vmem:[%s3536_s1 + $0x38] sm:$0xff] (!%p143_p2)  ;;  %v1811_v20 = vld [vmem:[%s3536_s1 + $0x230] sm:$0xff] (!%p143_p2) }
   0xa   : > { %2663 = vmatpush3.bf16.msra.mxu0 (!%p143_p2), %v2660_v7  ;;  %2537 = vmatprep.subr.bf16.mxu1 (!%p143_p2), %v2536_v8  ;;  %v2668_v17 = vpack.c.bf16 (!%p143_p2), %v1810_v15, %v1809_v14  ;;  %v1812_v21 = vld [vmem:[%s3536_s1 + $0x238] sm:$0xff] (!%p143_p2)  ;;  %v2544_v22 = vpack.c.bf16 (!%p143_p2), %v218_v19, %v217_v18  ;;  %v219_v24 = vld [vmem:[%s3536_s1 + $0x40] sm:$0xff] (!%p143_p2)  ;;  %v220_v25 = vld [vmem:[%s3536_s1 + $0x48] sm:$0xff] (!%p143_p2) }
   0xb   : > { %2665 = vmatprep.subr.bf16.mxu0 (!%p143_p2), %v2664_v12  ;;  %v2672_v23 = vpack.c.bf16 (!%p143_p2), %v1812_v21, %v1811_v20  ;;  %v1813_v27 = vld [vmem:[%s3536_s1 + $0x240] sm:$0xff] (!%p143_p2)  ;;  %v1814_v28 = vld [vmem:[%s3536_s1 + $0x248] sm:$0xff] (!%p143_p2)  ;;  %v2548_v30 = vpack.c.bf16 (!%p143_p2), %v220_v25, %v219_v24  ;;  %v221_v32 = vld [vmem:[%s3536_s1 + $0x50] sm:$0xff] (!%p143_p2) }
   0xc   : > { %v2676_v31 = vpack.c.bf16 (!%p143_p2), %v1814_v28, %v1813_v27  ;;  %v222_v33 = vld [vmem:[%s3536_s1 + $0x58] sm:$0xff] (!%p143_p2)  ;;  %v1815_v34 = vld [vmem:[%s3536_s1 + $0x250] sm:$0xff] (!%p143_p2)  ;;  %v223_v38 = vld [vmem:[%s3536_s1 + $0x60] sm:$0xff] (!%p143_p2) }
   0xd   : > { %s3540_s20 = smov (!%p172_p3, %s1728_s20), 7  ;;  %2539 = vmatpush3.bf16.msra.mxu1 %v2536_v8  ;;  %v1816_v35 = vld [vmem:[%s3536_s1 + $0x258] sm:$0xff]  ;;  %v2552_v36 = vpack.c.bf16 %v222_v33, %v221_v32  ;;  %v224_v39 = vld [vmem:[%s3536_s1 + $0x68] sm:$0xff]  ;;  %v1817_v40 = vld [vmem:[%s3536_s1 + $0x260] sm:$0xff]  ;;  %s3542_s13 = smov (!%p178_p4, %s2943_s13), 1 }
   0xe   : > { %s2900_s14 = smul.u32 144, %s3540_s20  ;;  %2667 = vmatpush3.bf16.msra.mxu0 %v2664_v12  ;;  %2541 = vmatprep.subr.bf16.mxu1 %v2540_v16  ;;  %v2680_v37 = vpack.c.bf16 %v1816_v35, %v1815_v34  ;;  %v1818_v41 = vld [vmem:[%s3536_s1 + $0x268] sm:$0xff]  ;;  %v2556_v42 = vpack.c.bf16 %v224_v39, %v223_v38  ;;  %v225_v44 = vld [vmem:[%s3536_s1 + $0x70] sm:$0xff]  ;;  %v226_v45 = vld [vmem:[%s3536_s1 + $0x78] sm:$0xff]  ;;  %s1732_s21 = sshll.u32 %s3542_s13, 1 }
   0xf   : > { %2669 = vmatprep.subr.bf16.mxu0 %v2668_v17  ;;  %v2684_v43 = vpack.c.bf16 %v1818_v41, %v1817_v40  ;;  %v1819_v46 = vld [vmem:[%s3536_s1 + $0x270] sm:$0xff]  ;;  %v1820_v47 = vld [vmem:[%s3536_s1 + $0x278] sm:$0xff]  ;;  %v2560_v48 = vpack.c.bf16 %v226_v45, %v225_v44  ;;  %v1741_v50 = vld [vmem:[%s3536_s1 + $0x80] sm:$0xff]  ;;  %s186_s24 = scalar_lea.vmem %s3538_s3, %s1732_s21 }
  0x10   : > { %s2999_s25 = scalar_lea.vmem %s3535_s0, %s2900_s14  ;;  %v2688_v49 = vpack.c.bf16 %v1820_v47, %v1819_v46  ;;  %v1742_v51 = vld [vmem:[%s3536_s1 + $0x88] sm:$0xff]  ;;  %v1829_v52 = vld [vmem:[%s3536_s1 + $0x280] sm:$0xff]  ;;  %v1743_v56 = vld [vmem:[%s3536_s1 + $0x90] sm:$0xff] }
  0x11   : > { %v195_v26 = vld [vmem:[%s2999_s25] sm:$0xff]  ;;  %v1797_v29 = vld [vmem:[%s2999_s25 + $0x1b0] sm:$0xff]  ;;  %2543 = vmatpush3.bf16.msra.mxu1 %v2540_v16  ;;  %v1830_v53 = vld [vmem:[%s3536_s1 + $0x288] sm:$0xff]  ;;  %v2564_v54 = vpack.c.bf16 %v1742_v51, %v1741_v50 }
  0x12   : > { %2168 = vmatprep.mubr.f32.mxu1 %v195_v26  ;;  %2344 = vmatprep.mubr.f32.mxu0 %v1797_v29  ;;  %v2692_v55 = vpack.c.bf16 %v1830_v53, %v1829_v52  ;;  %v1744_v57 = vld [vmem:[%s3536_s1 + $0x98] sm:$0xff]  ;;  %v1831_v58 = vld [vmem:[%s3536_s1 + $0x290] sm:$0xff]  ;;  %v1798_v61 = vld [vmem:[%s2999_s25 + $0x1c0] sm:$0xff] }
  0x13   : > { %2671 = vmatpush3.bf16.msra.mxu0 %v2668_v17  ;;  %2545 = vmatprep.subr.bf16.mxu1 %v2544_v22  ;;  %v1832_v59 = vld [vmem:[%s3536_s1 + $0x298] sm:$0xff]  ;;  %v3076_v60 = vld [vmem:[%s2999_s25 + $0x10] sm:$0xff]  ;;  %v2568_v62 = vpack.c.bf16 %v1744_v57, %v1743_v56  ;;  %v1745_v0 = vld [vmem:[%s3536_s1 + $0xa0] sm:$0xff] }
  0x14   : > { %2673 = vmatprep.subr.bf16.mxu0 %v2672_v23  ;;  %v2696_v63 = vpack.c.bf16 %v1832_v59, %v1831_v58  ;;  %v1746_v1 = vld [vmem:[%s3536_s1 + $0xa8] sm:$0xff]  ;;  %v1833_v2 = vld [vmem:[%s3536_s1 + $0x2a0] sm:$0xff]  ;;  %v1799_v5 = vld [vmem:[%s2999_s25 + $0x1d0] sm:$0xff] }
  0x15   : > { %2547 = vmatpush3.bf16.msra.mxu1 %v2544_v22  ;;  %v1834_v3 = vld [vmem:[%s3536_s1 + $0x2a8] sm:$0xff]  ;;  %v3093_v4 = vld [vmem:[%s2999_s25 + $0x20] sm:$0xff]  ;;  %v3097_v6 = vld [vmem:[%s2999_s25 + $0x30] sm:$0xff]  ;;  %v2572_v7 = vpack.c.bf16 %v1746_v1, %v1745_v0 }
  0x16   : > { %2549 = vmatprep.subr.bf16.mxu1 %v2548_v30  ;;  %v1800_v8 = vld [vmem:[%s2999_s25 + $0x1e0] sm:$0xff]  ;;  %v2700_v9 = vpack.c.bf16 %v1834_v3, %v1833_v2  ;;  %v1747_v10 = vld [vmem:[%s3536_s1 + $0xb0] sm:$0xff]  ;;  %v1748_v11 = vld [vmem:[%s3536_s1 + $0xb8] sm:$0xff] }
  0x17   : > { %2675 = vmatpush3.bf16.msra.mxu0 %v2672_v23  ;;  %v1835_v12 = vld [vmem:[%s3536_s1 + $0x2b0] sm:$0xff]  ;;  %v1836_v13 = vld [vmem:[%s3536_s1 + $0x2b8] sm:$0xff]  ;;  %v3115_v14 = vld [vmem:[%s2999_s25 + $0x40] sm:$0xff]  ;;  %v2576_v17 = vpack.c.bf16 %v1748_v11, %v1747_v10 }
  0x18   : > { %2677 = vmatprep.subr.bf16.mxu0 %v2676_v31  ;;  %v1801_v15 = vld [vmem:[%s2999_s25 + $0x1f0] sm:$0xff]  ;;  %v1802_v18 = vld [vmem:[%s2999_s25 + $0x200] sm:$0xff]  ;;  %v2704_v19 = vpack.c.bf16 %v1836_v13, %v1835_v12  ;;  %v1750_v21 = vld [vmem:[%s3536_s1 + $0xc8] sm:$0xff] }
  0x19   : > { %2551 = vmatpush3.bf16.msra.mxu1 %v2548_v30  ;;  %v3119_v16 = vld [vmem:[%s2999_s25 + $0x50] sm:$0xff]  ;;  %v1749_v20 = vld [vmem:[%s3536_s1 + $0xc0] sm:$0xff]  ;;  %v1838_v23 = vld [vmem:[%s3536_s1 + $0x2c8] sm:$0xff] }
  0x1a   : > { %2553 = vmatprep.subr.bf16.mxu1 %v2552_v36  ;;  %v1837_v22 = vld [vmem:[%s3536_s1 + $0x2c0] sm:$0xff]  ;;  %v1803_v25 = vld [vmem:[%s2999_s25 + $0x210] sm:$0xff]  ;;  %v2580_v27 = vpack.c.bf16 %v1750_v21, %v1749_v20  ;;  %v1840_v33 = vld [vmem:[%s3536_s1 + $0x2d8] sm:$0xff] }
  0x1b   : > { %2679 = vmatpush3.bf16.msra.mxu0 %v2676_v31  ;;  %v3137_v24 = vld [vmem:[%s2999_s25 + $0x60] sm:$0xff]  ;;  %v3141_v26 = vld [vmem:[%s2999_s25 + $0x70] sm:$0xff]  ;;  %v2708_v29 = vpack.c.bf16 %v1838_v23, %v1837_v22  ;;  %v1752_v31 = vld [vmem:[%s3536_s1 + $0xd8] sm:$0xff] }
  0x1c   : > { %2681 = vmatprep.subr.bf16.mxu0 %v2680_v37  ;;  %v1804_v28 = vld [vmem:[%s2999_s25 + $0x220] sm:$0xff]  ;;  %v1751_v30 = vld [vmem:[%s3536_s1 + $0xd0] sm:$0xff]  ;;  %v1754_v39 = vld [vmem:[%s3536_s1 + $0xe8] sm:$0xff] }
  0x1d   : > { %2555 = vmatpush3.bf16.msra.mxu1 %v2552_v36  ;;  %v1839_v32 = vld [vmem:[%s3536_s1 + $0x2d0] sm:$0xff]  ;;  %v1821_v35 = vld [vmem:[%s2999_s25 + $0x121] sm:$0xff]  ;;  %v2584_v36 = vpack.c.bf16 %v1752_v31, %v1751_v30  ;;  %v1756_v45 = vld [vmem:[%s3536_s1 + $0xf8] sm:$0xff] }
  0x1e   : > { %2557 = vmatprep.subr.bf16.mxu1 %v2556_v42  ;;  %v1733_v34 = vld [vmem:[%s2999_s25 + $0x90] sm:$0xff]  ;;  %v1753_v38 = vld [vmem:[%s3536_s1 + $0xe0] sm:$0xff]  ;;  %v1842_v41 = vld [vmem:[%s3536_s1 + $0x2e8] sm:$0xff] }
  0x1f   : > { %2683 = vmatpush3.bf16.msra.mxu0 %v2680_v37  ;;  %v2712_v37 = vpack.c.bf16 %v1840_v33, %v1839_v32  ;;  %v1841_v40 = vld [vmem:[%s3536_s1 + $0x2e0] sm:$0xff]  ;;  %v1755_v44 = vld [vmem:[%s3536_s1 + $0xf0] sm:$0xff]  ;;  %v1844_v47 = vld [vmem:[%s3536_s1 + $0x2f8] sm:$0xff] }
  0x20   : > { %2685 = vmatprep.subr.bf16.mxu0 %v2684_v43  ;;  %v1843_v46 = vld [vmem:[%s3536_s1 + $0x2f0] sm:$0xff]  ;;  %v1757_v50 = vld [vmem:[%s3536_s1 + $0x100] sm:$0xff]  ;;  %v1758_v51 = vld [vmem:[%s3536_s1 + $0x108] sm:$0xff] }
  0x21   : > { %2559 = vmatpush3.bf16.msra.mxu1 %v2556_v42  ;;  %v2588_v42 = vpack.c.bf16 %v1754_v39, %v1753_v38  ;;  %v1853_v52 = vld [vmem:[%s3536_s1 + $0x300] sm:$0xff]  ;;  %v1854_v53 = vld [vmem:[%s3536_s1 + $0x308] sm:$0xff]  ;;  %v1759_v56 = vld [vmem:[%s3536_s1 + $0x110] sm:$0xff] }
  0x22   : > { %2561 = vmatprep.subr.bf16.mxu1 %v2560_v48  ;;  %v1760_v57 = vld [vmem:[%s3536_s1 + $0x118] sm:$0xff]  ;;  %v1855_v58 = vld [vmem:[%s3536_s1 + $0x310] sm:$0xff]  ;;  %v1761_v1 = vld [vmem:[%s3536_s1 + $0x120] sm:$0xff] }
  0x23   : > { %2687 = vmatpush3.bf16.msra.mxu0 %v2684_v43  ;;  %v2716_v43 = vpack.c.bf16 %v1842_v41, %v1841_v40  ;;  %v1856_v59 = vld [vmem:[%s3536_s1 + $0x318] sm:$0xff]  ;;  %v1762_v2 = vld [vmem:[%s3536_s1 + $0x128] sm:$0xff]  ;;  %v1857_v3 = vld [vmem:[%s3536_s1 + $0x320] sm:$0xff] }
  0x24   : > { %2689 = vmatprep.subr.bf16.mxu0 %v2688_v49  ;;  %v2728_v0 = vpack.c.bf16 %v1856_v59, %v1855_v58  ;;  %v2604_v10 = vpack.c.bf16 %v1762_v2, %v1761_v1  ;;  %v1824_v11 = vld [vmem:[%s2999_s25 + $0x151] sm:$0xff]  ;;  %v1825_v20 = vld [vmem:[%s2999_s25 + $0x161] sm:$0xff] }
  0x25   : > { %2563 = vmatpush3.bf16.msra.mxu1 %v2560_v48  ;;  %v2592_v48 = vpack.c.bf16 %v1756_v45, %v1755_v44  ;;  %v1763_v13 = vld [vmem:[%s3536_s1 + $0x130] sm:$0xff]  ;;  %v3252_v21 = vld [vmem:[%s2999_s25 + $0xe0] sm:$0xff]  ;;  %v1862_v30 = vld [vmem:[%s3536_s1 + $0x348] sm:$0xff] }
  0x26   : > { %2565 = vmatprep.subr.bf16.mxu1 %v2564_v54  ;;  %v1826_v23 = vld [vmem:[%s2999_s25 + $0x171] sm:$0xff]  ;;  %v1827_v32 = vld [vmem:[%s2999_s25 + $0x181] sm:$0xff] }
  0x27   : > { %2691 = vmatpush3.bf16.msra.mxu0 %v2688_v49  ;;  %v2720_v49 = vpack.c.bf16 %v1844_v47, %v1843_v46  ;;  %v3270_v31 = vld [vmem:[%s2999_s25 + $0xf0] sm:$0xff]  ;;  %v3274_v33 = vld [vmem:[%s2999_s25 + $0x100] sm:$0xff]  ;;  %v1768_v38 = vld [vmem:[%s3536_s1 + $0x158] sm:$0xff] }
  0x28   : > { %2693 = vmatprep.subr.bf16.mxu0 %v2692_v55  ;;  %2169 = vmatmul.mubr.f32.vlgmr.msra.gmra.mrb[0].mxu1 %v3076_v60  ;;  %v1863_v39 = vld [vmem:[%s3536_s1 + $0x350] sm:$0xff]  ;;  %v1864_v40 = vld [vmem:[%s3536_s1 + $0x358] sm:$0xff]  ;;  %v503_v41 = vld [vmem:[%s2999_s25 + $0x1] sm:$0xff] }
  0x29   : > { %2567 = vmatpush3.bf16.msra.mxu1 %v2564_v54  ;;  %2171 = vmatprep.mubr.f32.mxu1 %v3093_v4  ;;  %v2596_v54 = vpack.c.bf16 %v1758_v51, %v1757_v50  ;;  %v1769_v44 = vld [vmem:[%s3536_s1 + $0x160] sm:$0xff]  ;;  %v1770_v45 = vld [vmem:[%s3536_s1 + $0x168] sm:$0xff]  ;;  %v1771_v50 = vld [vmem:[%s3536_s1 + $0x170] sm:$0xff] }
  0x2a   : > { %2345 = vmatmul.mubr.f32.vlgmr.msra.gmra.mrb[0].mxu0 %v1798_v61  ;;  %2569 = vmatprep.subr.bf16.mxu1 %v2568_v62  ;;  %v3209_v61 = vld [vmem:[%s2999_s25 + $0xa0] sm:$0xff]  ;;  %v1866_v47 = vld [vmem:[%s3536_s1 + $0x368] sm:$0xff]  ;;  %v1772_v51 = vld [vmem:[%s3536_s1 + $0x178] sm:$0xff] }
  0x2b   : > { %2695 = vmatpush3.bf16.msra.mxu0 %v2692_v55  ;;  %2347 = vmatprep.mubr.f32.mxu0 %v1799_v5  ;;  %v2724_v55 = vpack.c.bf16 %v1854_v53, %v1853_v52  ;;  %v1858_v5 = vld [vmem:[%s3536_s1 + $0x328] sm:$0xff]  ;;  %v1865_v46 = vld [vmem:[%s3536_s1 + $0x360] sm:$0xff]  ;;  %v1867_v52 = vld [vmem:[%s3536_s1 + $0x370] sm:$0xff]  ;;  %v2624_v53 = vpack.c.bf16 %v1772_v51, %v1771_v50 }
  0x2c   : > { %2697 = vmatprep.subr.bf16.mxu0 %v2696_v63  ;;  %2172 = vmatmul.mubr.f32.gmra.mrb[2].mxu1 %v3097_v6  ;;  %v2732_v12 = vpack.c.bf16 %v1858_v5, %v1857_v3  ;;  %v1878_v58 = vld [vmem:[%s3536_s1 + $0x388] sm:$0xff]  ;;  %v1879_v1 = vld [vmem:[%s3536_s1 + $0x390] sm:$0xff]  ;;  %v1880_v2 = vld [vmem:[%s3536_s1 + $0x398] sm:$0xff] }
  0x2d   : > { %2571 = vmatpush3.bf16.msra.mxu1 %v2568_v62  ;;  %2174 = vmatprep.mubr.f32.mxu1 %v3115_v14  ;;  %v1822_v62 = vld [vmem:[%s2999_s25 + $0x131] sm:$0xff] }
  0x2e   : > { %2348 = vmatmul.mubr.f32.gmra.mrb[2].mxu0 %v1800_v8  ;;  %2573 = vmatprep.subr.bf16.mxu1 %v2572_v7  ;;  %v1823_v8 = vld [vmem:[%s2999_s25 + $0x141] sm:$0xff]  ;;  %v3342_v3 = vld [vmem:[%s2999_s25 + $0x11] sm:$0xff] }
  0x2f   : > { %2699 = vmatpush3.bf16.msra.mxu0 %v2696_v63  ;;  %2350 = vmatprep.mubr.f32.mxu0 %v1801_v15  ;;  %v2600_v63 = vpack.c.bf16 %v1760_v57, %v1759_v56  ;;  %v1764_v15 = vld [vmem:[%s3536_s1 + $0x138] sm:$0xff]  ;;  %v1782_v56 = vld [vmem:[%s3536_s1 + $0x188] sm:$0xff]  ;;  %v1877_v57 = vld [vmem:[%s3536_s1 + $0x380] sm:$0xff] }
  0x30   : > { %2701 = vmatprep.subr.bf16.mxu0 %v2700_v9  ;;  %2175 = vmatmul.mubr.f32.gmra.mrb[4].mxu1 %v3119_v16  ;;  %v2608_v22 = vpack.c.bf16 %v1764_v15, %v1763_v13  ;;  %v1882_v13 = vld [vmem:[%s3536_s1 + $0x3a8] sm:$0xff]  ;;  %v1795_v50 = vld [vmem:[%s3536_s1 + $0x1f0] sm:$0xff]  ;;  %v1796_v51 = vld [vmem:[%s3536_s1 + $0x1f8] sm:$0xff] }
  0x31   : > { %2575 = vmatpush3.bf16.msra.mxu1 %v2572_v7  ;;  %2177 = vmatprep.mubr.f32.mxu1 %v3137_v24  ;;  %v3226_v7 = vld [vmem:[%s2999_s25 + $0xb0] sm:$0xff]  ;;  %v3358_v15 = vld [vmem:[%s2999_s25 + $0x21] sm:$0xff] }
  0x32   : > { %2351 = vmatmul.mubr.f32.gmra.mrb[4].mxu0 %v1802_v18  ;;  %2577 = vmatprep.subr.bf16.mxu1 %v2576_v17  ;;  %v1860_v18 = vld [vmem:[%s3536_s1 + $0x338] sm:$0xff] }
  0x33   : > { %2703 = vmatpush3.bf16.msra.mxu0 %v2700_v9  ;;  %2353 = vmatprep.mubr.f32.mxu0 %v1803_v25  ;;  %v3230_v9 = vld [vmem:[%s2999_s25 + $0xc0] sm:$0xff] }
  0x34   : > { %2705 = vmatprep.subr.bf16.mxu0 %v2704_v19  ;;  %2178 = vmatmul.mubr.f32.gmra.mrb[6].mxu1 %v3141_v26 }
  0x35   : > { %2579 = vmatpush3.bf16.msra.mxu1 %v2576_v17  ;;  %2212 = vmatprep.mubr.f32.mxu1 %v1733_v34  ;;  %v1859_v17 = vld [vmem:[%s3536_s1 + $0x330] sm:$0xff] }
  0x36   : > { %2354 = vmatmul.mubr.f32.gmra.mrb[6].mxu0 %v1804_v28  ;;  %2581 = vmatprep.subr.bf16.mxu1 %v2580_v27  ;;  %v2736_v25 = vpack.c.bf16 %v1860_v18, %v1859_v17  ;;  %v1766_v28 = vld [vmem:[%s3536_s1 + $0x148] sm:$0xff]  ;;  %v3362_v17 = vld [vmem:[%s2999_s25 + $0x31] sm:$0xff] }
  0x37   : > { %2707 = vmatpush3.bf16.msra.mxu0 %v2704_v19  ;;  %2388 = vmatprep.mubr.f32.mxu0 %v1821_v35  ;;  %v3248_v19 = vld [vmem:[%s2999_s25 + $0xd0] sm:$0xff] }
  0x38   : > { %2709 = vmatprep.subr.bf16.mxu0 %v2708_v29  ;;  %v1828_v35 = vld [vmem:[%s2999_s25 + $0x191] sm:$0xff] }
  0x39   : > { %2583 = vmatpush3.bf16.msra.mxu1 %v2580_v27  ;;  %v1765_v27 = vld [vmem:[%s3536_s1 + $0x140] sm:$0xff] }
  0x3a   : > { %2585 = vmatprep.subr.bf16.mxu1 %v2584_v36  ;;  %v2612_v34 = vpack.c.bf16 %v1766_v28, %v1765_v27  ;;  %v3380_v27 = vld [vmem:[%s2999_s25 + $0x41] sm:$0xff]  ;;  %v3384_v28 = vld [vmem:[%s2999_s25 + $0x51] sm:$0xff] }
  0x3b   : > { %2711 = vmatpush3.bf16.msra.mxu0 %v2708_v29  ;;  %v1861_v29 = vld [vmem:[%s3536_s1 + $0x340] sm:$0xff] }
  0x3c   : > { %2713 = vmatprep.subr.bf16.mxu0 %v2712_v37 }
  0x3d   : > { %2587 = vmatpush3.bf16.msra.mxu1 %v2584_v36  ;;  %v2740_v36 = vpack.c.bf16 %v1862_v30, %v1861_v29 }
  0x3e   : > { %2589 = vmatprep.subr.bf16.mxu1 %v2588_v42 }
  0x3f   : > { %2715 = vmatpush3.bf16.msra.mxu0 %v2712_v37  ;;  %v1767_v37 = vld [vmem:[%s3536_s1 + $0x150] sm:$0xff] }
  0x40   : > { %2717 = vmatprep.subr.bf16.mxu0 %v2716_v43 }
  0x41   : > { %2591 = vmatpush3.bf16.msra.mxu1 %v2588_v42  ;;  %v2616_v42 = vpack.c.bf16 %v1768_v38, %v1767_v37  ;;  %v1852_v38 = vld [vmem:[%s2999_s25 + $0x80] sm:$0xff] }
  0x42   : > { %2593 = vmatprep.subr.bf16.mxu1 %v2592_v48 }
  0x43   : > { %2719 = vmatpush3.bf16.msra.mxu0 %v2716_v43  ;;  %v2744_v43 = vpack.c.bf16 %v1864_v40, %v1863_v39  ;;  %v1792_v40 = vld [vmem:[%s3536_s1 + $0x1d8] sm:$0xff] }
  0x44   : > { %2721 = vmatprep.subr.bf16.mxu0 %v2720_v49 }
  0x45   : > { %2595 = vmatpush3.bf16.msra.mxu1 %v2592_v48  ;;  %v2620_v48 = vpack.c.bf16 %v1770_v45, %v1769_v44  ;;  %v1793_v45 = vld [vmem:[%s3536_s1 + $0x1e0] sm:$0xff] }
  0x46   : > { %2597 = vmatprep.subr.bf16.mxu1 %v2596_v54 }
  0x47   : > { %2723 = vmatpush3.bf16.msra.mxu0 %v2720_v49  ;;  %v2748_v49 = vpack.c.bf16 %v1866_v47, %v1865_v46  ;;  %v1794_v46 = vld [vmem:[%s3536_s1 + $0x1e8] sm:$0xff] }
  0x48   : > { %2725 = vmatprep.subr.bf16.mxu0 %v2724_v55  ;;  %2213 = vmatmul.mubr.f32.vlgmr.msra.gmra.mrb[0].mxu1 %v3209_v61  ;;  %v1890_v47 = vld [vmem:[%s3536_s1 + $0x3e8] sm:$0xff] }
  0x49   : > { %2599 = vmatpush3.bf16.msra.mxu1 %v2596_v54  ;;  %2215 = vmatprep.mubr.f32.mxu1 %v3226_v7 }
  0x4a   : > { %2389 = vmatmul.mubr.f32.vlgmr.msra.gmra.mrb[0].mxu0 %v1822_v62  ;;  %2601 = vmatprep.subr.bf16.mxu1 %v2600_v63  ;;  %v2756_v62 = vpack.c.bf16 %v1878_v58, %v1877_v57  ;;  %v1903_v57 = vld [vmem:[%s3536_s1 + $0x410] sm:$0xff]  ;;  %v1904_v58 = vld [vmem:[%s3536_s1 + $0x418] sm:$0xff] }
  0x4b   : > { %2727 = vmatpush3.bf16.msra.mxu0 %v2724_v55  ;;  %2391 = vmatprep.mubr.f32.mxu0 %v1823_v8  ;;  %v1781_v55 = vld [vmem:[%s3536_s1 + $0x180] sm:$0xff]  ;;  %v2760_v8 = vpack.c.bf16 %v1880_v2, %v1879_v1  ;;  %v1906_v1 = vld [vmem:[%s3536_s1 + $0x428] sm:$0xff]  ;;  %v1776_v2 = vld [vmem:[%s2999_s25 + $0x150] sm:$0xff] }
  0x4c   : > { %2729 = vmatprep.subr.bf16.mxu0 %v2728_v0  ;;  %2216 = vmatmul.mubr.f32.gmra.mrb[2].mxu1 %v3230_v9  ;;  %v2628_v59 = vpack.c.bf16 %v1782_v56, %v1781_v55  ;;  %v1902_v55 = vld [vmem:[%s3536_s1 + $0x408] sm:$0xff] }
  0x4d   : > { %2603 = vmatpush3.bf16.msra.mxu1 %v2600_v63  ;;  %2218 = vmatprep.mubr.f32.mxu1 %v3248_v19  ;;  %v1783_v63 = vld [vmem:[%s3536_s1 + $0x190] sm:$0xff] }
  0x4e   : > { %2392 = vmatmul.mubr.f32.gmra.mrb[2].mxu0 %v1824_v11  ;;  %2605 = vmatprep.subr.bf16.mxu1 %v2604_v10  ;;  %v1786_v11 = vld [vmem:[%s3536_s1 + $0x1a8] sm:$0xff] }
  0x4f   : > { %2731 = vmatpush3.bf16.msra.mxu0 %v2728_v0  ;;  %2394 = vmatprep.mubr.f32.mxu0 %v1825_v20  ;;  %v1784_v0 = vld [vmem:[%s3536_s1 + $0x198] sm:$0xff] }
  0x50   : > { %2733 = vmatprep.subr.bf16.mxu0 %v2732_v12  ;;  %2219 = vmatmul.mubr.f32.gmra.mrb[4].mxu1 %v3252_v21  ;;  %v2632_v5 = vpack.c.bf16 %v1784_v0, %v1783_v63  ;;  %v2792_v63 = vpack.c.bf16 %v1904_v58, %v1903_v57  ;;  %v1905_v0 = vld [vmem:[%s3536_s1 + $0x420] sm:$0xff] }
  0x51   : > { %2607 = vmatpush3.bf16.msra.mxu1 %v2604_v10  ;;  %2221 = vmatprep.mubr.f32.mxu1 %v3270_v31  ;;  %v1785_v10 = vld [vmem:[%s3536_s1 + $0x1a0] sm:$0xff] }
  0x52   : > { %2395 = vmatmul.mubr.f32.gmra.mrb[4].mxu0 %v1826_v23  ;;  %2609 = vmatprep.subr.bf16.mxu1 %v2608_v22  ;;  %v2636_v18 = vpack.c.bf16 %v1786_v11, %v1785_v10  ;;  %v1788_v23 = vld [vmem:[%s3536_s1 + $0x1b8] sm:$0xff]  ;;  %v1907_v10 = vld [vmem:[%s3536_s1 + $0x430] sm:$0xff] }
  0x53   : > { %2735 = vmatpush3.bf16.msra.mxu0 %v2732_v12  ;;  %2397 = vmatprep.mubr.f32.mxu0 %v1827_v32  ;;  %v1881_v12 = vld [vmem:[%s3536_s1 + $0x3a0] sm:$0xff]  ;;  %v1790_v32 = vld [vmem:[%s3536_s1 + $0x1c8] sm:$0xff]  ;;  %v1778_v11 = vld [vmem:[%s2999_s25 + $0x170] sm:$0xff] }
  0x54   : > { %2737 = vmatprep.subr.bf16.mxu0 %v2736_v25  ;;  %2222 = vmatmul.mubr.f32.gmra.mrb[6].mxu1 %v3274_v33  ;;  %v2764_v20 = vpack.c.bf16 %v1882_v13, %v1881_v12  ;;  %v1909_v13 = vld [vmem:[%s3536_s1 + $0x440] sm:$0xff] }
  0x55   : > { %2611 = vmatpush3.bf16.msra.mxu1 %v2608_v22  ;;  %2256 = vmatprep.mubr.f32.mxu1 %v503_v41  ;;  %v1787_v22 = vld [vmem:[%s3536_s1 + $0x1b0] sm:$0xff]  ;;  %v1888_v41 = vld [vmem:[%s3536_s1 + $0x3d8] sm:$0xff] }
  0x56   : > { %2398 = vmatmul.mubr.f32.gmra.mrb[6].mxu0 %v1828_v35  ;;  %2613 = vmatprep.subr.bf16.mxu1 %v2612_v34  ;;  %v2640_v29 = vpack.c.bf16 %v1788_v23, %v1787_v22  ;;  %v3402_v35 = vld [vmem:[%s2999_s25 + $0x61] sm:$0xff]  ;;  %v1911_v22 = vld [vmem:[%s3536_s1 + $0x450] sm:$0xff]  ;;  %v1912_v23 = vld [vmem:[%s3536_s1 + $0x458] sm:$0xff] }
  0x57   : > { %2739 = vmatpush3.bf16.msra.mxu0 %v2736_v25  ;;  %2432 = vmatprep.mubr.f32.mxu0 %v3076_v60  ;;  %v1868_v60 = vld [vmem:[%s3536_s1 + $0x378] sm:$0xff] }
  0x58   : > { %2741 = vmatprep.subr.bf16.mxu0 %v2740_v36  ;;  %v2752_v54 = vpack.c.bf16 %v1868_v60, %v1867_v52  ;;  %v1884_v25 = vld [vmem:[%s3536_s1 + $0x3b8] sm:$0xff]  ;;  %v1891_v52 = vld [vmem:[%s3536_s1 + $0x3f0] sm:$0xff]  ;;  %v2656_v60 = vpack.c.bf16 %v1796_v51, %v1795_v50 }
  0x59   : > { %2615 = vmatpush3.bf16.msra.mxu1 %v2612_v34  ;;  %v1886_v34 = vld [vmem:[%s3536_s1 + $0x3c8] sm:$0xff] }
  0x5a   : > { %2617 = vmatprep.subr.bf16.mxu1 %v2616_v42 }
  0x5b   : > { %2743 = vmatpush3.bf16.msra.mxu0 %v2740_v36  ;;  %v3406_v36 = vld [vmem:[%s2999_s25 + $0x71] sm:$0xff] }
  0x5c   : > { %2745 = vmatprep.subr.bf16.mxu0 %v2744_v43 }
  0x5d   : > { %2619 = vmatpush3.bf16.msra.mxu1 %v2616_v42  ;;  %v1773_v42 = vld [vmem:[%s2999_s25 + $0x120] sm:$0xff] }
  0x5e   : > { %2621 = vmatprep.subr.bf16.mxu1 %v2620_v48 }
  0x5f   : > { %2747 = vmatpush3.bf16.msra.mxu0 %v2744_v43 }
  0x60   : > { %2749 = vmatprep.subr.bf16.mxu0 %v2748_v49 }
  0x61   : > { %2623 = vmatpush3.bf16.msra.mxu1 %v2620_v48  ;;  %v2652_v48 = vpack.c.bf16 %v1794_v46, %v1793_v45 }
  0x62   : > { %2625 = vmatprep.subr.bf16.mxu1 %v2624_v53 }
  0x63   : > { %2751 = vmatpush3.bf16.msra.mxu0 %v2748_v49 }
  0x64   : > { %2753 = vmatprep.subr.bf16.mxu0 %v2752_v54 }
  0x65   : > { %2627 = vmatpush3.bf16.msra.mxu1 %v2624_v53 }
  0x66   : > { %2629 = vmatprep.subr.bf16.mxu1 %v2628_v59 }
  0x67   : > { %2755 = vmatpush3.bf16.msra.mxu0 %v2752_v54  ;;  %v1901_v54 = vld [vmem:[%s3536_s1 + $0x400] sm:$0xff] }
  0x68   : > { %2757 = vmatprep.subr.bf16.mxu0 %v2756_v62  ;;  %2257 = vmatmul.mubr.f32.vlgmr.msra.gmra.mrb[0].mxu1 %v3342_v3  ;;  %v2788_v56 = vpack.c.bf16 %v1902_v55, %v1901_v54 }
  0x69   : > { %2631 = vmatpush3.bf16.msra.mxu1 %v2628_v59  ;;  %2259 = vmatprep.mubr.f32.mxu1 %v3358_v15  ;;  %v1774_v59 = vld [vmem:[%s2999_s25 + $0x130] sm:$0xff] }
  0x6a   : > { %2433 = vmatmul.mubr.f32.vlgmr.msra.gmra.mrb[0].mxu0 %v3093_v4  ;;  %2633 = vmatprep.subr.bf16.mxu1 %v2632_v5  ;;  %v1883_v4 = vld [vmem:[%s3536_s1 + $0x3b0] sm:$0xff] }
  0x6b   : > { %2759 = vmatpush3.bf16.msra.mxu0 %v2756_v62  ;;  %2435 = vmatprep.mubr.f32.mxu0 %v3097_v6  ;;  %v2768_v30 = vpack.c.bf16 %v1884_v25, %v1883_v4  ;;  %v1789_v6 = vld [vmem:[%s3536_s1 + $0x1c0] sm:$0xff]  ;;  %v1914_v4 = vld [vmem:[%s3536_s1 + $0x468] sm:$0xff] }
  0x6c   : > { %2761 = vmatprep.subr.bf16.mxu0 %v2760_v8  ;;  %2260 = vmatmul.mubr.f32.gmra.mrb[2].mxu1 %v3362_v17  ;;  %v2644_v37 = vpack.c.bf16 %v1790_v32, %v1789_v6  ;;  %v1775_v62 = vld [vmem:[%s2999_s25 + $0x140] sm:$0xff] }
  0x6d   : > { %2635 = vmatpush3.bf16.msra.mxu1 %v2632_v5  ;;  %2262 = vmatprep.mubr.f32.mxu1 %v3380_v27  ;;  %v1777_v5 = vld [vmem:[%s2999_s25 + $0x160] sm:$0xff] }
  0x6e   : > { %2436 = vmatmul.mubr.f32.gmra.mrb[2].mxu0 %v3115_v14  ;;  %2637 = vmatprep.subr.bf16.mxu1 %v2636_v18  ;;  %v1885_v14 = vld [vmem:[%s3536_s1 + $0x3c0] sm:$0xff] }
  0x6f   : > { %2763 = vmatpush3.bf16.msra.mxu0 %v2760_v8  ;;  %2438 = vmatprep.mubr.f32.mxu0 %v3119_v16  ;;  %v2772_v39 = vpack.c.bf16 %v1886_v34, %v1885_v14  ;;  %v1791_v16 = vld [vmem:[%s3536_s1 + $0x1d0] sm:$0xff]  ;;  %v2796_v8 = vpack.c.bf16 %v1906_v1, %v1905_v0 }
  0x70   : > { %2765 = vmatprep.subr.bf16.mxu0 %v2764_v20  ;;  %2263 = vmatmul.mubr.f32.gmra.mrb[4].mxu1 %v3384_v28  ;;  %v2648_v43 = vpack.c.bf16 %v1792_v40, %v1791_v16 }
  0x71   : > { %2639 = vmatpush3.bf16.msra.mxu1 %v2636_v18  ;;  %2265 = vmatprep.mubr.f32.mxu1 %v3402_v35  ;;  %v1910_v18 = vld [vmem:[%s3536_s1 + $0x448] sm:$0xff] }
  0x72   : > { %2439 = vmatmul.mubr.f32.gmra.mrb[4].mxu0 %v3137_v24  ;;  %2641 = vmatprep.subr.bf16.mxu1 %v2640_v29  ;;  %v1887_v24 = vld [vmem:[%s3536_s1 + $0x3d0] sm:$0xff] }
  0x73   : > { %2767 = vmatpush3.bf16.msra.mxu0 %v2764_v20  ;;  %2441 = vmatprep.mubr.f32.mxu0 %v3141_v26  ;;  %v2776_v44 = vpack.c.bf16 %v1888_v41, %v1887_v24  ;;  %v1889_v26 = vld [vmem:[%s3536_s1 + $0x3e0] sm:$0xff]  ;;  %v2804_v20 = vpack.c.bf16 %v1910_v18, %v1909_v13 }
  0x74   : > { %2769 = vmatprep.subr.bf16.mxu0 %v2768_v30  ;;  %2266 = vmatmul.mubr.f32.gmra.mrb[6].mxu1 %v3406_v36  ;;  %v2780_v49 = vpack.c.bf16 %v1890_v47, %v1889_v26 }
  0x75   : > { %2643 = vmatpush3.bf16.msra.mxu1 %v2640_v29  ;;  %2300 = vmatprep.mubr.f32.mxu1 %v1773_v42  ;;  %v1915_v29 = vld [vmem:[%s3536_s1 + $0x470] sm:$0xff] }
  0x76   : > { %2442 = vmatmul.mubr.f32.gmra.mrb[6].mxu0 %v1852_v38  ;;  %2645 = vmatprep.subr.bf16.mxu1 %v2644_v37 }
  0x77   : > { %2771 = vmatpush3.bf16.msra.mxu0 %v2768_v30  ;;  %2476 = vmatprep.mubr.f32.mxu0 %v3209_v61  ;;  %v1892_v61 = vld [vmem:[%s3536_s1 + $0x3f8] sm:$0xff] }
  0x78   : > { %2773 = vmatprep.subr.bf16.mxu0 %v2772_v39  ;;  %v2784_v53 = vpack.c.bf16 %v1892_v61, %v1891_v52  ;;  %v1916_v30 = vld [vmem:[%s3536_s1 + $0x478] sm:$0xff] }
  0x79   : > { %2647 = vmatpush3.bf16.msra.mxu1 %v2644_v37 }
  0x7a   : > { %2649 = vmatprep.subr.bf16.mxu1 %v2648_v43 }
  0x7b   : > { %2775 = vmatpush3.bf16.msra.mxu0 %v2772_v39 }
  0x7c   : > { %2777 = vmatprep.subr.bf16.mxu0 %v2776_v44 }
  0x7d   : > { %2651 = vmatpush3.bf16.msra.mxu1 %v2648_v43 }
  0x7e   : > { %2653 = vmatprep.subr.bf16.mxu1 %v2652_v48 }
  0x7f   : > { %2779 = vmatpush3.bf16.msra.mxu0 %v2776_v44 }
  0x80   : > { %2781 = vmatprep.subr.bf16.mxu0 %v2780_v49 }
  0x81   : > { %2655 = vmatpush3.bf16.msra.mxu1 %v2652_v48 }
  0x82   : > { %2657 = vmatprep.subr.bf16.mxu1 %v2656_v60 }
  0x83   : > { %2783 = vmatpush3.bf16.msra.mxu0 %v2780_v49 }
  0x84   : > { %2785 = vmatprep.subr.bf16.mxu0 %v2784_v53 }
  0x85   : > { %2659 = vmatpush3.bf16.msra.mxu1 %v2656_v60 }
  0x86   : > { %2820 = vmatprep.subr.bf16.mxu1 %v2788_v56 }
  0x87   : > { %2787 = vmatpush3.bf16.msra.mxu0 %v2784_v53 }
  0x88   : > { %2789 = vmatprep.subr.bf16.mxu0 %v2788_v56  ;;  %2301 = vmatmul.mubr.f32.vlgmr.msra.gmra.mrb[0].mxu1 %v1774_v59 }
  0x89   : > { %2828 = vmatpush3.bf16.msra.mxu1 %v2788_v56  ;;  %2303 = vmatprep.mubr.f32.mxu1 %v1775_v62 }
  0x8a   : > { %2477 = vmatmul.mubr.f32.vlgmr.msra.gmra.mrb[0].mxu0 %v3226_v7  ;;  %2821 = vmatprep.subr.bf16.mxu1 %v2792_v63  ;;  %v1908_v7 = vld [vmem:[%s3536_s1 + $0x438] sm:$0xff] }
  0x8b   : > { %2791 = vmatpush3.bf16.msra.mxu0 %v2788_v56  ;;  %2479 = vmatprep.mubr.f32.mxu0 %v3230_v9  ;;  %v1779_v9 = vld [vmem:[%s2999_s25 + $0x180] sm:$0xff]  ;;  %v2800_v12 = vpack.c.bf16 %v1908_v7, %v1907_v10 }
  0x8c   : > { %2793 = vmatprep.subr.bf16.mxu0 %v2792_v63  ;;  %2304 = vmatmul.mubr.f32.gmra.mrb[2].mxu1 %v1776_v2 }
  0x8d   : > { %2829 = vmatpush3.bf16.msra.mxu1 %v2792_v63  ;;  %2306 = vmatprep.mubr.f32.mxu1 %v1777_v5 }
  0x8e   : > { %2480 = vmatmul.mubr.f32.gmra.mrb[2].mxu0 %v3248_v19  ;;  %2822 = vmatprep.subr.bf16.mxu1 %v2796_v8  ;;  %v1780_v19 = vld [vmem:[%s2999_s25 + $0x190] sm:$0xff] }
  0x8f   : > { %2795 = vmatpush3.bf16.msra.mxu0 %v2792_v63  ;;  %2482 = vmatprep.mubr.f32.mxu0 %v3252_v21  ;;  %v1876_v21 = vld [vmem:[%s2999_s25 + $0x110] sm:$0xff] }
  0x90   : > { %2797 = vmatprep.subr.bf16.mxu0 %v2796_v8  ;;  %2307 = vmatmul.mubr.f32.gmra.mrb[4].mxu1 %v1778_v11 }
  0x91   : > { %2830 = vmatpush3.bf16.msra.mxu1 %v2796_v8  ;;  %2309 = vmatprep.mubr.f32.mxu1 %v1779_v9 }
  0x92   : > { %2483 = vmatmul.mubr.f32.gmra.mrb[4].mxu0 %v3270_v31  ;;  %2823 = vmatprep.subr.bf16.mxu1 %v2800_v12  ;;  %v2808_v31 = vpack.c.bf16 %v1912_v23, %v1911_v22 }
  0x93   : > { %2799 = vmatpush3.bf16.msra.mxu0 %v2796_v8  ;;  %2485 = vmatprep.mubr.f32.mxu0 %v3274_v33  ;;  %v1913_v33 = vld [vmem:[%s3536_s1 + $0x460] sm:$0xff] }
  0x94   : > { %2801 = vmatprep.subr.bf16.mxu0 %v2800_v12  ;;  %2310 = vmatmul.mubr.f32.gmra.mrb[6].mxu1 %v1780_v19  ;;  %v2812_v25 = vpack.c.bf16 %v1914_v4, %v1913_v33 }
  0x95   : > { %2831 = vmatpush3.bf16.msra.mxu1 %v2800_v12  ;;  %2526 = vmatprep.mubr.f32.mxu1 %v3384_v28  ;;  %v1900_v28 = vld [vmem:[%s2999_s25 + $0x81] sm:$0xff]  ;;  %s1919_s25 = sshll.u32 %s3542_s13, 6 }
  0x96   : > { %2486 = vmatmul.mubr.f32.gmra.mrb[6].mxu0 %v1876_v21  ;;  %2824 = vmatprep.subr.bf16.mxu1 %v2804_v20  ;;  %s182_s19 = scalar_lea.vmem %s3537_s2, %s1919_s25 }
  0x97   : > { %2803 = vmatpush3.bf16.msra.mxu0 %v2800_v12  ;;  %2520 = vmatprep.mubr.f32.mxu0 %v3342_v3  ;;  %v2816_v3 = vpack.c.bf16 %v1916_v30, %v1915_v29 }
  0x98   : > { %2805 = vmatprep.subr.bf16.mxu0 %v2804_v20 }
  0x99   : > { %2832 = vmatpush3.bf16.msra.mxu1 %v2804_v20 }
  0x9a   : > { %2825 = vmatprep.subr.bf16.mxu1 %v2808_v31 }
  0x9b   : > { %2807 = vmatpush3.bf16.msra.mxu0 %v2804_v20 }
  0x9c   : > { %2809 = vmatprep.subr.bf16.mxu0 %v2808_v31 }
  0x9d   : > { %2833 = vmatpush3.bf16.msra.mxu1 %v2808_v31 }
  0x9e   : > { %2826 = vmatprep.subr.bf16.mxu1 %v2812_v25 }
  0x9f   : > { %2811 = vmatpush3.bf16.msra.mxu0 %v2808_v31 }
  0xa0   : > { %2813 = vmatprep.subr.bf16.mxu0 %v2812_v25 }
  0xa1   : > { %2834 = vmatpush3.bf16.msra.mxu1 %v2812_v25 }
  0xa2   : > { %2827 = vmatprep.subr.bf16.mxu1 %v2816_v3 }
  0xa3   : > { %2815 = vmatpush3.bf16.msra.mxu0 %v2812_v25 }
  0xa4   : > { %2817 = vmatprep.subr.bf16.mxu0 %v2816_v3 }
  0xa5   : > { %2835 = vmatpush3.bf16.msra.mxu1 %v2816_v3 }
  0xa7   : > { %2819 = vmatpush3.bf16.msra.mxu0 %v2816_v3 }
  0xa8   : > { %2527 = vmatmul.mubr.f32.vlgmr.msra.gmra.mrb[8].mxu1 %v3402_v35 }
  0xa9   : > { %2529 = vmatprep.mubr.f32.mxu1 %v3406_v36 }
  0xaa   : > { %2521 = vmatmul.mubr.f32.vlgmr.msra.gmra.mrb[0].mxu0 %v3358_v15 }
  0xab   : > { %2523 = vmatprep.mubr.f32.mxu0 %v3362_v17 }
  0xac   : > { %2530 = vmatmul.mubr.f32.gmra.mrb[10].mxu1 %v1900_v28 }
  0xae   : > { %2524 = vmatmul.mubr.f32.gmra.mrb[2].mxu0 %v3380_v27 }
 0x15b   : > { %v2302_v6 = vpop.f32.mrb[0].mxu1 }
 0x15c   : > { %v757_v32 = vpop.f32.mrb[1].mxu1 }
 0x15f   : > { %v2305_v14 = vpop.f32.mrb[2].mxu1 }
 0x160   : > { %v767_v34 = vpop.f32.mrb[3].mxu1 }
 0x163   : > { %v2308_v37 = vpop.f32.mrb[4].mxu1 }
 0x164   : > { %v777_v39 = vpop.f32.mrb[5].mxu1 }
 0x165   : > { %v2484_v38 = vpop.f32.mrb[4].mxu0 }
 0x166   : > { %v2840_v35 = vadd.f32 %v2484_v38, %v2308_v37  ;;  %v1396_v16 = vpop.f32.mrb[5].mxu0 }
 0x167   : > { %v2842_v15 = vadd.f32 %v1396_v16, %v777_v39  ;;  %v2311_v40 = vpop.f32.mrb[6].mxu1 }
 0x168   : > { %v787_v24 = vpop.f32.mrb[7].mxu1 }
 0x169   : > { %v2487_v36 = vpop.f32.mrb[6].mxu0 }
 0x16a   : > { %v2844_v41 = vadd.f32 %v2487_v36, %v2311_v40  ;;  %v1406_v17 = vpop.f32.mrb[7].mxu0 }
 0x16b   : > { %v2846_v42 = vadd.f32 %v1406_v17, %v787_v24 }
 0x17b   : > { %v2528_v27 = vpop.f32.mrb[8].mxu1 }
 0x17c   : > { %v2841_v44 = vadd.f32 %v2840_v35, %v2528_v27  ;;  %v1550_v45 = vpop.f32.mrb[9].mxu1 }
 0x17d   : > { %v2522_v43 = vpop.f32.mrb[0].mxu0  ;;  %v2843_v47 = vadd.f32 %v2842_v15, %v1550_v45 }
 0x17e   : > { %v2836_v46 = vadd.f32 %v2522_v43, %v2302_v6  ;;  %v1530_v26 = vpop.f32.mrb[1].mxu0  ;;  %1598 = vst [vmem:[%s182_s19 + $0x28] sm:$0xff] %v2841_v44  ;;  %v1620_v10 = vmul.f32 %v2841_v44, %v2841_v44 }
 0x17f   : > { %v2837_v48 = vadd.f32 %v1530_v26, %v757_v32  ;;  %1597 = vst [vmem:[%s182_s19 + $0x20] sm:$0xff] %v2843_v47  ;;  %v2531_v50 = vpop.f32.mrb[10].mxu1  ;;  %v1619_v2 = vmul.f32 %v2843_v47, %v2843_v47 }
 0x180   : > { %1594 = vst [vmem:[%s182_s19 + $0x8] sm:$0xff] %v2836_v46  ;;  %v1616_v49 = vmul.f32 %v2836_v46, %v2836_v46  ;;  %v2845_v60 = vadd.f32 %v2844_v41, %v2531_v50  ;;  %v1560_v53 = vpop.f32.mrb[11].mxu1 }
 0x181   : > { %1593 = vst [vmem:[%s182_s19] sm:$0xff] %v2837_v48  ;;  %v1601_v51 = vadd.f32 %v2837_v48, %v2836_v46  ;;  %v1615_v52 = vmul.f32 %v2837_v48, %v2837_v48  ;;  %v2525_v61 = vpop.f32.mrb[2].mxu0  ;;  %v2847_v56 = vadd.f32 %v2846_v42, %v1560_v53 }
 0x182   : > { %v2838_v54 = vadd.f32 %v2525_v61, %v2305_v14  ;;  %v1540_v55 = vpop.f32.mrb[3].mxu0  ;;  %1600 = vst [vmem:[%s182_s19 + $0x38] sm:$0xff] %v2845_v60  ;;  %v1622_v18 = vmul.f32 %v2845_v60, %v2845_v60 }
 0x183   : > { %v1623_v57 = vadd.f32 %v1616_v49, %v1615_v52  ;;  %v2839_v58 = vadd.f32 %v1540_v55, %v767_v34  ;;  %1599 = vst [vmem:[%s182_s19 + $0x30] sm:$0xff] %v2847_v56  ;;  %v1621_v12 = vmul.f32 %v2847_v56, %v2847_v56 }
 0x184   : > { %1596 = vst [vmem:[%s182_s19 + $0x18] sm:$0xff] %v2838_v54  ;;  %v1618_v63 = vmul.f32 %v2838_v54, %v2838_v54 }
 0x185   : > { %1595 = vst [vmem:[%s182_s19 + $0x10] sm:$0xff] %v2839_v58  ;;  %v1602_v59 = vadd.f32 %v2839_v58, %v1601_v51  ;;  %v1617_v62 = vmul.f32 %v2839_v58, %v2839_v58 }
 0x187   : > { %v1603_v0 = vadd.f32 %v2838_v54, %v1602_v59  ;;  %v1624_v1 = vadd.f32 %v1623_v57, %v1617_v62 }
 0x189   : > { %v1625_v5 = vadd.f32 %v1624_v1, %v1618_v63  ;;  %v1604_v8 = vadd.f32 %v2843_v47, %v1603_v0 }
 0x18b   : > { %v1605_v7 = vadd.f32 %v2841_v44, %v1604_v8  ;;  %v1626_v11 = vadd.f32 %v1625_v5, %v1619_v2 }
 0x18d   : > { %v1606_v9 = vadd.f32 %v2847_v56, %v1605_v7  ;;  %v1627_v13 = vadd.f32 %v1626_v11, %v1620_v10 }
 0x18f   : > { %v1607_v19 = vadd.f32 %v2845_v60, %v1606_v9  ;;  %v1628_v21 = vadd.f32 %v1627_v13, %v1621_v12 }
 0x191   : > { %v1608_v20 = vrot.slane %v1607_v19, 4  ;;  %v1629_v22 = vadd.f32 %v1628_v21, %v1622_v18 }
 0x193   : > { %v1609_v23 = vadd.f32 %v1608_v20, %v1607_v19  ;;  %v1630_v31 = vrot.slane %v1629_v22, 4 }
 0x195   : > { %v1610_v33 = vrot.slane %v1609_v23, 2  ;;  %v1631_v4 = vadd.f32 %v1630_v31, %v1629_v22 }
 0x197   : > { %v1611_v25 = vadd.f32 %v1610_v33, %v1609_v23  ;;  %v1632_v29 = vrot.slane %v1631_v4, 2 }
 0x199   : > { %v1612_v30 = vrot.slane %v1611_v25, 1  ;;  %v1633_v3 = vadd.f32 %v1632_v29, %v1631_v4 }
 0x19b   : > { %v1613_v28 = vadd.f32 %v1612_v30, %v1611_v25  ;;  %v1634_v6 = vrot.slane %v1633_v3, 1 }
 0x19d   : > { %1614 = vst [vmem:[%s186_s24] sm:$0x1] %v1613_v28  ;;  %v1635_v32 = vadd.f32 %v1634_v6, %v1633_v3 }
 0x19f   : > { %1636 = vst [vmem:[%s186_s24 + $0x1] sm:$0x1] %v1635_v32 }
 0x1a0 PF: > { %s14_s12 = sadd.s32 1, %s2915_s12  }
 0x1a1   : > { %p11_p5 = scmp.ge.s32.totalorder %s14_s12, 4  }
 0x1a3   :  { %13 = sbr.rel (!%p11_p5) target bundleno = 1 (0x1), region = 83 }

// kernel: resnet_block_forward.4
= control target key start
LH: loop header
LB: loop body
LE: loop exit
PB: predicated region body
PF: predicated region fallthrough
CT: control target
= control target key end

     0   :  { %s3430_s24 = smov 0   ;;  %s4158_s0 = inlined_call_operand.vmem [shape: f32[2,64,128], index: 0, kind: input, shape index: {}]   ;;  %s4159_s1 = inlined_call_operand.vmem [shape: f32[2,128], index: 1, kind: input, shape index: {}]   ;;  %s4160_s2 = inlined_call_operand.vmem [shape: f32[8,9,9,128], index: 2, kind: input, shape index: {}]   ;;  %s4161_s3 = inlined_call_operand.vmem [shape: f32[9,128,128], index: 3, kind: input, shape index: {}]   ;;  %s4162_s4 = inlined_call_operand.vmem [shape: f32[128,128], index: 4, kind: input, shape index: {}]   ;;  %s4163_s5 = inlined_call_operand.vmem [shape: f32[2,64,128], index: 5, kind: output, shape index: {0}]   ;;  %s4164_s6 = inlined_call_operand.vmem [shape: f32[2,64,128], index: 6, kind: output, shape index: {1}]   ;;  %s4165_s7 = inlined_call_operand.vmem [shape: f32[2,4,128], index: 7, kind: output, shape index: {2}]  }
   0x1 LB: > { %s3436_s25 = sadd.s32 4294967295, %s3387_s24   ;;  %p2162_p0 = scmp.ge.s32.totalorder %s3387_s24, 1  ;;  %s3387_s24 = sphi %s3430_s24, %s18_s24  }
   0x2   : > { %p260_p1 = scmp.lt.s32.totalorder %s3387_s24, 3 }
   0x4   : > { %p261_p2 = pnand %p2162_p0, %p260_p1 }
   0x5   : > { %v430_v0 = vld [vmem:[%s4161_s3] sm:$0xff] (!%p261_p2)  ;;  %v431_v1 = vld [vmem:[%s4161_s3 + $0x8] sm:$0xff] (!%p261_p2)  ;;  %p308_p3 = scmp.lt.s32.totalorder (!%p261_p2), %s3436_s25, 1  ;;  %v345_v3 = vlaneseq (!%p261_p2)  ;;  %v432_v6 = vld [vmem:[%s4161_s3 + $0x10] sm:$0xff] (!%p261_p2)  ;;  %v3389_v8 = vmov (!%p261_p2), 0.0   ;;  %s2165_s19 = sshll.u32 (!%p261_p2), %s3436_s25, 2 }
   0x6   : > { %264 = sbr.rel (%p261_p2) target bundleno = 415 (0x19f), region = 40  ;;  %v2220_v2 = vld [vmem:[%s4161_s3 + $0x200] sm:$0xff] (!%p261_p2)  ;;  %v2987_v4 = vpack.c.bf16 (!%p261_p2), %v431_v1, %v430_v0  ;;  %v2221_v5 = vld [vmem:[%s4161_s3 + $0x208] sm:$0xff] (!%p261_p2)  ;;  %v433_v7 = vld [vmem:[%s4161_s3 + $0x18] sm:$0xff] (!%p261_p2)  ;;  %377 = vst [vmem:[#allocation2] sm:$0xff] (!%p261_p2), %v3389_v8  ;;  %2579 = vmatprep.mubr.f32.mxu1 (!%p261_p2), %v3389_v8 }
   0x7   : > { %378 = vst [vmem:[#allocation2 + $0x8] sm:$0x3] (!%p261_p2), %v3389_v8  ;;  %379 = vst [vmem:[#allocation2 + $0x10] sm:$0xff] (!%p261_p2), %v3389_v8  ;;  %v3115_v9 = vpack.c.bf16 (!%p261_p2), %v2221_v5, %v2220_v2  ;;  %v2991_v10 = vpack.c.bf16 (!%p261_p2), %v433_v7, %v432_v6  ;;  %v2222_v11 = vld [vmem:[%s4161_s3 + $0x210] sm:$0xff] (!%p261_p2)  ;;  %v2223_v12 = vld [vmem:[%s4161_s3 + $0x218] sm:$0xff] (!%p261_p2)  ;;  %v346_v18 = vshrl.u32 (!%p261_p2), %v345_v3, 7 }
   0x8   : > { %380 = vst [vmem:[#allocation2 + $0x18] sm:$0x3] (!%p261_p2), %v3389_v8  ;;  %381 = vst [vmem:[#allocation2 + $0x20] sm:$0xff] (!%p261_p2), %v3389_v8  ;;  %v434_v13 = vld [vmem:[%s4161_s3 + $0x20] sm:$0xff] (!%p261_p2)  ;;  %2988 = vmatprep.subr.bf16.mxu1 (!%p261_p2), %v2987_v4  ;;  %v3119_v14 = vpack.c.bf16 (!%p261_p2), %v2223_v12, %v2222_v11  ;;  %v435_v15 = vld [vmem:[%s4161_s3 + $0x28] sm:$0xff] (!%p261_p2) }
   0x9   : > { %382 = vst [vmem:[#allocation2 + $0x28] sm:$0x3] (!%p261_p2), %v3389_v8  ;;  %383 = vst [vmem:[#allocation2 + $0x30] sm:$0xff] (!%p261_p2), %v3389_v8  ;;  %v2224_v16 = vld [vmem:[%s4161_s3 + $0x220] sm:$0xff] (!%p261_p2)  ;;  %v2225_v17 = vld [vmem:[%s4161_s3 + $0x228] sm:$0xff] (!%p261_p2)  ;;  %3116 = vmatprep.subr.bf16.mxu0 (!%p261_p2), %v3115_v9  ;;  %2990 = vmatpush3.bf16.msra.mxu1 (!%p261_p2), %v2987_v4  ;;  %v2995_v19 = vpack.c.bf16 (!%p261_p2), %v435_v15, %v434_v13  ;;  %v347_v25 = vsub.s32 (!%p261_p2), 0, %v346_v18 }
   0xa   : > { %384 = vst [vmem:[#allocation2 + $0x38] sm:$0x3] (!%p261_p2), %v3389_v8  ;;  %385 = vst [vmem:[#allocation2 + $0x40] sm:$0xff] (!%p261_p2), %v3389_v8  ;;  %3118 = vmatpush3.bf16.msra.mxu0 (!%p261_p2), %v3115_v9  ;;  %2992 = vmatprep.subr.bf16.mxu1 (!%p261_p2), %v2991_v10  ;;  %v3123_v20 = vpack.c.bf16 (!%p261_p2), %v2225_v17, %v2224_v16  ;;  %v436_v21 = vld [vmem:[%s4161_s3 + $0x30] sm:$0xff] (!%p261_p2)  ;;  %v437_v22 = vld [vmem:[%s4161_s3 + $0x38] sm:$0xff] (!%p261_p2)  ;;  %v359_v26 = vsub.s32 (!%p261_p2), 1, %v346_v18 }
   0xb   : > { %386 = vst [vmem:[#allocation2 + $0x48] sm:$0x3] (!%p261_p2), %v3389_v8  ;;  %387 = vst [vmem:[#allocation2 + $0x50] sm:$0xff] (!%p261_p2), %v3389_v8  ;;  %3120 = vmatprep.subr.bf16.mxu0 (!%p261_p2), %v3119_v14  ;;  %v2226_v23 = vld [vmem:[%s4161_s3 + $0x230] sm:$0xff] (!%p261_p2)  ;;  %v2227_v24 = vld [vmem:[%s4161_s3 + $0x238] sm:$0xff] (!%p261_p2)  ;;  %v2999_v27 = vpack.c.bf16 (!%p261_p2), %v437_v22, %v436_v21 }
   0xc   : > { %388 = vst [vmem:[#allocation2 + $0x58] sm:$0x3] (!%p261_p2), %v3389_v8  ;;  %389 = vst [vmem:[#allocation2 + $0x60] sm:$0xff] (!%p261_p2), %v3389_v8  ;;  %v3127_v28 = vpack.c.bf16 (!%p261_p2), %v2227_v24, %v2226_v23  ;;  %v438_v29 = vld [vmem:[%s4161_s3 + $0x40] sm:$0xff] (!%p261_p2)  ;;  %v439_v30 = vld [vmem:[%s4161_s3 + $0x48] sm:$0xff] (!%p261_p2) }
   0xd   : > { %390 = vst [vmem:[#allocation2 + $0x68] sm:$0x3] %v3389_v8  ;;  %391 = vst [vmem:[#allocation2 + $0x70] sm:$0xff] %v3389_v8  ;;  %s3492_s21 = scalar_select %p308_p3, %s3436_s25, 1  ;;  %2994 = vmatpush3.bf16.msra.mxu1 %v2991_v10  ;;  %v2228_v31 = vld [vmem:[%s4161_s3 + $0x240] sm:$0xff]  ;;  %v2229_v32 = vld [vmem:[%s4161_s3 + $0x248] sm:$0xff]  ;;  %v3003_v38 = vpack.c.bf16 %v439_v30, %v438_v29 }
   0xe   : > { %392 = vst [vmem:[#allocation2 + $0x78] sm:$0x3] %v3389_v8  ;;  %393 = vst [vmem:[#allocation2 + $0x80] sm:$0xff] %v3389_v8  ;;  %3122 = vmatpush3.bf16.msra.mxu0 %v3119_v14  ;;  %2996 = vmatprep.subr.bf16.mxu1 %v2995_v19  ;;  %v336_v33 = vld [vmem:[%s4159_s1] sm:$0x3]  ;;  %v3131_v39 = vpack.c.bf16 %v2229_v32, %v2228_v31  ;;  %v440_v40 = vld [vmem:[%s4161_s3 + $0x50] sm:$0xff] }
   0xf   : > { %394 = vst [vmem:[#allocation2 + $0x88] sm:$0x3] %v3389_v8  ;;  %395 = vst [vmem:[#allocation2 + $0x90] sm:$0xff] %v3389_v8  ;;  %s3504_s30 = sshll.u32 %s3492_s21, 6  ;;  %3124 = vmatprep.subr.bf16.mxu0 %v3123_v20  ;;  %v348_v35 = vrot.slane %v336_v33, %v347_v25  ;;  %v3540_v36 = vrot.slane %v336_v33, %v359_v26  ;;  %v441_v41 = vld [vmem:[%s4161_s3 + $0x58] sm:$0xff]  ;;  %v2230_v44 = vld [vmem:[%s4161_s3 + $0x250] sm:$0xff] }
  0x10   : > { %396 = vst [vmem:[#allocation2 + $0x98] sm:$0x3] %v3389_v8  ;;  %s3522_s18 = scalar_lea.vmem %s4158_s0, %s3504_s30  ;;  %v2231_v45 = vld [vmem:[%s4161_s3 + $0x258] sm:$0xff]  ;;  %v3007_v48 = vpack.c.bf16 %v441_v41, %v440_v40  ;;  %v442_v50 = vld [vmem:[%s4161_s3 + $0x60] sm:$0xff]  ;;  %v443_v51 = vld [vmem:[%s4161_s3 + $0x68] sm:$0xff]  ;;  %s314_s25 = sadd.s32 3, %s2165_s19 }
  0x11   : > { %v337_v34 = vld [vmem:[%s3522_s18] sm:$0xff]  ;;  %2998 = vmatpush3.bf16.msra.mxu1 %v2995_v19  ;;  %v338_v37 = vld [vmem:[%s3522_s18 + $0x8] sm:$0xff]  ;;  %v3135_v49 = vpack.c.bf16 %v2231_v45, %v2230_v44  ;;  %v339_v56 = vld [vmem:[%s3522_s18 + $0x10] sm:$0xff]  ;;  %v3011_v59 = vpack.c.bf16 %v443_v51, %v442_v50  ;;  %p315_p4 = scmp.lt.s32.totalorder %s314_s25, 7  ;;  %s4125_s12 = scalar_lea.vmem %s4164_s6, %s3504_s30 }
  0x12   : > { %3126 = vmatpush3.bf16.msra.mxu0 %v3123_v20  ;;  %3000 = vmatprep.subr.bf16.mxu1 %v2999_v27  ;;  %v349_v42 = vmul.f32 %v348_v35, %v337_v34  ;;  %v350_v43 = vmul.f32 %v348_v35, %v338_v37  ;;  %v2232_v54 = vld [vmem:[%s4161_s3 + $0x260] sm:$0xff]  ;;  %v2233_v55 = vld [vmem:[%s4161_s3 + $0x268] sm:$0xff]  ;;  %v351_v57 = vmul.f32 %v348_v35, %v339_v56  ;;  %v340_v58 = vld [vmem:[%s3522_s18 + $0x18] sm:$0xff] }
  0x13   : > { %3128 = vmatprep.subr.bf16.mxu0 %v3127_v28  ;;  %v352_v60 = vmul.f32 %v348_v35, %v340_v58  ;;  %v341_v61 = vld [vmem:[%s3522_s18 + $0x20] sm:$0xff]  ;;  %v3139_v62 = vpack.c.bf16 %v2233_v55, %v2232_v54  ;;  %v444_v63 = vld [vmem:[%s4161_s3 + $0x70] sm:$0xff]  ;;  %v445_v0 = vld [vmem:[%s4161_s3 + $0x78] sm:$0xff]  ;;  %s4167_s25 = smov (!%p315_p4, %s314_s25), 7 }
  0x14   : > { %v361_v46 = vadd.f32 %v3540_v36, %v349_v42  ;;  %v362_v47 = vadd.f32 %v3540_v36, %v350_v43  ;;  %v363_v1 = vadd.f32 %v3540_v36, %v351_v57  ;;  %v353_v2 = vmul.f32 %v348_v35, %v341_v61  ;;  %v342_v3 = vld [vmem:[%s3522_s18 + $0x28] sm:$0xff]  ;;  %v2234_v4 = vld [vmem:[%s4161_s3 + $0x270] sm:$0xff]  ;;  %v2235_v5 = vld [vmem:[%s4161_s3 + $0x278] sm:$0xff]  ;;  %s3371_s9 = smul.u32 144, %s4167_s25  ;;  %s4131_s25 = scalar_lea.vmem %s4163_s5, %s3504_s30 }
  0x15   : > { %3002 = vmatpush3.bf16.msra.mxu1 %v2999_v27  ;;  %v364_v6 = vadd.f32 %v3540_v36, %v352_v60  ;;  %v354_v7 = vmul.f32 %v348_v35, %v342_v3  ;;  %v343_v9 = vld [vmem:[%s3522_s18 + $0x30] sm:$0xff]  ;;  %v344_v13 = vld [vmem:[%s3522_s18 + $0x38] sm:$0xff]  ;;  %v3015_v14 = vpack.c.bf16 %v445_v0, %v444_v63  ;;  %v3143_v18 = vpack.c.bf16 %v2235_v5, %v2234_v4  ;;  %v2172_v19 = vld [vmem:[%s4161_s3 + $0x80] sm:$0xff]  ;;  %s2171_s30 = sshll.u32 %s3492_s21, 2 }
  0x16   : > { %3130 = vmatpush3.bf16.msra.mxu0 %v3127_v28  ;;  %3004 = vmatprep.subr.bf16.mxu1 %v3003_v38  ;;  %v3563_v52 = vmax.f32 %v361_v46, 0.0  ;;  %v3565_v53 = vmax.f32 %v362_v47, 0.0  ;;  %v3595_v10 = vmax.f32 %v363_v1, 0.0  ;;  %v365_v11 = vadd.f32 %v3540_v36, %v353_v2  ;;  %v2173_v20 = vld [vmem:[%s4161_s3 + $0x88] sm:$0xff]  ;;  %v2236_v23 = vld [vmem:[%s4161_s3 + $0x280] sm:$0xff]  ;;  %v2174_v31 = vld [vmem:[%s4161_s3 + $0x90] sm:$0xff]  ;;  %s4052_s20 = scalar_lea.vmem %s4160_s2, %s3371_s9  ;;  %s335_s16 = scalar_lea.vmem %s4165_s7, %s2171_s30 }
  0x17   : > { %3132 = vmatprep.subr.bf16.mxu0 %v3131_v39  ;;  %v355_v12 = vmul.f32 %v348_v35, %v343_v9  ;;  %v3599_v15 = vmax.f32 %v364_v6, 0.0  ;;  %v366_v16 = vadd.f32 %v3540_v36, %v354_v7  ;;  %v356_v17 = vmul.f32 %v348_v35, %v344_v13  ;;  %v2237_v24 = vld [vmem:[%s4161_s3 + $0x288] sm:$0xff]  ;;  %v2175_v32 = vld [vmem:[%s4161_s3 + $0x98] sm:$0xff]  ;;  %v2238_v33 = vld [vmem:[%s4161_s3 + $0x290] sm:$0xff] }
  0x18   : > { %398 = vst [vmem:[#allocation2 + $0x11] sm:$0xff] %v3563_v52  ;;  %2755 = vmatprep.mubr.f32.mxu0 %v3563_v52  ;;  %399 = vst [vmem:[#allocation2 + $0x21] sm:$0xff] %v3565_v53  ;;  %v3609_v21 = vmax.f32 %v365_v11, 0.0  ;;  %v3019_v28 = vpack.c.bf16 %v2173_v20, %v2172_v19  ;;  %v3147_v30 = vpack.c.bf16 %v2237_v24, %v2236_v23  ;;  %v2239_v34 = vld [vmem:[%s4161_s3 + $0x298] sm:$0xff]  ;;  %v2240_v40 = vld [vmem:[%s4161_s3 + $0x2a0] sm:$0xff] }
  0x19   : > { %3006 = vmatpush3.bf16.msra.mxu1 %v3003_v38  ;;  %400 = vst [vmem:[#allocation2 + $0x31] sm:$0xff] %v3595_v10  ;;  %v367_v22 = vadd.f32 %v3540_v36, %v355_v12  ;;  %401 = vst [vmem:[#allocation2 + $0x41] sm:$0xff] %v3599_v15  ;;  %v3619_v25 = vmax.f32 %v366_v16, 0.0  ;;  %v368_v26 = vadd.f32 %v3540_v36, %v356_v17  ;;  %v2176_v38 = vld [vmem:[%s4161_s3 + $0xa0] sm:$0xff]  ;;  %v2241_v41 = vld [vmem:[%s4161_s3 + $0x2a8] sm:$0xff] }
  0x1a   : > { %3134 = vmatpush3.bf16.msra.mxu0 %v3131_v39  ;;  %3008 = vmatprep.subr.bf16.mxu1 %v3007_v48  ;;  %402 = vst [vmem:[#allocation2 + $0x51] sm:$0xff] %v3609_v21  ;;  %v3023_v36 = vpack.c.bf16 %v2175_v32, %v2174_v31  ;;  %v3151_v37 = vpack.c.bf16 %v2239_v34, %v2238_v33  ;;  %v2177_v39 = vld [vmem:[%s4161_s3 + $0xa8] sm:$0xff]  ;;  %v2178_v46 = vld [vmem:[%s4161_s3 + $0xb0] sm:$0xff]  ;;  %v2179_v47 = vld [vmem:[%s4161_s3 + $0xb8] sm:$0xff] }
  0x1b   : > { %3136 = vmatprep.subr.bf16.mxu0 %v3135_v49  ;;  %v3623_v27 = vmax.f32 %v367_v22, 0.0  ;;  %403 = vst [vmem:[#allocation2 + $0x61] sm:$0xff] %v3619_v25  ;;  %v3626_v29 = vmax.f32 %v368_v26, 0.0  ;;  %v3027_v44 = vpack.c.bf16 %v2177_v39, %v2176_v38  ;;  %v3155_v45 = vpack.c.bf16 %v2241_v41, %v2240_v40  ;;  %v2180_v56 = vld [vmem:[%s4161_s3 + $0xc0] sm:$0xff]  ;;  %v2181_v57 = vld [vmem:[%s4161_s3 + $0xc8] sm:$0xff]  ;;  %v2182_v0 = vld [vmem:[%s4161_s3 + $0xd0] sm:$0xff] }
  0x1c   : > { %v3031_v54 = vpack.c.bf16 %v2179_v47, %v2178_v46  ;;  %v2244_v58 = vld [vmem:[%s4161_s3 + $0x2c0] sm:$0xff]  ;;  %v2183_v1 = vld [vmem:[%s4161_s3 + $0xd8] sm:$0xff]  ;;  %v2246_v2 = vld [vmem:[%s4161_s3 + $0x2d0] sm:$0xff] }
  0x1d   : > { %3010 = vmatpush3.bf16.msra.mxu1 %v3007_v48  ;;  %404 = vst [vmem:[#allocation2 + $0x71] sm:$0xff] %v3623_v27  ;;  %405 = vst [vmem:[#allocation2 + $0x81] sm:$0xff] %v3626_v29  ;;  %v2242_v48 = vld [vmem:[%s4161_s3 + $0x2b0] sm:$0xff]  ;;  %v2247_v3 = vld [vmem:[%s4161_s3 + $0x2d8] sm:$0xff]  ;;  %v3039_v6 = vpack.c.bf16 %v2183_v1, %v2182_v0 }
  0x1e   : > { %3138 = vmatpush3.bf16.msra.mxu0 %v3135_v49  ;;  %3012 = vmatprep.subr.bf16.mxu1 %v3011_v59  ;;  %v2243_v49 = vld [vmem:[%s4161_s3 + $0x2b8] sm:$0xff]  ;;  %v567_v4 = vld [vmem:[#allocation2 + $0x1] sm:$0xff]  ;;  %v3167_v7 = vpack.c.bf16 %v2247_v3, %v2246_v2  ;;  %v2186_v17 = vld [vmem:[%s4161_s3 + $0xf0] sm:$0xff] }
  0x1f   : > { %3140 = vmatprep.subr.bf16.mxu0 %v3139_v62  ;;  %v3642_v35 = vld [vmem:[#allocation2 + $0x10] sm:$0xff]  ;;  %v3657_v42 = vld [vmem:[#allocation2 + $0x20] sm:$0xff]  ;;  %v3159_v55 = vpack.c.bf16 %v2243_v49, %v2242_v48  ;;  %v2185_v11 = vld [vmem:[%s4161_s3 + $0xe8] sm:$0xff] }
  0x20   : > { %v3660_v43 = vld [vmem:[#allocation2 + $0x30] sm:$0xff]  ;;  %v3677_v50 = vld [vmem:[#allocation2 + $0x40] sm:$0xff]  ;;  %v2249_v13 = vld [vmem:[%s4161_s3 + $0x2e8] sm:$0xff] }
  0x21   : > { %3014 = vmatpush3.bf16.msra.mxu1 %v3011_v59  ;;  %v3680_v51 = vld [vmem:[#allocation2 + $0x50] sm:$0xff]  ;;  %v2245_v59 = vld [vmem:[%s4161_s3 + $0x2c8] sm:$0xff]  ;;  %v2184_v9 = vld [vmem:[%s4161_s3 + $0xe0] sm:$0xff] }
  0x22   : > { %3142 = vmatpush3.bf16.msra.mxu0 %v3139_v62  ;;  %3016 = vmatprep.subr.bf16.mxu1 %v3015_v14  ;;  %v3697_v60 = vld [vmem:[#allocation2 + $0x60] sm:$0xff]  ;;  %v3035_v62 = vpack.c.bf16 %v2181_v57, %v2180_v56  ;;  %v3163_v63 = vpack.c.bf16 %v2245_v59, %v2244_v58  ;;  %v3718_v5 = vld [vmem:[#allocation2 + $0x12] sm:$0xff]  ;;  %v2189_v26 = vld [vmem:[%s4161_s3 + $0x108] sm:$0xff] }
  0x23   : > { %3144 = vmatprep.subr.bf16.mxu0 %v3143_v18  ;;  %v2248_v12 = vld [vmem:[%s4161_s3 + $0x2e0] sm:$0xff]  ;;  %v2250_v19 = vld [vmem:[%s4161_s3 + $0x2f0] sm:$0xff]  ;;  %v2251_v20 = vld [vmem:[%s4161_s3 + $0x2f8] sm:$0xff] }
  0x24   : > { %v3700_v61 = vld [vmem:[#allocation2 + $0x70] sm:$0xff]  ;;  %v3171_v16 = vpack.c.bf16 %v2249_v13, %v2248_v12  ;;  %v3175_v23 = vpack.c.bf16 %v2251_v20, %v2250_v19  ;;  %v2188_v24 = vld [vmem:[%s4161_s3 + $0x100] sm:$0xff]  ;;  %v2191_v34 = vld [vmem:[%s4161_s3 + $0x118] sm:$0xff] }
  0x25   : > { %3018 = vmatpush3.bf16.msra.mxu1 %v3015_v14  ;;  %v3043_v14 = vpack.c.bf16 %v2185_v11, %v2184_v9  ;;  %v3051_v31 = vpack.c.bf16 %v2189_v26, %v2188_v24  ;;  %v2190_v33 = vld [vmem:[%s4161_s3 + $0x110] sm:$0xff]  ;;  %v3769_v38 = vld [vmem:[#allocation2 + $0x22] sm:$0xff]  ;;  %v2259_v57 = vld [vmem:[%s4161_s3 + $0x338] sm:$0xff] }
  0x26   : > { %3146 = vmatpush3.bf16.msra.mxu0 %v3143_v18  ;;  %3020 = vmatprep.subr.bf16.mxu1 %v3019_v28  ;;  %v2187_v18 = vld [vmem:[%s4161_s3 + $0xf8] sm:$0xff]  ;;  %v3055_v39 = vpack.c.bf16 %v2191_v34, %v2190_v33  ;;  %v2192_v41 = vld [vmem:[%s4161_s3 + $0x120] sm:$0xff]  ;;  %v2257_v46 = vld [vmem:[%s4161_s3 + $0x328] sm:$0xff] }
  0x27   : > { %3148 = vmatprep.subr.bf16.mxu0 %v3147_v30  ;;  %v3047_v22 = vpack.c.bf16 %v2187_v18, %v2186_v17  ;;  %v3785_v47 = vld [vmem:[#allocation2 + $0x32] sm:$0xff]  ;;  %v3787_v49 = vld [vmem:[#allocation2 + $0x42] sm:$0xff] }
  0x28   : > { %2580 = vmatmul.mubr.f32.vlgmr.msra.gmra.mrb[0].mxu1 %v3642_v35  ;;  %v2258_v56 = vld [vmem:[%s4161_s3 + $0x330] sm:$0xff]  ;;  %v2196_v0 = vld [vmem:[%s4161_s3 + $0x140] sm:$0xff]  ;;  %v2197_v1 = vld [vmem:[%s4161_s3 + $0x148] sm:$0xff] }
  0x29   : > { %3022 = vmatpush3.bf16.msra.mxu1 %v3019_v28  ;;  %2756 = vmatmul.mubr.f32.vlgmr.msra.gmra.mrb[0].mxu0 %v3565_v53  ;;  %v2252_v28 = vld [vmem:[%s4161_s3 + $0x300] sm:$0xff]  ;;  %v3805_v58 = vld [vmem:[#allocation2 + $0x52] sm:$0xff]  ;;  %v2261_v3 = vld [vmem:[%s4161_s3 + $0x348] sm:$0xff] }
  0x2a   : > { %3150 = vmatpush3.bf16.msra.mxu0 %v3147_v30  ;;  %3024 = vmatprep.subr.bf16.mxu1 %v3023_v36  ;;  %v2253_v30 = vld [vmem:[%s4161_s3 + $0x308] sm:$0xff]  ;;  %v2260_v2 = vld [vmem:[%s4161_s3 + $0x340] sm:$0xff]  ;;  %v2198_v11 = vld [vmem:[%s4161_s3 + $0x150] sm:$0xff] }
  0x2b   : > { %3152 = vmatprep.subr.bf16.mxu0 %v3151_v37  ;;  %2582 = vmatprep.mubr.f32.mxu1 %v3657_v42  ;;  %v3179_v32 = vpack.c.bf16 %v2253_v30, %v2252_v28  ;;  %v3195_v9 = vpack.c.bf16 %v2261_v3, %v2260_v2  ;;  %v2199_v12 = vld [vmem:[%s4161_s3 + $0x158] sm:$0xff]  ;;  %v2262_v13 = vld [vmem:[%s4161_s3 + $0x350] sm:$0xff]  ;;  %v2200_v19 = vld [vmem:[%s4161_s3 + $0x160] sm:$0xff] }
  0x2c   : > { %2758 = vmatprep.mubr.f32.mxu0 %v3595_v10  ;;  %2583 = vmatmul.mubr.f32.gmra.mrb[2].mxu1 %v3660_v43  ;;  %v3071_v17 = vpack.c.bf16 %v2199_v12, %v2198_v11  ;;  %v2201_v20 = vld [vmem:[%s4161_s3 + $0x168] sm:$0xff]  ;;  %v2202_v28 = vld [vmem:[%s4161_s3 + $0x170] sm:$0xff]  ;;  %v2203_v30 = vld [vmem:[%s4161_s3 + $0x178] sm:$0xff] }
  0x2d   : > { %3026 = vmatpush3.bf16.msra.mxu1 %v3023_v36  ;;  %2759 = vmatmul.mubr.f32.gmra.mrb[2].mxu0 %v3599_v15  ;;  %v2254_v36 = vld [vmem:[%s4161_s3 + $0x310] sm:$0xff]  ;;  %v3075_v24 = vpack.c.bf16 %v2201_v20, %v2200_v19  ;;  %v3079_v33 = vpack.c.bf16 %v2203_v30, %v2202_v28  ;;  %v2211_v2 = vld [vmem:[%s4161_s3 + $0x1b8] sm:$0xff]  ;;  %v2212_v12 = vld [vmem:[%s4161_s3 + $0x1c0] sm:$0xff] }
  0x2e   : > { %3154 = vmatpush3.bf16.msra.mxu0 %v3151_v37  ;;  %3028 = vmatprep.subr.bf16.mxu1 %v3027_v44  ;;  %v2255_v37 = vld [vmem:[%s4161_s3 + $0x318] sm:$0xff]  ;;  %v2274_v3 = vld [vmem:[%s4161_s3 + $0x3b0] sm:$0xff]  ;;  %v2216_v30 = vld [vmem:[%s4161_s3 + $0x1e0] sm:$0xff] }
  0x2f   : > { %3156 = vmatprep.subr.bf16.mxu0 %v3155_v45  ;;  %2585 = vmatprep.mubr.f32.mxu1 %v3677_v50  ;;  %v3183_v40 = vpack.c.bf16 %v2255_v37, %v2254_v36  ;;  %v2204_v36 = vld [vmem:[%s4161_s3 + $0x180] sm:$0xff]  ;;  %v2205_v37 = vld [vmem:[%s4161_s3 + $0x188] sm:$0xff]  ;;  %v2214_v20 = vld [vmem:[%s4161_s3 + $0x1d0] sm:$0xff] }
  0x30   : > { %2761 = vmatprep.mubr.f32.mxu0 %v3609_v21  ;;  %2586 = vmatmul.mubr.f32.gmra.mrb[4].mxu1 %v3680_v51 }
  0x31   : > { %3030 = vmatpush3.bf16.msra.mxu1 %v3027_v44  ;;  %2762 = vmatmul.mubr.f32.gmra.mrb[4].mxu0 %v3619_v25  ;;  %v2193_v44 = vld [vmem:[%s4161_s3 + $0x128] sm:$0xff] }
  0x32   : > { %3158 = vmatpush3.bf16.msra.mxu0 %v3155_v45  ;;  %3032 = vmatprep.subr.bf16.mxu1 %v3031_v54  ;;  %v2256_v45 = vld [vmem:[%s4161_s3 + $0x320] sm:$0xff]  ;;  %v3059_v48 = vpack.c.bf16 %v2193_v44, %v2192_v41  ;;  %v3083_v41 = vpack.c.bf16 %v2205_v37, %v2204_v36  ;;  %v2219_v36 = vld [vmem:[%s4161_s3 + $0x1f8] sm:$0xff]  ;;  %v2282_v37 = vld [vmem:[%s4161_s3 + $0x3f0] sm:$0xff] }
  0x33   : > { %3160 = vmatprep.subr.bf16.mxu0 %v3159_v55  ;;  %2588 = vmatprep.mubr.f32.mxu1 %v3697_v60 }
  0x34   : > { %2764 = vmatprep.mubr.f32.mxu0 %v3623_v27  ;;  %2589 = vmatmul.mubr.f32.gmra.mrb[6].mxu1 %v3700_v61 }
  0x35   : > { %3034 = vmatpush3.bf16.msra.mxu1 %v3031_v54  ;;  %2765 = vmatmul.mubr.f32.gmra.mrb[6].mxu0 %v3626_v29  ;;  %v2194_v54 = vld [vmem:[%s4161_s3 + $0x130] sm:$0xff] }
  0x36   : > { %3162 = vmatpush3.bf16.msra.mxu0 %v3159_v55  ;;  %3036 = vmatprep.subr.bf16.mxu1 %v3035_v62  ;;  %v2195_v55 = vld [vmem:[%s4161_s3 + $0x138] sm:$0xff] }
  0x37   : > { %3164 = vmatprep.subr.bf16.mxu0 %v3163_v63  ;;  %2623 = vmatprep.mubr.f32.mxu1 %v567_v4  ;;  %v3063_v59 = vpack.c.bf16 %v2195_v55, %v2194_v54  ;;  %v3825_v4 = vld [vmem:[#allocation2 + $0x72] sm:$0xff] }
  0x38   : > { %2799 = vmatprep.mubr.f32.mxu0 %v3718_v5 }
  0x39   : > { %3038 = vmatpush3.bf16.msra.mxu1 %v3035_v62  ;;  %v3807_v62 = vld [vmem:[#allocation2 + $0x62] sm:$0xff] }
  0x3a   : > { %3166 = vmatpush3.bf16.msra.mxu0 %v3163_v63  ;;  %3040 = vmatprep.subr.bf16.mxu1 %v3039_v6  ;;  %v3191_v63 = vpack.c.bf16 %v2259_v57, %v2258_v56  ;;  %v2208_v56 = vld [vmem:[%s4161_s3 + $0x1a0] sm:$0xff]  ;;  %v2209_v57 = vld [vmem:[%s4161_s3 + $0x1a8] sm:$0xff] }
  0x3b   : > { %3168 = vmatprep.subr.bf16.mxu0 %v3167_v7 }
  0x3d   : > { %3042 = vmatpush3.bf16.msra.mxu1 %v3039_v6  ;;  %v3067_v6 = vpack.c.bf16 %v2197_v1, %v2196_v0  ;;  %v3091_v0 = vpack.c.bf16 %v2209_v57, %v2208_v56  ;;  %v1818_v56 = vld [vmem:[%s4162_s4 + $0x10] sm:$0xff]  ;;  %v1819_v57 = vld [vmem:[%s4162_s4 + $0x18] sm:$0xff] }
  0x3e   : > { %3170 = vmatpush3.bf16.msra.mxu0 %v3167_v7  ;;  %3044 = vmatprep.subr.bf16.mxu1 %v3043_v14  ;;  %v3827_v7 = vld [vmem:[#allocation2 + $0x82] sm:$0xff] }
  0x3f   : > { %3172 = vmatprep.subr.bf16.mxu0 %v3171_v16 }
  0x41   : > { %3046 = vmatpush3.bf16.msra.mxu1 %v3043_v14  ;;  %v2263_v14 = vld [vmem:[%s4161_s3 + $0x358] sm:$0xff] }
  0x42   : > { %3174 = vmatpush3.bf16.msra.mxu0 %v3171_v16  ;;  %3048 = vmatprep.subr.bf16.mxu1 %v3047_v22  ;;  %v721_v16 = vld [vmem:[#allocation2 + $0x2] sm:$0xff]  ;;  %v3199_v18 = vpack.c.bf16 %v2263_v14, %v2262_v13 }
  0x43   : > { %3176 = vmatprep.subr.bf16.mxu0 %v3175_v23  ;;  %v2213_v13 = vld [vmem:[%s4161_s3 + $0x1c8] sm:$0xff]  ;;  %v2276_v14 = vld [vmem:[%s4161_s3 + $0x3c0] sm:$0xff] }
  0x45   : > { %3050 = vmatpush3.bf16.msra.mxu1 %v3047_v22  ;;  %v2264_v22 = vld [vmem:[%s4161_s3 + $0x360] sm:$0xff] }
  0x46   : > { %3178 = vmatpush3.bf16.msra.mxu0 %v3175_v23  ;;  %3052 = vmatprep.subr.bf16.mxu1 %v3051_v31  ;;  %v2265_v23 = vld [vmem:[%s4161_s3 + $0x368] sm:$0xff] }
  0x47   : > { %3180 = vmatprep.subr.bf16.mxu0 %v3179_v32  ;;  %v3203_v26 = vpack.c.bf16 %v2265_v23, %v2264_v22  ;;  %v2215_v22 = vld [vmem:[%s4161_s3 + $0x1d8] sm:$0xff]  ;;  %v2278_v23 = vld [vmem:[%s4161_s3 + $0x3d0] sm:$0xff] }
  0x48   : > { %2624 = vmatmul.mubr.f32.vlgmr.msra.gmra.mrb[0].mxu1 %v3563_v52  ;;  %v3187_v52 = vpack.c.bf16 %v2257_v46, %v2256_v45  ;;  %v2206_v45 = vld [vmem:[%s4161_s3 + $0x190] sm:$0xff]  ;;  %v2207_v46 = vld [vmem:[%s4161_s3 + $0x198] sm:$0xff] }
  0x49   : > { %3054 = vmatpush3.bf16.msra.mxu1 %v3051_v31  ;;  %2800 = vmatmul.mubr.f32.vlgmr.msra.gmra.mrb[0].mxu0 %v3769_v38  ;;  %v2266_v31 = vld [vmem:[%s4161_s3 + $0x370] sm:$0xff]  ;;  %v3087_v54 = vpack.c.bf16 %v2207_v46, %v2206_v45  ;;  %v2284_v45 = vld [vmem:[%s4161_s3 + $0x400] sm:$0xff]  ;;  %v2285_v46 = vld [vmem:[%s4161_s3 + $0x408] sm:$0xff] }
  0x4a   : > { %3182 = vmatpush3.bf16.msra.mxu0 %v3179_v32  ;;  %3056 = vmatprep.subr.bf16.mxu1 %v3055_v39  ;;  %v2267_v32 = vld [vmem:[%s4161_s3 + $0x378] sm:$0xff] }
  0x4b   : > { %3184 = vmatprep.subr.bf16.mxu0 %v3183_v40  ;;  %2626 = vmatprep.mubr.f32.mxu1 %v3565_v53  ;;  %v3207_v34 = vpack.c.bf16 %v2267_v32, %v2266_v31  ;;  %v2217_v31 = vld [vmem:[%s4161_s3 + $0x1e8] sm:$0xff] }
  0x4c   : > { %2802 = vmatprep.mubr.f32.mxu0 %v3785_v47  ;;  %2627 = vmatmul.mubr.f32.gmra.mrb[2].mxu1 %v3595_v10  ;;  %v2281_v32 = vld [vmem:[%s4161_s3 + $0x3e8] sm:$0xff] }
  0x4d   : > { %3058 = vmatpush3.bf16.msra.mxu1 %v3055_v39  ;;  %2803 = vmatmul.mubr.f32.gmra.mrb[2].mxu0 %v3787_v49  ;;  %v2268_v39 = vld [vmem:[%s4161_s3 + $0x380] sm:$0xff] }
  0x4e   : > { %3186 = vmatpush3.bf16.msra.mxu0 %v3183_v40  ;;  %3060 = vmatprep.subr.bf16.mxu1 %v3059_v48  ;;  %v2269_v40 = vld [vmem:[%s4161_s3 + $0x388] sm:$0xff] }
  0x4f   : > { %3188 = vmatprep.subr.bf16.mxu0 %v3187_v52  ;;  %2629 = vmatprep.mubr.f32.mxu1 %v3599_v15  ;;  %v3211_v44 = vpack.c.bf16 %v2269_v40, %v2268_v39 }
  0x50   : > { %2805 = vmatprep.mubr.f32.mxu0 %v3805_v58  ;;  %2630 = vmatmul.mubr.f32.gmra.mrb[4].mxu1 %v3609_v21 }
  0x51   : > { %3062 = vmatpush3.bf16.msra.mxu1 %v3059_v48  ;;  %2806 = vmatmul.mubr.f32.gmra.mrb[4].mxu0 %v3807_v62  ;;  %v2270_v48 = vld [vmem:[%s4161_s3 + $0x390] sm:$0xff] }
  0x52   : > { %3190 = vmatpush3.bf16.msra.mxu0 %v3187_v52  ;;  %3064 = vmatprep.subr.bf16.mxu1 %v3063_v59  ;;  %v2271_v52 = vld [vmem:[%s4161_s3 + $0x398] sm:$0xff] }
  0x53   : > { %3192 = vmatprep.subr.bf16.mxu0 %v3191_v63  ;;  %2632 = vmatprep.mubr.f32.mxu1 %v3619_v25  ;;  %v3215_v55 = vpack.c.bf16 %v2271_v52, %v2270_v48  ;;  %v3243_v52 = vpack.c.bf16 %v2285_v46, %v2284_v45 }
  0x54   : > { %2808 = vmatprep.mubr.f32.mxu0 %v3825_v4  ;;  %2633 = vmatmul.mubr.f32.gmra.mrb[6].mxu1 %v3623_v27 }
  0x55   : > { %3066 = vmatpush3.bf16.msra.mxu1 %v3063_v59  ;;  %2809 = vmatmul.mubr.f32.gmra.mrb[6].mxu0 %v3827_v7  ;;  %v2272_v59 = vld [vmem:[%s4161_s3 + $0x3a0] sm:$0xff] }
  0x56   : > { %3194 = vmatpush3.bf16.msra.mxu0 %v3191_v63  ;;  %3068 = vmatprep.subr.bf16.mxu1 %v3067_v6  ;;  %v2273_v63 = vld [vmem:[%s4161_s3 + $0x3a8] sm:$0xff] }
  0x57   : > { %3196 = vmatprep.subr.bf16.mxu0 %v3195_v9  ;;  %2667 = vmatprep.mubr.f32.mxu1 %v721_v16  ;;  %v3219_v1 = vpack.c.bf16 %v2273_v63, %v2272_v59  ;;  %v2277_v16 = vld [vmem:[%s4161_s3 + $0x3c8] sm:$0xff]  ;;  %v3279_v63 = vpack.c.bf16 %v1819_v57, %v1818_v56 }
  0x58   : > { %2843 = vmatprep.mubr.f32.mxu0 %v3657_v42  ;;  %v3227_v19 = vpack.c.bf16 %v2277_v16, %v2276_v14  ;;  %v1808_v14 = vld [vmem:[%s4052_s20] sm:$0xff] }
  0x59   : > { %3070 = vmatpush3.bf16.msra.mxu1 %v3067_v6  ;;  %v2275_v6 = vld [vmem:[%s4161_s3 + $0x3b8] sm:$0xff] }
  0x5a   : > { %3198 = vmatpush3.bf16.msra.mxu0 %v3195_v9  ;;  %3072 = vmatprep.subr.bf16.mxu1 %v3071_v17  ;;  %v3223_v11 = vpack.c.bf16 %v2275_v6, %v2274_v3 }
  0x5b   : > { %3200 = vmatprep.subr.bf16.mxu0 %v3199_v18 }
  0x5d   : > { %3074 = vmatpush3.bf16.msra.mxu1 %v3071_v17  ;;  %v3940_v17 = vld [vmem:[#allocation2 + $0x80] sm:$0xff] }
  0x5e   : > { %3202 = vmatpush3.bf16.msra.mxu0 %v3199_v18  ;;  %3076 = vmatprep.subr.bf16.mxu1 %v3075_v24  ;;  %v3099_v18 = vpack.c.bf16 %v2213_v13, %v2212_v12  ;;  %v1825_v13 = vld [vmem:[%s4162_s4 + $0x48] sm:$0xff] }
  0x5f   : > { %3204 = vmatprep.subr.bf16.mxu0 %v3203_v26 }
  0x61   : > { %3078 = vmatpush3.bf16.msra.mxu1 %v3075_v24  ;;  %v2279_v24 = vld [vmem:[%s4161_s3 + $0x3d8] sm:$0xff] }
  0x62   : > { %3206 = vmatpush3.bf16.msra.mxu0 %v3203_v26  ;;  %3080 = vmatprep.subr.bf16.mxu1 %v3079_v33  ;;  %v3103_v26 = vpack.c.bf16 %v2215_v22, %v2214_v20  ;;  %v3231_v28 = vpack.c.bf16 %v2279_v24, %v2278_v23  ;;  %v1829_v22 = vld [vmem:[%s4162_s4 + $0x68] sm:$0xff] }
  0x63   : > { %3208 = vmatprep.subr.bf16.mxu0 %v3207_v34  ;;  %v2297_v23 = vld [vmem:[%s4161_s3 + $0x468] sm:$0xff] }
  0x65   : > { %3082 = vmatpush3.bf16.msra.mxu1 %v3079_v33  ;;  %v3107_v33 = vpack.c.bf16 %v2217_v31, %v2216_v30  ;;  %v1831_v30 = vld [vmem:[%s4162_s4 + $0x78] sm:$0xff] }
  0x66   : > { %3210 = vmatpush3.bf16.msra.mxu0 %v3207_v34  ;;  %3084 = vmatprep.subr.bf16.mxu1 %v3083_v41  ;;  %v2299_v31 = vld [vmem:[%s4161_s3 + $0x478] sm:$0xff] }
  0x67   : > { %3212 = vmatprep.subr.bf16.mxu0 %v3211_v44 }
  0x68   : > { %2668 = vmatmul.mubr.f32.vlgmr.msra.gmra.mrb[0].mxu1 %v3718_v5  ;;  %v2210_v5 = vld [vmem:[%s4161_s3 + $0x1b0] sm:$0xff] }
  0x69   : > { %3086 = vmatpush3.bf16.msra.mxu1 %v3083_v41  ;;  %2844 = vmatmul.mubr.f32.vlgmr.msra.gmra.mrb[0].mxu0 %v3660_v43  ;;  %v3095_v9 = vpack.c.bf16 %v2211_v2, %v2210_v5  ;;  %v1816_v41 = vld [vmem:[%s4162_s4] sm:$0xff]  ;;  %v2289_v2 = vld [vmem:[%s4161_s3 + $0x428] sm:$0xff] }
  0x6a   : > { %3214 = vmatpush3.bf16.msra.mxu0 %v3211_v44  ;;  %3088 = vmatprep.subr.bf16.mxu1 %v3087_v54  ;;  %v1817_v44 = vld [vmem:[%s4162_s4 + $0x8] sm:$0xff]  ;;  %v2288_v5 = vld [vmem:[%s4161_s3 + $0x420] sm:$0xff] }
  0x6b   : > { %3216 = vmatprep.subr.bf16.mxu0 %v3215_v55  ;;  %2670 = vmatprep.mubr.f32.mxu1 %v3769_v38  ;;  %v3275_v48 = vpack.c.bf16 %v1817_v44, %v1816_v41  ;;  %v3251_v6 = vpack.c.bf16 %v2289_v2, %v2288_v5 }
  0x6c   : > { %2671 = vmatmul.mubr.f32.gmra.mrb[2].mxu1 %v3785_v47  ;;  %2846 = vmatprep.mubr.f32.mxu0 %v3677_v50 }
  0x6d   : > { %3090 = vmatpush3.bf16.msra.mxu1 %v3087_v54  ;;  %2847 = vmatmul.mubr.f32.gmra.mrb[2].mxu0 %v3680_v51  ;;  %v2286_v54 = vld [vmem:[%s4161_s3 + $0x410] sm:$0xff] }
  0x6e   : > { %3218 = vmatpush3.bf16.msra.mxu0 %v3215_v55  ;;  %3092 = vmatprep.subr.bf16.mxu1 %v3091_v0  ;;  %v2287_v55 = vld [vmem:[%s4161_s3 + $0x418] sm:$0xff] }
  0x6f   : > { %3220 = vmatprep.subr.bf16.mxu0 %v3219_v1  ;;  %2673 = vmatprep.mubr.f32.mxu1 %v3787_v49  ;;  %v3247_v59 = vpack.c.bf16 %v2287_v55, %v2286_v54 }
  0x70   : > { %2674 = vmatmul.mubr.f32.gmra.mrb[4].mxu1 %v3805_v58  ;;  %2849 = vmatprep.mubr.f32.mxu0 %v3697_v60 }
  0x71   : > { %3094 = vmatpush3.bf16.msra.mxu1 %v3091_v0  ;;  %2850 = vmatmul.mubr.f32.gmra.mrb[4].mxu0 %v3700_v61  ;;  %v1820_v0 = vld [vmem:[%s4162_s4 + $0x20] sm:$0xff] }
  0x72   : > { %3222 = vmatpush3.bf16.msra.mxu0 %v3219_v1  ;;  %3096 = vmatprep.subr.bf16.mxu1 %v3095_v9  ;;  %v1821_v1 = vld [vmem:[%s4162_s4 + $0x28] sm:$0xff] }
  0x73   : > { %3224 = vmatprep.subr.bf16.mxu0 %v3223_v11  ;;  %2676 = vmatprep.mubr.f32.mxu1 %v3807_v62  ;;  %v3283_v3 = vpack.c.bf16 %v1821_v1, %v1820_v0 }
  0x74   : > { %2677 = vmatmul.mubr.f32.gmra.mrb[6].mxu1 %v3825_v4  ;;  %2852 = vmatprep.mubr.f32.mxu0 %v3940_v17 }
  0x75   : > { %3098 = vmatpush3.bf16.msra.mxu1 %v3095_v9  ;;  %2853 = vmatmul.mubr.f32.gmra.mrb[6].mxu0 %v3389_v8  ;;  %v2280_v8 = vld [vmem:[%s4161_s3 + $0x3e0] sm:$0xff]  ;;  %v1823_v9 = vld [vmem:[%s4162_s4 + $0x38] sm:$0xff] }
  0x76   : > { %3226 = vmatpush3.bf16.msra.mxu0 %v3223_v11  ;;  %3100 = vmatprep.subr.bf16.mxu1 %v3099_v18  ;;  %v3235_v34 = vpack.c.bf16 %v2281_v32, %v2280_v8 }
  0x77   : > { %3228 = vmatprep.subr.bf16.mxu0 %v3227_v19  ;;  %2711 = vmatprep.mubr.f32.mxu1 %v3642_v35  ;;  %v2218_v35 = vld [vmem:[%s4161_s3 + $0x1f0] sm:$0xff] }
  0x78   : > { %2887 = vmatprep.mubr.f32.mxu0 %v3565_v53  ;;  %v2283_v53 = vld [vmem:[%s4161_s3 + $0x3f8] sm:$0xff]  ;;  %v3111_v39 = vpack.c.bf16 %v2219_v36, %v2218_v35  ;;  %v1811_v35 = vld [vmem:[%s4052_s20 + $0x30] sm:$0xff]  ;;  %v1812_v36 = vld [vmem:[%s4052_s20 + $0x40] sm:$0xff] }
  0x79   : > { %3102 = vmatpush3.bf16.msra.mxu1 %v3099_v18  ;;  %v3239_v40 = vpack.c.bf16 %v2283_v53, %v2282_v37  ;;  %v1827_v18 = vld [vmem:[%s4162_s4 + $0x58] sm:$0xff]  ;;  %v1813_v37 = vld [vmem:[%s4052_s20 + $0x50] sm:$0xff]  ;;  %v1814_v53 = vld [vmem:[%s4052_s20 + $0x60] sm:$0xff] }
  0x7a   : > { %3230 = vmatpush3.bf16.msra.mxu0 %v3227_v19  ;;  %3104 = vmatprep.subr.bf16.mxu1 %v3103_v26  ;;  %v1499_v19 = vld [vmem:[#allocation2 + $0x91] sm:$0xff] }
  0x7b   : > { %3232 = vmatprep.subr.bf16.mxu0 %v3231_v28 }
  0x7d   : > { %3106 = vmatpush3.bf16.msra.mxu1 %v3103_v26 }
  0x7e   : > { %3234 = vmatpush3.bf16.msra.mxu0 %v3231_v28  ;;  %3108 = vmatprep.subr.bf16.mxu1 %v3107_v33  ;;  %v1830_v28 = vld [vmem:[%s4162_s4 + $0x70] sm:$0xff] }
  0x7f   : > { %3236 = vmatprep.subr.bf16.mxu0 %v3235_v34  ;;  %v3303_v8 = vpack.c.bf16 %v1831_v30, %v1830_v28 }
  0x81   : > { %3110 = vmatpush3.bf16.msra.mxu1 %v3107_v33  ;;  %v1809_v33 = vld [vmem:[%s4052_s20 + $0x10] sm:$0xff] }
  0x82   : > { %3238 = vmatpush3.bf16.msra.mxu0 %v3235_v34  ;;  %3112 = vmatprep.subr.bf16.mxu1 %v3111_v39  ;;  %v1810_v34 = vld [vmem:[%s4052_s20 + $0x20] sm:$0xff] }
  0x83   : > { %3240 = vmatprep.subr.bf16.mxu0 %v3239_v40 }
  0x85   : > { %3114 = vmatpush3.bf16.msra.mxu1 %v3111_v39  ;;  %v1653_v39 = vld [vmem:[#allocation2 + $0x92] sm:$0xff] }
  0x86   : > { %3242 = vmatpush3.bf16.msra.mxu0 %v3239_v40  ;;  %3276 = vmatprep.subr.bf16.mxu1 %v3275_v48 }
  0x87   : > { %3244 = vmatprep.subr.bf16.mxu0 %v3243_v52 }
  0x88   : > { %2712 = vmatmul.mubr.f32.vlgmr.msra.gmra.mrb[0].mxu1 %v3657_v42  ;;  %v1822_v42 = vld [vmem:[%s4162_s4 + $0x30] sm:$0xff] }
  0x89   : > { %2888 = vmatmul.mubr.f32.vlgmr.msra.gmra.mrb[0].mxu0 %v3595_v10  ;;  %3278 = vmatpush3.bf16.msra.mxu1 %v3275_v48  ;;  %v2290_v10 = vld [vmem:[%s4161_s3 + $0x430] sm:$0xff]  ;;  %v3287_v11 = vpack.c.bf16 %v1823_v9, %v1822_v42 }
  0x8a   : > { %3246 = vmatpush3.bf16.msra.mxu0 %v3243_v52  ;;  %2714 = vmatprep.mubr.f32.mxu1 %v3660_v43  ;;  %v2291_v43 = vld [vmem:[%s4161_s3 + $0x438] sm:$0xff] }
  0x8b   : > { %3248 = vmatprep.subr.bf16.mxu0 %v3247_v59  ;;  %3280 = vmatprep.subr.bf16.mxu1 %v3279_v63  ;;  %v3255_v12 = vpack.c.bf16 %v2291_v43, %v2290_v10 }
  0x8c   : > { %2715 = vmatmul.mubr.f32.gmra.mrb[2].mxu1 %v3677_v50  ;;  %2890 = vmatprep.mubr.f32.mxu0 %v3599_v15  ;;  %v1824_v50 = vld [vmem:[%s4162_s4 + $0x40] sm:$0xff] }
  0x8d   : > { %3282 = vmatpush3.bf16.msra.mxu1 %v3279_v63  ;;  %2717 = vmatprep.mubr.f32.mxu1 %v3680_v51  ;;  %v2292_v15 = vld [vmem:[%s4161_s3 + $0x440] sm:$0xff]  ;;  %v2293_v51 = vld [vmem:[%s4161_s3 + $0x448] sm:$0xff] }
  0x8e   : > { %3250 = vmatpush3.bf16.msra.mxu0 %v3247_v59  ;;  %3284 = vmatprep.subr.bf16.mxu1 %v3283_v3  ;;  %v3259_v16 = vpack.c.bf16 %v2293_v51, %v2292_v15 }
  0x8f   : > { %3252 = vmatprep.subr.bf16.mxu0 %v3251_v6  ;;  %2891 = vmatmul.mubr.f32.gmra.mrb[2].mxu0 %v3609_v21  ;;  %v3291_v21 = vpack.c.bf16 %v1825_v13, %v1824_v50 }
  0x90   : > { %2718 = vmatmul.mubr.f32.gmra.mrb[4].mxu1 %v3697_v60  ;;  %2893 = vmatprep.mubr.f32.mxu0 %v3619_v25  ;;  %v1826_v60 = vld [vmem:[%s4162_s4 + $0x50] sm:$0xff] }
  0x91   : > { %3286 = vmatpush3.bf16.msra.mxu1 %v3283_v3  ;;  %2720 = vmatprep.mubr.f32.mxu1 %v3700_v61  ;;  %v2294_v25 = vld [vmem:[%s4161_s3 + $0x450] sm:$0xff]  ;;  %v2295_v61 = vld [vmem:[%s4161_s3 + $0x458] sm:$0xff]  ;;  %v3295_v20 = vpack.c.bf16 %v1827_v18, %v1826_v60 }
  0x92   : > { %3254 = vmatpush3.bf16.msra.mxu0 %v3251_v6  ;;  %3288 = vmatprep.subr.bf16.mxu1 %v3287_v11 }
  0x93   : > { %3256 = vmatprep.subr.bf16.mxu0 %v3255_v12  ;;  %2894 = vmatmul.mubr.f32.gmra.mrb[4].mxu0 %v3623_v27  ;;  %v3263_v27 = vpack.c.bf16 %v2295_v61, %v2294_v25 }
  0x94   : > { %2721 = vmatmul.mubr.f32.gmra.mrb[6].mxu1 %v3940_v17  ;;  %2896 = vmatprep.mubr.f32.mxu0 %v3626_v29  ;;  %v1828_v17 = vld [vmem:[%s4162_s4 + $0x60] sm:$0xff] }
  0x95   : > { %3290 = vmatpush3.bf16.msra.mxu1 %v3287_v11  ;;  %2975 = vmatprep.mubr.f32.mxu1 %v1808_v14  ;;  %v2296_v29 = vld [vmem:[%s4161_s3 + $0x460] sm:$0xff]  ;;  %v3299_v24 = vpack.c.bf16 %v1829_v22, %v1828_v17 }
  0x96   : > { %3258 = vmatpush3.bf16.msra.mxu0 %v3255_v12  ;;  %3292 = vmatprep.subr.bf16.mxu1 %v3291_v21  ;;  %v3267_v26 = vpack.c.bf16 %v2297_v23, %v2296_v29 }
  0x97   : > { %3260 = vmatprep.subr.bf16.mxu0 %v3259_v16  ;;  %2897 = vmatmul.mubr.f32.gmra.mrb[6].mxu0 %v1499_v19 }
  0x98   : > { %2931 = vmatprep.mubr.f32.mxu0 %v3769_v38  ;;  %v2298_v38 = vld [vmem:[%s4161_s3 + $0x470] sm:$0xff] }
  0x99   : > { %3294 = vmatpush3.bf16.msra.mxu1 %v3291_v21  ;;  %v3271_v32 = vpack.c.bf16 %v2299_v31, %v2298_v38 }
  0x9a   : > { %3262 = vmatpush3.bf16.msra.mxu0 %v3259_v16  ;;  %3296 = vmatprep.subr.bf16.mxu1 %v3295_v20 }
  0x9b   : > { %3264 = vmatprep.subr.bf16.mxu0 %v3263_v27 }
  0x9d   : > { %3298 = vmatpush3.bf16.msra.mxu1 %v3295_v20 }
  0x9e   : > { %3266 = vmatpush3.bf16.msra.mxu0 %v3263_v27  ;;  %3300 = vmatprep.subr.bf16.mxu1 %v3299_v24 }
  0x9f   : > { %3268 = vmatprep.subr.bf16.mxu0 %v3267_v26 }
  0xa1   : > { %3302 = vmatpush3.bf16.msra.mxu1 %v3299_v24 }
  0xa2   : > { %3270 = vmatpush3.bf16.msra.mxu0 %v3267_v26  ;;  %3304 = vmatprep.subr.bf16.mxu1 %v3303_v8 }
  0xa3   : > { %3272 = vmatprep.subr.bf16.mxu0 %v3271_v32 }
  0xa5   : > { %3306 = vmatpush3.bf16.msra.mxu1 %v3303_v8 }
  0xa6   : > { %3274 = vmatpush3.bf16.msra.mxu0 %v3271_v32 }
  0xa8   : > { %2976 = vmatmul.mubr.f32.vlgmr.msra.gmra.mrb[8].mxu1 %v1809_v33 }
  0xa9   : > { %2932 = vmatmul.mubr.f32.vlgmr.msra.gmra.mrb[0].mxu0 %v3785_v47  ;;  %2978 = vmatprep.mubr.f32.mxu1 %v1810_v34  ;;  %v1815_v47 = vld [vmem:[%s4052_s20 + $0x70] sm:$0xff] }
  0xaa   : > { %2934 = vmatprep.mubr.f32.mxu0 %v3787_v49 }
  0xac   : > { %2979 = vmatmul.mubr.f32.gmra.mrb[10].mxu1 %v1811_v35 }
  0xad   : > { %2935 = vmatmul.mubr.f32.gmra.mrb[2].mxu0 %v3805_v58  ;;  %2981 = vmatprep.mubr.f32.mxu1 %v1812_v36 }
  0xae   : > { %2937 = vmatprep.mubr.f32.mxu0 %v3807_v62 }
  0xb0   : > { %2982 = vmatmul.mubr.f32.gmra.mrb[12].mxu1 %v1813_v37 }
  0xb1   : > { %2938 = vmatmul.mubr.f32.gmra.mrb[4].mxu0 %v3825_v4  ;;  %2984 = vmatprep.mubr.f32.mxu1 %v1814_v53 }
  0xb2   : > { %2940 = vmatprep.mubr.f32.mxu0 %v3827_v7 }
  0xb4   : > { %2985 = vmatmul.mubr.f32.gmra.mrb[14].mxu1 %v1815_v47 }
  0xb5   : > { %2941 = vmatmul.mubr.f32.gmra.mrb[6].mxu0 %v1653_v39 }
 0x15b   : > { %v2713_v49 = vpop.f32.mrb[0].mxu1 }
 0x15c   : > { %v974_v40 = vpop.f32.mrb[1].mxu1 }
 0x15f   : > { %v2716_v58 = vpop.f32.mrb[2].mxu1 }
 0x160   : > { %v984_v41 = vpop.f32.mrb[3].mxu1 }
 0x163   : > { %v2719_v44 = vpop.f32.mrb[4].mxu1 }
 0x164   : > { %v994_v45 = vpop.f32.mrb[5].mxu1 }
 0x167   : > { %v4117_v62 = vpop.f32.mrb[6].mxu1 }
 0x168   : > { %v4119_v46 = vpop.f32.mrb[7].mxu1 }
 0x17b   : > { %v2977_v4 = vpop.f32.mrb[8].mxu1 }
 0x17c   : > { %v2933_v7 = vpop.f32.mrb[0].mxu0  ;;  %1946 = vst [vmem:[%s4125_s12 + $0x8] sm:$0xff] %v2977_v4  ;;  %v2004_v48 = vmul.f32 %v2977_v4, %v2977_v4  ;;  %v1898_v52 = vpop.f32.mrb[9].mxu1 }
 0x17d   : > { %v3307_v54 = vadd.f32 %v2933_v7, %v2713_v49  ;;  %v1745_v55 = vpop.f32.mrb[1].mxu0  ;;  %1945 = vst [vmem:[%s4125_s12] sm:$0xff] %v1898_v52  ;;  %v1989_v56 = vadd.f32 %v2977_v4, %v1898_v52  ;;  %v2003_v57 = vmul.f32 %v1898_v52, %v1898_v52 }
 0x17e   : > { %v3308_v59 = vadd.f32 %v1745_v55, %v974_v40 }
 0x17f   : > { %1938 = vst [vmem:[%s4131_s25 + $0x8] sm:$0xff] %v3307_v54  ;;  %v1968_v63 = vmul.f32 %v3307_v54, %v3307_v54  ;;  %v2011_v0 = vadd.f32 %v2004_v48, %v2003_v57  ;;  %v2980_v1 = vpop.f32.mrb[10].mxu1 }
 0x180   : > { %1937 = vst [vmem:[%s4131_s25] sm:$0xff] %v3308_v59  ;;  %v1953_v5 = vadd.f32 %v3308_v59, %v3307_v54  ;;  %v1967_v2 = vmul.f32 %v3308_v59, %v3308_v59  ;;  %v2936_v3 = vpop.f32.mrb[2].mxu0  ;;  %1948 = vst [vmem:[%s4125_s12 + $0x18] sm:$0xff] %v2980_v1  ;;  %v1908_v6 = vpop.f32.mrb[11].mxu1  ;;  %v2006_v9 = vmul.f32 %v2980_v1, %v2980_v1 }
 0x181   : > { %v3309_v42 = vadd.f32 %v2936_v3, %v2716_v58  ;;  %v1755_v10 = vpop.f32.mrb[3].mxu0  ;;  %1947 = vst [vmem:[%s4125_s12 + $0x10] sm:$0xff] %v1908_v6  ;;  %v1990_v43 = vadd.f32 %v1989_v56, %v1908_v6  ;;  %v2005_v11 = vmul.f32 %v1908_v6, %v1908_v6 }
 0x182   : > { %v1975_v12 = vadd.f32 %v1968_v63, %v1967_v2  ;;  %v3310_v50 = vadd.f32 %v1755_v10, %v984_v41 }
 0x183   : > { %1940 = vst [vmem:[%s4131_s25 + $0x18] sm:$0xff] %v3309_v42  ;;  %v2012_v13 = vadd.f32 %v2011_v0, %v2005_v11  ;;  %v2983_v15 = vpop.f32.mrb[12].mxu1  ;;  %v1991_v51 = vadd.f32 %v2980_v1, %v1990_v43  ;;  %v1970_v17 = vmul.f32 %v3309_v42, %v3309_v42 }
 0x184   : > { %1939 = vst [vmem:[%s4131_s25 + $0x10] sm:$0xff] %v3310_v50  ;;  %v1954_v21 = vadd.f32 %v3310_v50, %v1953_v5  ;;  %v1969_v14 = vmul.f32 %v3310_v50, %v3310_v50  ;;  %v2939_v16 = vpop.f32.mrb[4].mxu0  ;;  %1950 = vst [vmem:[%s4125_s12 + $0x28] sm:$0xff] %v2983_v15  ;;  %v2008_v60 = vmul.f32 %v2983_v15, %v2983_v15  ;;  %v1918_v18 = vpop.f32.mrb[13].mxu1 }
 0x185   : > { %v3311_v25 = vadd.f32 %v2939_v16, %v2719_v44  ;;  %v1765_v61 = vpop.f32.mrb[5].mxu0  ;;  %1949 = vst [vmem:[%s4125_s12 + $0x20] sm:$0xff] %v1918_v18  ;;  %v1992_v19 = vadd.f32 %v1991_v51, %v1918_v18  ;;  %v2007_v20 = vmul.f32 %v1918_v18, %v1918_v18  ;;  %v2013_v27 = vadd.f32 %v2012_v13, %v2006_v9 }
 0x186   : > { %v1976_v22 = vadd.f32 %v1975_v12, %v1969_v14  ;;  %v3312_v29 = vadd.f32 %v1765_v61, %v994_v45  ;;  %v1955_v23 = vadd.f32 %v3309_v42, %v1954_v21 }
 0x187   : > { %1942 = vst [vmem:[%s4131_s25 + $0x28] sm:$0xff] %v3311_v25  ;;  %v2014_v24 = vadd.f32 %v2013_v27, %v2007_v20  ;;  %v2986_v26 = vpop.f32.mrb[14].mxu1  ;;  %v1993_v28 = vadd.f32 %v2983_v15, %v1992_v19  ;;  %v1972_v47 = vmul.f32 %v3311_v25, %v3311_v25 }
 0x188   : > { %1941 = vst [vmem:[%s4131_s25 + $0x20] sm:$0xff] %v3312_v29  ;;  %v1956_v30 = vadd.f32 %v3312_v29, %v1955_v23  ;;  %v1971_v38 = vmul.f32 %v3312_v29, %v3312_v29  ;;  %v1977_v31 = vadd.f32 %v1976_v22, %v1970_v17  ;;  %v2942_v8 = vpop.f32.mrb[6].mxu0  ;;  %1952 = vst [vmem:[%s4125_s12 + $0x38] sm:$0xff] %v2986_v26  ;;  %v1928_v33 = vpop.f32.mrb[15].mxu1 }
 0x189   : > { %v2010_v32 = vmul.f32 %v2986_v26, %v2986_v26  ;;  %v3313_v34 = vadd.f32 %v2942_v8, %v4117_v62  ;;  %v1775_v35 = vpop.f32.mrb[7].mxu0  ;;  %1951 = vst [vmem:[%s4125_s12 + $0x30] sm:$0xff] %v1928_v33  ;;  %v1994_v36 = vadd.f32 %v1993_v28, %v1928_v33  ;;  %v2009_v37 = vmul.f32 %v1928_v33, %v1928_v33 }
 0x18a   : > { %v2015_v53 = vadd.f32 %v2014_v24, %v2008_v60  ;;  %v1978_v39 = vadd.f32 %v1977_v31, %v1971_v38  ;;  %v3314_v49 = vadd.f32 %v1775_v35, %v4119_v46  ;;  %v1957_v40 = vadd.f32 %v3311_v25, %v1956_v30 }
 0x18b   : > { %1944 = vst [vmem:[%s4131_s25 + $0x38] sm:$0xff] %v3313_v34  ;;  %v1995_v58 = vadd.f32 %v2986_v26, %v1994_v36  ;;  %v1974_v48 = vmul.f32 %v3313_v34, %v3313_v34 }
 0x18c   : > { %v2016_v41 = vadd.f32 %v2015_v53, %v2009_v37  ;;  %1943 = vst [vmem:[%s4131_s25 + $0x30] sm:$0xff] %v3314_v49  ;;  %v1958_v44 = vadd.f32 %v3314_v49, %v1957_v40  ;;  %v1973_v45 = vmul.f32 %v3314_v49, %v3314_v49  ;;  %v1979_v4 = vadd.f32 %v1978_v39, %v1972_v47 }
 0x18d   : > { %v1996_v7 = vrot.slane %v1995_v58, 4 }
 0x18e   : > { %v2017_v62 = vadd.f32 %v2016_v41, %v2010_v32  ;;  %v1959_v52 = vadd.f32 %v3313_v34, %v1958_v44  ;;  %v1980_v54 = vadd.f32 %v1979_v4, %v1973_v45 }
 0x18f   : > { %v1997_v55 = vadd.f32 %v1996_v7, %v1995_v58 }
 0x190   : > { %v2018_v56 = vrot.slane %v2017_v62, 4  ;;  %v1960_v57 = vrot.slane %v1959_v52, 4  ;;  %v1981_v59 = vadd.f32 %v1980_v54, %v1974_v48 }
 0x191   : > { %v1998_v63 = vrot.slane %v1997_v55, 2 }
 0x192   : > { %v2019_v46 = vadd.f32 %v2018_v56, %v2017_v62  ;;  %v1961_v0 = vadd.f32 %v1960_v57, %v1959_v52  ;;  %v1982_v1 = vrot.slane %v1981_v59, 4 }
 0x193   : > { %v1999_v5 = vadd.f32 %v1998_v63, %v1997_v55 }
 0x194   : > { %v2020_v2 = vrot.slane %v2019_v46, 2  ;;  %v1962_v3 = vrot.slane %v1961_v0, 2  ;;  %v1983_v6 = vadd.f32 %v1982_v1, %v1981_v59 }
 0x195   : > { %v2000_v42 = vrot.slane %v1999_v5, 1 }
 0x196   : > { %v2021_v9 = vadd.f32 %v2020_v2, %v2019_v46  ;;  %v1963_v10 = vadd.f32 %v1962_v3, %v1961_v0  ;;  %v1984_v43 = vrot.slane %v1983_v6, 2 }
 0x197   : > { %v2001_v11 = vadd.f32 %v2000_v42, %v1999_v5 }
 0x198   : > { %v2022_v12 = vrot.slane %v2021_v9, 1  ;;  %v1964_v50 = vrot.slane %v1963_v10, 1  ;;  %v1985_v13 = vadd.f32 %v1984_v43, %v1983_v6 }
 0x199   : > { %2002 = vst [vmem:[%s335_s16 + $0x2] sm:$0x1] %v2001_v11 }
 0x19a   : > { %v2023_v15 = vadd.f32 %v2022_v12, %v2021_v9  ;;  %v1965_v51 = vadd.f32 %v1964_v50, %v1963_v10  ;;  %v1986_v21 = vrot.slane %v1985_v13, 1 }
 0x19c   : > { %2024 = vst [vmem:[%s335_s16 + $0x3] sm:$0x1] %v2023_v15  ;;  %1966 = vst [vmem:[%s335_s16] sm:$0x1] %v1965_v51  ;;  %v1987_v14 = vadd.f32 %v1986_v21, %v1985_v13 }
 0x19e   : > { %1988 = vst [vmem:[%s335_s16 + $0x1] sm:$0x1] %v1987_v14 }
 0x19f PF: > { %s18_s24 = sadd.s32 1, %s3387_s24  }
 0x1a0   : > { %p15_p5 = scmp.ge.s32.totalorder %s18_s24, 4  }
 0x1a2   :  { %17 = sbr.rel (!%p15_p5) target bundleno = 1 (0x1), region = 107 }

</bundles_post_ra>
